<compile_context>
chip_gen: v5e
topology: v5e:2x2
jax: 0.10.0
libtpu: 0.0.40
codegen_flags: <defaults>
</compile_context>

<pallas_src>
import functools

import jax
import jax.numpy as jnp
import numpy as np
from jax import lax
from jax.experimental import pallas as pl
from jax.experimental.pallas import tpu as pltpu

NUM_GROUPS = 32
EPS = 1e-6


def _pick_tile(n, cap):
    """Largest power-of-two tile <= cap that divides n (falls back to n itself)."""
    for t in (2048, 1024, 512, 256, 128, 64, 32, 16, 8):
        if t <= cap and n % t == 0:
            return t
    return n


# --------------------------------------------------------------------------------------
# Resident kernel: one grid step per batch element, q/k/v VMEM-resident.
# --------------------------------------------------------------------------------------
def _attn_resident_kernel(x_ref, g1_ref, g2_ref, vec_ref, wqkv_ref, wp_ref, out_ref,
                          q_scr, k_scr, v_scr, *flash_scr, tq, tkv):
    HW, C = x_ref.shape
    n_q = HW // tq
    n_kv = HW // tkv

    # ---- GroupNorm statistics (f32 row-tiled column sums) -------------------------------
    # NOTE: single-pass E[x^2]-E[x]^2; fine for normalized activations, switch to a two-pass
    # centered sum if large-mean real checkpoints need tighter parity.
    def _stats_body(i, carry):
        cs, css = carry
        r0 = pl.multiple_of(i * tq, tq)
        xt = x_ref[pl.ds(r0, tq), :]
        return (cs + jnp.sum(xt, axis=0, keepdims=True),
                css + jnp.sum(xt * xt, axis=0, keepdims=True))

    zero = jnp.zeros((1, C), jnp.float32)
    colsum, colsumsq = lax.fori_loop(0, n_q, _stats_body, (zero, zero))

    row = lax.broadcasted_iota(jnp.int32, (2, C), 0)
    stats = jnp.where(row == 0,
                      jnp.broadcast_to(colsum, (2, C)),
                      jnp.broadcast_to(colsumsq, (2, C)))
    # factored group aggregation: (2,C)@(C,G) -> per-group mean / E[x^2] -> (2,G)@(G,C)
    g = jnp.dot(stats, g1_ref[...], preferred_element_type=jnp.float32)
    gstats = jnp.dot(g, g2_ref[...], preferred_element_type=jnp.float32)
    mean = gstats[0:1, :]
    var = gstats[1:2, :] - mean * mean           # biased variance (matches torch GroupNorm)
    inv_std = lax.rsqrt(var + EPS)
    scale = vec_ref[0:1, :] * inv_std            # gamma * inv_std
    shift = vec_ref[1:2, :] - mean * scale       # beta - mean * gamma * inv_std
    bq = vec_ref[2:3, :]                         # pre-scaled by C**-0.5 on the host
    bk = vec_ref[3:4, :]
    bv = vec_ref[4:5, :]
    bp = vec_ref[5:6, :]

    # ---- normalize + QKV projection (row-tiled) -> bf16 VMEM scratch ---------------------
    @pl.loop(0, n_q)
    def _(i):
        r0 = pl.multiple_of(i * tq, tq)
        ht = (x_ref[pl.ds(r0, tq), :] * scale + shift).astype(jnp.bfloat16)
        qt = jnp.dot(ht, wqkv_ref[0], preferred_element_type=jnp.float32) + bq
        q_scr[pl.ds(r0, tq), :] = qt.astype(jnp.bfloat16)
        kt = jnp.dot(ht, wqkv_ref[1], preferred_element_type=jnp.float32) + bk
        k_scr[pl.ds(r0, tq), :] = kt.astype(jnp.bfloat16)
        vt = jnp.dot(ht, wqkv_ref[2], preferred_element_type=jnp.float32) + bv
        v_scr[pl.ds(r0, tq), :] = vt.astype(jnp.bfloat16)

    # ---- attention + proj_out + residual, per query tile ---------------------------------
    if n_kv == 1:
        # single KV tile: plain softmax, no online-softmax carry
        @pl.loop(0, n_q)
        def _(i):
            r0 = pl.multiple_of(i * tq, tq)
            q_i = q_scr[pl.ds(r0, tq), :]
            s = lax.dot_general(q_i, k_scr[...], (((1,), (1,)), ((), ())),
                                preferred_element_type=jnp.float32)     # (tq, HW)
            m = jnp.max(s, axis=-1, keepdims=True)
            p = jnp.exp(s - m)
            l = jnp.sum(p, axis=-1, keepdims=True)
            o = jnp.dot(p.astype(jnp.bfloat16), v_scr[...],
                        preferred_element_type=jnp.float32)
            o = o * pl.reciprocal(l, approx=False)
            proj = jnp.dot(o.astype(jnp.bfloat16), wp_ref[...],
                           preferred_element_type=jnp.float32) + bp
            out_ref[pl.ds(r0, tq), :] = x_ref[pl.ds(r0, tq), :] + proj
    else:
        m_scr, l_scr, acc_scr = flash_scr

        @pl.loop(0, n_q)
        def _(i):
            r0 = pl.multiple_of(i * tq, tq)
            q_i = q_scr[pl.ds(r0, tq), :]
            m_scr[...] = jnp.full_like(m_scr, -jnp.inf)
            l_scr[...] = jnp.zeros_like(l_scr)
            acc_scr[...] = jnp.zeros_like(acc_scr)

            @pl.loop(0, n_kv)
            def _(j):
                c0 = pl.multiple_of(j * tkv, tkv)
                k_j = k_scr[pl.ds(c0, tkv), :]
                v_j = v_scr[pl.ds(c0, tkv), :]
                s = lax.dot_general(q_i, k_j, (((1,), (1,)), ((), ())),
                                    preferred_element_type=jnp.float32)  # (tq, tkv)
                m_p = m_scr[...]
                m_n = jnp.maximum(m_p, jnp.max(s, axis=-1, keepdims=True))
                alpha = jnp.exp(m_p - m_n)
                p = jnp.exp(s - m_n)
                l_scr[...] = alpha * l_scr[...] + jnp.sum(p, axis=-1, keepdims=True)
                acc_scr[...] = alpha * acc_scr[...] + jnp.dot(
                    p.astype(jnp.bfloat16), v_j, preferred_element_type=jnp.float32)
                m_scr[...] = m_n

            o = acc_scr[...] * pl.reciprocal(l_scr[...], approx=False)
            proj = jnp.dot(o.astype(jnp.bfloat16), wp_ref[...],
                           preferred_element_type=jnp.float32) + bp
            out_ref[pl.ds(r0, tq), :] = x_ref[pl.ds(r0, tq), :] + proj


# --------------------------------------------------------------------------------------
# Streaming fallback kernels (used when the resident plan does not fit the VMEM budget).
# --------------------------------------------------------------------------------------
def _qkv_proj_kernel(x_ref, ss_ref, vec_ref, wqkv_ref, q_ref, k_ref, v_ref):
    ht = (x_ref[...] * ss_ref[0:1, :] + ss_ref[1:2, :]).astype(jnp.bfloat16)
    q_ref[...] = (jnp.dot(ht, wqkv_ref[0], preferred_element_type=jnp.float32)
                  + vec_ref[2:3, :]).astype(jnp.bfloat16)
    k_ref[...] = (jnp.dot(ht, wqkv_ref[1], preferred_element_type=jnp.float32)
                  + vec_ref[3:4, :]).astype(jnp.bfloat16)
    v_ref[...] = (jnp.dot(ht, wqkv_ref[2], preferred_element_type=jnp.float32)
                  + vec_ref[4:5, :]).astype(jnp.bfloat16)


def _flash_stream_kernel(q_ref, k_ref, v_ref, x_ref, vec_ref, wp_ref, out_ref,
                         m_scr, l_scr, acc_scr):
    j = pl.program_id(2)

    @pl.when(j == 0)
    def _():
        m_scr[...] = jnp.full_like(m_scr, -jnp.inf)
        l_scr[...] = jnp.zeros_like(l_scr)
        acc_scr[...] = jnp.zeros_like(acc_scr)

    s = lax.dot_general(q_ref[...], k_ref[...], (((1,), (1,)), ((), ())),
                        preferred_element_type=jnp.float32)
    m_p = m_scr[...]
    m_n = jnp.maximum(m_p, jnp.max(s, axis=-1, keepdims=True))
    alpha = jnp.exp(m_p - m_n)
    p = jnp.exp(s - m_n)
    l_scr[...] = alpha * l_scr[...] + jnp.sum(p, axis=-1, keepdims=True)
    acc_scr[...] = alpha * acc_scr[...] + jnp.dot(p.astype(jnp.bfloat16), v_ref[...],
                                                  preferred_element_type=jnp.float32)
    m_scr[...] = m_n

    @pl.when(j == pl.num_programs(2) - 1)
    def _():
        o = acc_scr[...] * pl.reciprocal(l_scr[...], approx=False)
        proj = jnp.dot(o.astype(jnp.bfloat16), wp_ref[...],
                       preferred_element_type=jnp.float32) + vec_ref[5:6, :]
        out_ref[...] = x_ref[...] + proj


def _attn_streaming(x, vecs, wqkv, wp_b, gamma, beta, *, vmem_limit):
    B, HW, C = x.shape
    cg = C // NUM_GROUPS

    # GroupNorm stats in plain JAX (extra HBM passes over x; only taken when the resident
    # plan does not fit VMEM).
    xg = x.reshape(B, HW, NUM_GROUPS, cg)
    mean_g = jnp.mean(xg, axis=(1, 3))
    var_g = jnp.mean(xg * xg, axis=(1, 3)) - mean_g * mean_g
    mean_c = jnp.repeat(mean_g, cg, axis=1)
    inv_std_c = lax.rsqrt(jnp.repeat(var_g, cg, axis=1) + EPS)
    scale = gamma[None, :] * inv_std_c
    shift = beta[None, :] - mean_c * scale
    ss = jnp.stack([scale, shift], axis=1)                           # (B, 2, C)

    tp = _pick_tile(HW, 512)
    q, k, v = pl.pallas_call(
        _qkv_proj_kernel,
        out_shape=[jax.ShapeDtypeStruct((B, HW, C), jnp.bfloat16)] * 3,
        grid_spec=pltpu.PrefetchScalarGridSpec(
            num_scalar_prefetch=0,
            grid=(B, HW // tp),
            in_specs=[pl.BlockSpec((None, tp, C), lambda b, i: (b, i, 0)),
                      pl.BlockSpec((None, 2, C), lambda b, i: (b, 0, 0)),
                      pl.BlockSpec((8, C), lambda b, i: (0, 0),
                                   pipeline_mode=pl.Buffered(1)),
                      pl.BlockSpec((3, C, C), lambda b, i: (0, 0, 0),
                                   pipeline_mode=pl.Buffered(1))],
            out_specs=[pl.BlockSpec((None, tp, C), lambda b, i: (b, i, 0))] * 3),
        compiler_params=pltpu.CompilerParams(
            dimension_semantics=("parallel", "parallel"),
            vmem_limit_bytes=vmem_limit),
    )(x, ss, vecs, wqkv)

    tq = _pick_tile(HW, 256)
    tkv = _pick_tile(HW, 512)
    out = pl.pallas_call(
        _flash_stream_kernel,
        out_shape=jax.ShapeDtypeStruct((B, HW, C), jnp.float32),
        grid_spec=pltpu.PrefetchScalarGridSpec(
            num_scalar_prefetch=0,
            grid=(B, HW // tq, HW // tkv),
            in_specs=[pl.BlockSpec((None, tq, C), lambda b, i, j: (b, i, 0)),
                      pl.BlockSpec((None, tkv, C), lambda b, i, j: (b, j, 0)),
                      pl.BlockSpec((None, tkv, C), lambda b, i, j: (b, j, 0)),
                      pl.BlockSpec((None, tq, C), lambda b, i, j: (b, i, 0)),
                      pl.BlockSpec((8, C), lambda b, i, j: (0, 0),
                                   pipeline_mode=pl.Buffered(1)),
                      pl.BlockSpec((C, C), lambda b, i, j: (0, 0),
                                   pipeline_mode=pl.Buffered(1))],
            out_specs=pl.BlockSpec((None, tq, C), lambda b, i, j: (b, i, 0)),
            scratch_shapes=[pltpu.VMEM((tq, 1), jnp.float32),
                            pltpu.VMEM((tq, 1), jnp.float32),
                            pltpu.VMEM((tq, C), jnp.float32)]),
        compiler_params=pltpu.CompilerParams(
            dimension_semantics=("parallel", "parallel", "arbitrary"),
            vmem_limit_bytes=vmem_limit),
    )(q, k, v, x, vecs, wp_b)
    return out


# --------------------------------------------------------------------------------------
# Wrapper
# --------------------------------------------------------------------------------------
def attn_block_pallas(x_nchw, params, *, max_tkv=None, force_streaming=False):
    """x_nchw: (B, C, H, W) float32. Returns (B, C, H, W) float32."""
    B, C, H, W = x_nchw.shape
    assert C % NUM_GROUPS == 0, "GroupNorm(32) requires C % 32 == 0"
    HW = H * W
    cg = C // NUM_GROUPS

    # channels-last: C on the lane axis, all 1x1 convs become (HW,C)@(C,C) MXU matmuls.
    x = jnp.transpose(x_nchw, (0, 2, 3, 1)).reshape(B, HW, C).astype(jnp.float32)

    # fold the attention scale C**-0.5 into the q projection (weight + bias)
    s = float(C) ** (-0.5)
    wq_t = params["wq"][:, :, 0, 0].T * s
    wk_t = params["wk"][:, :, 0, 0].T
    wv_t = params["wv"][:, :, 0, 0].T
    wqkv = jnp.stack([wq_t, wk_t, wv_t], axis=0).astype(jnp.bfloat16)    # (3, C, C)
    wp_b = params["wp"][:, :, 0, 0].T.astype(jnp.bfloat16)               # (C, C)

    # gamma/beta and all biases packed into one (8, C) slab
    vecs = jnp.zeros((8, C), jnp.float32)
    vecs = vecs.at[0].set(params["gamma"])
    vecs = vecs.at[1].set(params["beta"])
    vecs = vecs.at[2].set(params["bq"] * s)
    vecs = vecs.at[3].set(params["bk"])
    vecs = vecs.at[4].set(params["bv"])
    vecs = vecs.at[5].set(params["bp"])

    # factored group-aggregation matrices (with 1/(cg*HW) baked in) — tiny constants
    gidx = np.arange(C) // cg
    g1 = jnp.asarray((gidx[:, None] == np.arange(NUM_GROUPS)[None, :]).astype(np.float32)
                     / float(cg * HW))                                   # (C, 32)
    g2 = jnp.asarray((np.arange(NUM_GROUPS)[:, None] == gidx[None, :]).astype(np.float32))  # (32, C)

    # VMEM budget: physical capacity minus headroom for Mosaic internal scratch
    # (~8 MiB on 64 MiB parts, ~16 MiB on 128 MiB parts).
    try:
        vmem_cap = int(pltpu.get_tpu_info().vmem_capacity_bytes)
    except Exception:
        vmem_cap = 64 * 1024 * 1024
    budget = vmem_cap - max(8 * 1024 * 1024, vmem_cap // 8)

    # tiling: K/V are VMEM-resident, so tkv can be large (smaller on 64 MiB parts)
    tq = _pick_tile(HW, 256)
    tkv_cap = 2048 if vmem_cap > 64 * 1024 * 1024 else 1024
    if max_tkv is not None:
        tkv_cap = min(tkv_cap, max_tkv)
    tkv = _pick_tile(HW, min(HW, tkv_cap))
    n_kv = HW // tkv

    # resident-plan VMEM estimate
    const_bytes = (g1.size + g2.size + vecs.size) * 4 + (wqkv.size + wp_b.size) * 2
    flash_bytes = (tq * C + 2 * tq * 128) * 4 if n_kv > 1 else 0
    temp_bytes = 3 * tq * max(tkv, C) * 4 + 4 * tq * C * 4
    qkv_scr_bytes = 3 * HW * C * 2
    xout_single = 2 * HW * C * 4
    est_single = xout_single + qkv_scr_bytes + const_bytes + flash_bytes + temp_bytes
    est_double = est_single + xout_single

    if force_streaming or est_single > budget:
        out = _attn_streaming(x, vecs, wqkv, wp_b,
                              params["gamma"].astype(jnp.float32),
                              params["beta"].astype(jnp.float32),
                              vmem_limit=budget)
    else:
        double_big = est_double <= budget

        def _big_spec():
            if double_big:
                return pl.BlockSpec((None, HW, C), lambda b: (b, 0, 0))
            return pl.BlockSpec((None, HW, C), lambda b: (b, 0, 0),
                                pipeline_mode=pl.Buffered(1))

        def _const2(shape):
            return pl.BlockSpec(shape, lambda b: (0, 0), pipeline_mode=pl.Buffered(1))

        in_specs = [_big_spec(),                       # x
                    _const2((C, NUM_GROUPS)),          # g1
                    _const2((NUM_GROUPS, C)),          # g2
                    _const2((8, C)),                   # vecs
                    pl.BlockSpec((3, C, C), lambda b: (0, 0, 0),
                                 pipeline_mode=pl.Buffered(1)),          # wqkv
                    _const2((C, C))]                   # wp

        scratch = [pltpu.VMEM((HW, C), jnp.bfloat16),  # q
                   pltpu.VMEM((HW, C), jnp.bfloat16),  # k
                   pltpu.VMEM((HW, C), jnp.bfloat16)]  # v
        if n_kv > 1:
            scratch += [pltpu.VMEM((tq, 1), jnp.float32),   # m
                        pltpu.VMEM((tq, 1), jnp.float32),   # l
                        pltpu.VMEM((tq, C), jnp.float32)]   # acc

        kernel = functools.partial(_attn_resident_kernel, tq=tq, tkv=tkv)
        out = pl.pallas_call(
            kernel,
            out_shape=jax.ShapeDtypeStruct((B, HW, C), jnp.float32),
            grid_spec=pltpu.PrefetchScalarGridSpec(
                num_scalar_prefetch=0,
                grid=(B,),
                in_specs=in_specs,
                out_specs=_big_spec(),
                scratch_shapes=scratch),
            compiler_params=pltpu.CompilerParams(
                dimension_semantics=("parallel",),
                vmem_limit_bytes=budget),
        )(x, g1, g2, vecs, wqkv, wp_b)

    return jnp.transpose(out.reshape(B, H, W, C), (0, 3, 1, 2))


# --------------------------------------------------------------------------------------
# Pure-JAX f32 reference mirroring the PyTorch forward (for validation)
# --------------------------------------------------------------------------------------
def attn_block_ref(x_nchw, params):
    B, C, H, W = x_nchw.shape
    x = x_nchw.astype(jnp.float32)
    cg = C // NUM_GROUPS
    xg = x.reshape(B, NUM_GROUPS, cg, H, W)
    mu = xg.mean(axis=(2, 3, 4), keepdims=True)
    var = ((xg - mu) ** 2).mean(axis=(2, 3, 4), keepdims=True)
    hn = ((xg - mu) / jnp.sqrt(var + EPS)).reshape(B, C, H, W)
    hn = hn * params["gamma"][None, :, None, None] + params["beta"][None, :, None, None]

    def conv1x1(h, w, b):
        return jnp.einsum("bchw,oc->bohw", h, w[:, :, 0, 0]) + b[None, :, None, None]

    q = conv1x1(hn, params["wq"], params["bq"]).reshape(B, C, H * W).transpose(0, 2, 1)
    k = conv1x1(hn, params["wk"], params["bk"]).reshape(B, C, H * W)
    v = conv1x1(hn, params["wv"], params["bv"]).reshape(B, C, H * W)
    w_ = jnp.einsum("bic,bcj->bij", q, k) * (float(C) ** -0.5)
    w_ = jax.nn.softmax(w_, axis=2)
    h_ = jnp.einsum("bcj,bij->bci", v, w_).reshape(B, C, H, W)
    h_ = conv1x1(h_, params["wp"], params["bp"])
    return x + h_


def init_params(key, C):
    ks = jax.random.split(key, 9)
    s = 0.05
    return {
        "gamma": 1.0 + 0.1 * jax.random.normal(ks[0], (C,), jnp.float32),
        "beta": 0.1 * jax.random.normal(ks[1], (C,), jnp.float32),
        "wq": s * jax.random.normal(ks[2], (C, C, 1, 1), jnp.float32),
        "bq": s * jax.random.normal(ks[3], (C,), jnp.float32),
        "wk": s * jax.random.normal(ks[4], (C, C, 1, 1), jnp.float32),
        "bk": s * jax.random.normal(ks[5], (C,), jnp.float32),
        "wv": s * jax.random.normal(ks[6], (C, C, 1, 1), jnp.float32),
        "bv": s * jax.random.normal(ks[7], (C,), jnp.float32),
        "wp": s * jax.random.normal(ks[8], (C, C, 1, 1), jnp.float32),
        "bp": jnp.zeros((C,), jnp.float32),
    }


if __name__ == "__main__":
    key = jax.random.PRNGKey(0)
    configs = [
        # (B, C, H, W), kwargs
        ((2, 64, 16, 16), {}),                             # resident, single KV tile, C<128
        ((2, 128, 32, 32), {"max_tkv": 256}),              # resident, multi-KV online softmax
        ((2, 64, 16, 16), {"force_streaming": True}),      # streaming fallback path
    ]
    for (B, C, H, W), kwargs in configs:
        key, kx, kp = jax.random.split(key, 3)
        x = jax.random.normal(kx, (B, C, H, W), jnp.float32)
        params = init_params(kp, C)

        out = jax.block_until_ready(attn_block_pallas(x, params, **kwargs))
        ref = jax.block_until_ready(attn_block_ref(x, params))

        # bf16 MXU operands with f32 accumulation -> looser tolerance than the pure-f32 ref
        np.testing.assert_allclose(np.asarray(out), np.asarray(ref), rtol=3e-2, atol=3e-2)

    print("KERNEL_OK")
</pallas_src>

<mosaic_0001>
module attributes {stable_mosaic.version = 11 : i64} {
  func.func @_attn_resident_kernel(%arg0: i32, %arg1: memref<1x256x64xf32, #tpu.memory_space<vmem>>, %arg2: memref<64x32xf32, #tpu.memory_space<vmem>>, %arg3: memref<32x64xf32, #tpu.memory_space<vmem>>, %arg4: memref<8x64xf32, #tpu.memory_space<vmem>>, %arg5: memref<3x64x64xbf16, #tpu.memory_space<vmem>>, %arg6: memref<64x64xbf16, #tpu.memory_space<vmem>>, %arg7: memref<1x256x64xf32, #tpu.memory_space<vmem>>, %arg8: memref<256x64xbf16, #tpu.memory_space<vmem>>, %arg9: memref<256x64xbf16, #tpu.memory_space<vmem>>, %arg10: memref<256x64xbf16, #tpu.memory_space<vmem>>) attributes {dimension_semantics = [#tpu.dimension_semantics<parallel>], iteration_bounds = array<i64: 2>, scalar_prefetch = 0 : i64, scratch_operands = 3 : i64, tpu.core_type = #tpu.core_type<tc>, window_params = [{transform_indices = @transform_0, window_bounds = array<i64: 1, 256, 64>}, {pipeline_mode = #tpu.pipeline_mode<synchronous>, transform_indices = @transform_1, window_bounds = array<i64: 64, 32>}, {pipeline_mode = #tpu.pipeline_mode<synchronous>, transform_indices = @transform_2, window_bounds = array<i64: 32, 64>}, {pipeline_mode = #tpu.pipeline_mode<synchronous>, transform_indices = @transform_3, window_bounds = array<i64: 8, 64>}, {pipeline_mode = #tpu.pipeline_mode<synchronous>, transform_indices = @transform_4, window_bounds = array<i64: 3, 64, 64>}, {pipeline_mode = #tpu.pipeline_mode<synchronous>, transform_indices = @transform_5, window_bounds = array<i64: 64, 64>}, {transform_indices = @transform_6, window_bounds = array<i64: 1, 256, 64>}]} {
    %cst = arith.constant 0.000000e+00 : f32
    %0 = vector.broadcast %cst : f32 to vector<1x64xf32>
    %c0_i32 = arith.constant 0 : i32
    %c256_i32 = arith.constant 256 : i32
    %1 = arith.muli %c0_i32, %c256_i32 : i32
    %2 = tpu.assume_multiple %1, 256 : i32
    %c0 = arith.constant 0 : index
    %3 = arith.index_cast %2 : i32 to index
    %c0_0 = arith.constant 0 : index
    %4 = vector.load %arg1[%c0, %3, %c0_0] : memref<1x256x64xf32, #tpu.memory_space<vmem>>, vector<1x256x64xf32>
    %5 = vector.shape_cast %4 : vector<1x256x64xf32> to vector<256x64xf32>
    %cst_1 = arith.constant dense<0.000000e+00> : vector<64xf32>
    %6 = vector.multi_reduction <add>, %5, %cst_1 [0] : vector<256x64xf32> to vector<64xf32>
    %7 = vector.shape_cast %6 : vector<64xf32> to vector<1x64xf32>
    %8 = arith.addf %0, %7 : vector<1x64xf32>
    %9 = arith.mulf %5, %5 : vector<256x64xf32>
    %cst_2 = arith.constant dense<0.000000e+00> : vector<64xf32>
    %10 = vector.multi_reduction <add>, %9, %cst_2 [0] : vector<256x64xf32> to vector<64xf32>
    %11 = vector.shape_cast %10 : vector<64xf32> to vector<1x64xf32>
    %12 = arith.addf %0, %11 : vector<1x64xf32>
    %c1_i32 = arith.constant 1 : i32
    %13 = tpu.iota {dimensions = array<i32: 0>} : vector<2x64xi32>
    %c0_i32_3 = arith.constant 0 : i32
    %14 = vector.broadcast %c0_i32_3 : i32 to vector<2x64xi32>
    %15 = arith.cmpi eq, %13, %14 : vector<2x64xi32>
    %16 = vector.shape_cast %8 : vector<1x64xf32> to vector<1x64xf32>
    %17 = vector.broadcast %16 : vector<1x64xf32> to vector<2x64xf32>
    %18 = vector.shape_cast %12 : vector<1x64xf32> to vector<1x64xf32>
    %19 = vector.broadcast %18 : vector<1x64xf32> to vector<2x64xf32>
    %20 = arith.select %15, %17, %19 : vector<2x64xi1>, vector<2x64xf32>
    %c0_4 = arith.constant 0 : index
    %c0_5 = arith.constant 0 : index
    %21 = vector.load %arg2[%c0_4, %c0_5] : memref<64x32xf32, #tpu.memory_space<vmem>>, vector<64x32xf32>
    %cst_6 = arith.constant dense<0.000000e+00> : vector<2x32xf32>
    %22 = tpu.matmul %20, %21, %cst_6 {dimension_numbers = #tpu.dot_dimension_numbers<[1], [0], [0], [1], [0, 0, 1, 1], [], []>} : vector<2x64xf32>, vector<64x32xf32>, vector<2x32xf32> -> vector<2x32xf32>
    %c0_7 = arith.constant 0 : index
    %c0_8 = arith.constant 0 : index
    %23 = vector.load %arg3[%c0_7, %c0_8] : memref<32x64xf32, #tpu.memory_space<vmem>>, vector<32x64xf32>
    %cst_9 = arith.constant dense<0.000000e+00> : vector<2x64xf32>
    %24 = tpu.matmul %22, %23, %cst_9 {dimension_numbers = #tpu.dot_dimension_numbers<[1], [0], [0], [1], [0, 0, 1, 1], [], []>} : vector<2x32xf32>, vector<32x64xf32>, vector<2x64xf32> -> vector<2x64xf32>
    %25 = vector.extract_strided_slice %24 {offsets = [0, 0], sizes = [1, 64], strides = [1, 1]} : vector<2x64xf32> to vector<1x64xf32>
    %26 = vector.extract_strided_slice %24 {offsets = [1, 0], sizes = [1, 64], strides = [1, 1]} : vector<2x64xf32> to vector<1x64xf32>
    %27 = arith.mulf %25, %25 : vector<1x64xf32>
    %28 = arith.subf %26, %27 : vector<1x64xf32>
    %cst_10 = arith.constant 9.99999997E-7 : f32
    %29 = vector.broadcast %cst_10 : f32 to vector<1x64xf32>
    %30 = arith.addf %28, %29 : vector<1x64xf32>
    %31 = math.rsqrt %30 : vector<1x64xf32>
    %c0_11 = arith.constant 0 : index
    %c0_12 = arith.constant 0 : index
    %32 = vector.load %arg4[%c0_11, %c0_12] : memref<8x64xf32, #tpu.memory_space<vmem>>, vector<1x64xf32>
    %33 = arith.mulf %32, %31 : vector<1x64xf32>
    %c1 = arith.constant 1 : index
    %c0_13 = arith.constant 0 : index
    %34 = vector.load %arg4[%c1, %c0_13] : memref<8x64xf32, #tpu.memory_space<vmem>>, vector<1x64xf32>
    %35 = arith.mulf %25, %33 : vector<1x64xf32>
    %36 = arith.subf %34, %35 : vector<1x64xf32>
    %c2 = arith.constant 2 : index
    %c0_14 = arith.constant 0 : index
    %37 = vector.load %arg4[%c2, %c0_14] : memref<8x64xf32, #tpu.memory_space<vmem>>, vector<1x64xf32>
    %c3 = arith.constant 3 : index
    %c0_15 = arith.constant 0 : index
    %38 = vector.load %arg4[%c3, %c0_15] : memref<8x64xf32, #tpu.memory_space<vmem>>, vector<1x64xf32>
    %c4 = arith.constant 4 : index
    %c0_16 = arith.constant 0 : index
    %39 = vector.load %arg4[%c4, %c0_16] : memref<8x64xf32, #tpu.memory_space<vmem>>, vector<1x64xf32>
    %c5 = arith.constant 5 : index
    %c0_17 = arith.constant 0 : index
    %40 = vector.load %arg4[%c5, %c0_17] : memref<8x64xf32, #tpu.memory_space<vmem>>, vector<1x64xf32>
    %c0_i32_18 = arith.constant 0 : i32
    %c1_i32_19 = arith.constant 1 : i32
    %41 = arith.muli %c0_i32_18, %c1_i32_19 : i32
    %c0_i32_20 = arith.constant 0 : i32
    %42 = arith.addi %c0_i32_20, %41 : i32
    %c256_i32_21 = arith.constant 256 : i32
    %43 = arith.muli %42, %c256_i32_21 : i32
    %44 = tpu.assume_multiple %43, 256 : i32
    %c0_22 = arith.constant 0 : index
    %45 = arith.index_cast %44 : i32 to index
    %c0_23 = arith.constant 0 : index
    %46 = vector.load %arg1[%c0_22, %45, %c0_23] : memref<1x256x64xf32, #tpu.memory_space<vmem>>, vector<1x256x64xf32>
    %47 = vector.shape_cast %46 : vector<1x256x64xf32> to vector<256x64xf32>
    %48 = vector.broadcast %33 : vector<1x64xf32> to vector<256x64xf32>
    %49 = arith.mulf %47, %48 : vector<256x64xf32>
    %50 = vector.broadcast %36 : vector<1x64xf32> to vector<256x64xf32>
    %51 = arith.addf %49, %50 : vector<256x64xf32>
    %52 = arith.truncf %51 : vector<256x64xf32> to vector<256x64xbf16>
    %c0_24 = arith.constant 0 : index
    %c0_25 = arith.constant 0 : index
    %c0_26 = arith.constant 0 : index
    %53 = vector.load %arg5[%c0_24, %c0_25, %c0_26] : memref<3x64x64xbf16, #tpu.memory_space<vmem>>, vector<1x64x64xbf16>
    %54 = vector.shape_cast %53 : vector<1x64x64xbf16> to vector<64x64xbf16>
    %cst_27 = arith.constant dense<0.000000e+00> : vector<256x64xf32>
    %55 = tpu.matmul %52, %54, %cst_27 {dimension_numbers = #tpu.dot_dimension_numbers<[1], [0], [0], [1], [0, 0, 1, 1], [], []>} : vector<256x64xbf16>, vector<64x64xbf16>, vector<256x64xf32> -> vector<256x64xf32>
    %56 = vector.broadcast %37 : vector<1x64xf32> to vector<256x64xf32>
    %57 = arith.addf %55, %56 : vector<256x64xf32>
    %58 = arith.truncf %57 : vector<256x64xf32> to vector<256x64xbf16>
    %59 = arith.index_cast %44 : i32 to index
    %c0_28 = arith.constant 0 : index
    %60 = vector.load %arg8[%59, %c0_28] : memref<256x64xbf16, #tpu.memory_space<vmem>>, vector<256x64xbf16>
    tpu.vector_store %arg8[%59, %c0_28], %58 {strides = array<i32>} : memref<256x64xbf16, #tpu.memory_space<vmem>>, vector<256x64xbf16>,
    %c1_29 = arith.constant 1 : index
    %c0_30 = arith.constant 0 : index
    %c0_31 = arith.constant 0 : index
    %61 = vector.load %arg5[%c1_29, %c0_30, %c0_31] : memref<3x64x64xbf16, #tpu.memory_space<vmem>>, vector<1x64x64xbf16>
    %62 = vector.shape_cast %61 : vector<1x64x64xbf16> to vector<64x64xbf16>
    %cst_32 = arith.constant dense<0.000000e+00> : vector<256x64xf32>
    %63 = tpu.matmul %52, %62, %cst_32 {dimension_numbers = #tpu.dot_dimension_numbers<[1], [0], [0], [1], [0, 0, 1, 1], [], []>} : vector<256x64xbf16>, vector<64x64xbf16>, vector<256x64xf32> -> vector<256x64xf32>
    %64 = vector.broadcast %38 : vector<1x64xf32> to vector<256x64xf32>
    %65 = arith.addf %63, %64 : vector<256x64xf32>
    %66 = arith.truncf %65 : vector<256x64xf32> to vector<256x64xbf16>
    %67 = arith.index_cast %44 : i32 to index
    %c0_33 = arith.constant 0 : index
    %68 = vector.load %arg9[%67, %c0_33] : memref<256x64xbf16, #tpu.memory_space<vmem>>, vector<256x64xbf16>
    tpu.vector_store %arg9[%67, %c0_33], %66 {strides = array<i32>} : memref<256x64xbf16, #tpu.memory_space<vmem>>, vector<256x64xbf16>,
    %c2_34 = arith.constant 2 : index
    %c0_35 = arith.constant 0 : index
    %c0_36 = arith.constant 0 : index
    %69 = vector.load %arg5[%c2_34, %c0_35, %c0_36] : memref<3x64x64xbf16, #tpu.memory_space<vmem>>, vector<1x64x64xbf16>
    %70 = vector.shape_cast %69 : vector<1x64x64xbf16> to vector<64x64xbf16>
    %cst_37 = arith.constant dense<0.000000e+00> : vector<256x64xf32>
    %71 = tpu.matmul %52, %70, %cst_37 {dimension_numbers = #tpu.dot_dimension_numbers<[1], [0], [0], [1], [0, 0, 1, 1], [], []>} : vector<256x64xbf16>, vector<64x64xbf16>, vector<256x64xf32> -> vector<256x64xf32>
    %72 = vector.broadcast %39 : vector<1x64xf32> to vector<256x64xf32>
    %73 = arith.addf %71, %72 : vector<256x64xf32>
    %74 = arith.truncf %73 : vector<256x64xf32> to vector<256x64xbf16>
    %75 = arith.index_cast %44 : i32 to index
    %c0_38 = arith.constant 0 : index
    %76 = vector.load %arg10[%75, %c0_38] : memref<256x64xbf16, #tpu.memory_space<vmem>>, vector<256x64xbf16>
    tpu.vector_store %arg10[%75, %c0_38], %74 {strides = array<i32>} : memref<256x64xbf16, #tpu.memory_space<vmem>>, vector<256x64xbf16>,
    %c1_i32_39 = arith.constant 1 : i32
    %c0_i32_40 = arith.constant 0 : i32
    %c1_i32_41 = arith.constant 1 : i32
    %77 = arith.muli %c0_i32_40, %c1_i32_41 : i32
    %c0_i32_42 = arith.constant 0 : i32
    %78 = arith.addi %c0_i32_42, %77 : i32
    %c256_i32_43 = arith.constant 256 : i32
    %79 = arith.muli %78, %c256_i32_43 : i32
    %80 = tpu.assume_multiple %79, 256 : i32
    %81 = arith.index_cast %80 : i32 to index
    %c0_44 = arith.constant 0 : index
    %82 = vector.load %arg8[%81, %c0_44] : memref<256x64xbf16, #tpu.memory_space<vmem>>, vector<256x64xbf16>
    %c0_45 = arith.constant 0 : index
    %c0_46 = arith.constant 0 : index
    %83 = vector.load %arg9[%c0_45, %c0_46] : memref<256x64xbf16, #tpu.memory_space<vmem>>, vector<256x64xbf16>
    %cst_47 = arith.constant dense<0.000000e+00> : vector<256x256xf32>
    %84 = tpu.matmul %82, %83, %cst_47 {dimension_numbers = #tpu.dot_dimension_numbers<[1], [1], [0], [0], [0, 0, 1, 0], [], []>} : vector<256x64xbf16>, vector<256x64xbf16>, vector<256x256xf32> -> vector<256x256xf32>
    %cst_48 = arith.constant dense<0xFF800000> : vector<256xf32>
    %85 = vector.multi_reduction <maximumf>, %84, %cst_48 [1] : vector<256x256xf32> to vector<256xf32>
    %86 = vector.shape_cast %85 : vector<256xf32> to vector<256x1xf32>
    %87 = vector.broadcast %86 : vector<256x1xf32> to vector<256x256xf32>
    %88 = arith.subf %84, %87 : vector<256x256xf32>
    %89 = math.exp %88 : vector<256x256xf32>
    %cst_49 = arith.constant dense<0.000000e+00> : vector<256xf32>
    %90 = vector.multi_reduction <add>, %89, %cst_49 [1] : vector<256x256xf32> to vector<256xf32>
    %91 = vector.shape_cast %90 : vector<256xf32> to vector<256x1xf32>
    %92 = arith.truncf %89 : vector<256x256xf32> to vector<256x256xbf16>
    %c0_50 = arith.constant 0 : index
    %c0_51 = arith.constant 0 : index
    %93 = vector.load %arg10[%c0_50, %c0_51] : memref<256x64xbf16, #tpu.memory_space<vmem>>, vector<256x64xbf16>
    %cst_52 = arith.constant dense<0.000000e+00> : vector<256x64xf32>
    %94 = tpu.matmul %92, %93, %cst_52 {dimension_numbers = #tpu.dot_dimension_numbers<[1], [0], [0], [1], [0, 0, 1, 1], [], []>} : vector<256x256xbf16>, vector<256x64xbf16>, vector<256x64xf32> -> vector<256x64xf32>
    %95 = tpu.reciprocal %91 : vector<256x1xf32> -> vector<256x1xf32>
    %96 = vector.broadcast %95 : vector<256x1xf32> to vector<256x64xf32>
    %97 = arith.mulf %94, %96 : vector<256x64xf32>
    %98 = arith.truncf %97 : vector<256x64xf32> to vector<256x64xbf16>
    %c0_53 = arith.constant 0 : index
    %c0_54 = arith.constant 0 : index
    %99 = vector.load %arg6[%c0_53, %c0_54] : memref<64x64xbf16, #tpu.memory_space<vmem>>, vector<64x64xbf16>
    %cst_55 = arith.constant dense<0.000000e+00> : vector<256x64xf32>
    %100 = tpu.matmul %98, %99, %cst_55 {dimension_numbers = #tpu.dot_dimension_numbers<[1], [0], [0], [1], [0, 0, 1, 1], [], []>} : vector<256x64xbf16>, vector<64x64xbf16>, vector<256x64xf32> -> vector<256x64xf32>
    %101 = vector.broadcast %40 : vector<1x64xf32> to vector<256x64xf32>
    %102 = arith.addf %100, %101 : vector<256x64xf32>
    %c0_56 = arith.constant 0 : index
    %103 = arith.index_cast %80 : i32 to index
    %c0_57 = arith.constant 0 : index
    %104 = vector.load %arg1[%c0_56, %103, %c0_57] : memref<1x256x64xf32, #tpu.memory_space<vmem>>, vector<1x256x64xf32>
    %105 = vector.shape_cast %104 : vector<1x256x64xf32> to vector<256x64xf32>
    %106 = arith.addf %105, %102 : vector<256x64xf32>
    %c0_58 = arith.constant 0 : index
    %107 = arith.index_cast %80 : i32 to index
    %c0_59 = arith.constant 0 : index
    %108 = vector.load %arg7[%c0_58, %107, %c0_59] : memref<1x256x64xf32, #tpu.memory_space<vmem>>, vector<1x256x64xf32>
    %109 = vector.shape_cast %108 : vector<1x256x64xf32> to vector<256x64xf32>
    %110 = vector.shape_cast %106 : vector<256x64xf32> to vector<1x256x64xf32>
    tpu.vector_store %arg7[%c0_58, %107, %c0_59], %110 {strides = array<i32>} : memref<1x256x64xf32, #tpu.memory_space<vmem>>, vector<1x256x64xf32>,
    %c1_i32_60 = arith.constant 1 : i32
    return
  }
  func.func @transform_0(%arg0: i32) -> (i32, i32, i32) {
    %c0_i32 = arith.constant 0 : i32
    %c0_i32_0 = arith.constant 0 : i32
    %c0_i32_1 = arith.constant 0 : i32
    return %arg0, %c0_i32, %c0_i32_0 : i32, i32, i32
  }
  func.func @transform_1(%arg0: i32) -> (i32, i32) {
    %c0_i32 = arith.constant 0 : i32
    %c0_i32_0 = arith.constant 0 : i32
    %c0_i32_1 = arith.constant 0 : i32
    return %c0_i32, %c0_i32_0 : i32, i32
  }
  func.func @transform_2(%arg0: i32) -> (i32, i32) {
    %c0_i32 = arith.constant 0 : i32
    %c0_i32_0 = arith.constant 0 : i32
    %c0_i32_1 = arith.constant 0 : i32
    return %c0_i32, %c0_i32_0 : i32, i32
  }
  func.func @transform_3(%arg0: i32) -> (i32, i32) {
    %c0_i32 = arith.constant 0 : i32
    %c0_i32_0 = arith.constant 0 : i32
    %c0_i32_1 = arith.constant 0 : i32
    return %c0_i32, %c0_i32_0 : i32, i32
  }
  func.func @transform_4(%arg0: i32) -> (i32, i32, i32) {
    %c0_i32 = arith.constant 0 : i32
    %c0_i32_0 = arith.constant 0 : i32
    %c0_i32_1 = arith.constant 0 : i32
    %c0_i32_2 = arith.constant 0 : i32
    return %c0_i32, %c0_i32_0, %c0_i32_1 : i32, i32, i32
  }
  func.func @transform_5(%arg0: i32) -> (i32, i32) {
    %c0_i32 = arith.constant 0 : i32
    %c0_i32_0 = arith.constant 0 : i32
    %c0_i32_1 = arith.constant 0 : i32
    return %c0_i32, %c0_i32_0 : i32, i32
  }
  func.func @transform_6(%arg0: i32) -> (i32, i32, i32) {
    %c0_i32 = arith.constant 0 : i32
    %c0_i32_0 = arith.constant 0 : i32
    %c0_i32_1 = arith.constant 0 : i32
    return %arg0, %c0_i32, %c0_i32_0 : i32, i32, i32
  }
}

</mosaic_0001>

<bundles_post_ra>
// kernel: tpu_custom_call.1
= control target key start
LH: loop header
LB: loop body
LE: loop exit
PB: predicated region body
PF: predicated region fallthrough
CT: control target
= control target key end

     0   :  { %s3981_s21 = smov 0   ;;  %s6142_s0 = inlined_call_operand.vmem [shape: f32[2,256,64], index: 0, kind: input, shape index: {}]   ;;  %s6143_s1 = inlined_call_operand.vmem [shape: f32[64,32], index: 1, kind: input, shape index: {}]   ;;  %s6144_s2 = inlined_call_operand.vmem [shape: f32[32,64], index: 2, kind: input, shape index: {}]   ;;  %s6145_s3 = inlined_call_operand.vmem [shape: f32[8,64], index: 3, kind: input, shape index: {}]   ;;  %s6146_s4 = inlined_call_operand.vmem [shape: bf16[3,64,64], index: 4, kind: input, shape index: {}]   ;;  %s6147_s5 = inlined_call_operand.vmem [shape: bf16[64,64], index: 5, kind: input, shape index: {}]   ;;  %s6148_s6 = inlined_call_operand.vmem [shape: f32[2,256,64], index: 6, kind: output, shape index: {}]  }
   0x1 LB: > { %s3277_s22 = sadd.s32 4294967295, %s3944_s21   ;;  %p3281_p0 = scmp.ge.s32.totalorder %s3944_s21, 1  ;;  %s3944_s21 = sphi %s3981_s21, %s16_s21  }
   0x2   : > { %p212_p1 = scmp.lt.s32.totalorder %s3944_s21, 3 }
   0x4   : > { %p213_p2 = pnand %p3281_p0, %p212_p1 }
   0x5   : > { %p242_p3 = scmp.lt.s32.totalorder (!%p213_p2), %s3277_s22, 1 }
   0x6   : > { %216 = sbr.rel (%p213_p2) target bundleno = 1654 (0x676), region = 44 }
   0xb   : > { %v469_v0 = vld [vmem:[%s6143_s1 + $0x38] sm:$0xff]  ;;  %v468_v1 = vld [vmem:[%s6143_s1 + $0x30] sm:$0xff]  ;;  %v467_v2 = vld [vmem:[%s6143_s1 + $0x28] sm:$0xff]  ;;  %s6204_s22 = smov (!%p242_p3, %s3277_s22), 1  ;;  %vm285_vm0 = vcmask 523264   ;;  %vm497_vm2 = vcmask 261120  }
   0xc   : > { %481 = vmatpush.msra.mxu3 %v469_v0  ;;  %v466_v3 = vld [vmem:[%s6143_s1 + $0x20] sm:$0xff]  ;;  %s3658_s7 = sshll.u32 %s6204_s22, 8  ;;  %v465_v4 = vld [vmem:[%s6143_s1 + $0x18] sm:$0xff]  ;;  %v464_v11 = vld [vmem:[%s6143_s1 + $0x10] sm:$0xff]  ;;  %vm833_vm6 = vcmask 519168  }
   0xd   : > { %s4012_s12 = scalar_lea.vmem %s6142_s0, %s3658_s7  ;;  %v463_v15 = vld [vmem:[%s6143_s1 + $0x8] sm:$0xff]  ;;  %v462_v19 = vld [vmem:[%s6143_s1] sm:$0xff]  ;;  %s5660_s13 = scalar_lea.vmem %s6148_s6, %s3658_s7 }
   0xe   : > { %482 = vmatpush.msra.mxu3 %v468_v1  ;;  %v4015_v5 = vld [vmem:[%s4012_s12] sm:$0xff]  ;;  %v4018_v6 = vld [vmem:[%s4012_s12 + $0x8] sm:$0xff]  ;;  %v4021_v7 = vld [vmem:[%s4012_s12 + $0x10] sm:$0xff] }
   0xf   : > { %v286_v8 = vsel %vm285_vm0, %v4015_v5, 0.0  ;;  %v287_v9 = vsel %vm285_vm0, %v4018_v6, 0.0  ;;  %v289_v10 = vsel %vm285_vm0, %v4021_v7, 0.0  ;;  %v4033_v12 = vld [vmem:[%s4012_s12 + $0x18] sm:$0xff]  ;;  %v4041_v16 = vld [vmem:[%s4012_s12 + $0x20] sm:$0xff]  ;;  %v4049_v20 = vld [vmem:[%s4012_s12 + $0x28] sm:$0xff]  ;;  %v356_v28 = vmul.f32 %v4015_v5, %v4015_v5 }
  0x10   : > { %483 = vmatpush.msra.mxu3 %v467_v2  ;;  %v288_v13 = vadd.f32 %v287_v9, %v286_v8  ;;  %v291_v14 = vsel %vm285_vm0, %v4033_v12, 0.0  ;;  %v293_v18 = vsel %vm285_vm0, %v4041_v16, 0.0  ;;  %v295_v22 = vsel %vm285_vm0, %v4049_v20, 0.0  ;;  %v4054_v23 = vld [vmem:[%s4012_s12 + $0x30] sm:$0xff]  ;;  %v4059_v26 = vld [vmem:[%s4012_s12 + $0x38] sm:$0xff]  ;;  %v4070_v32 = vld [vmem:[%s4012_s12 + $0x40] sm:$0xff] }
  0x11   : > { %v297_v25 = vsel %vm285_vm0, %v4054_v23, 0.0  ;;  %v299_v29 = vsel %vm285_vm0, %v4059_v26, 0.0  ;;  %v357_v30 = vmul.f32 %v4018_v6, %v4018_v6  ;;  %v358_v31 = vmul.f32 %v4021_v7, %v4021_v7  ;;  %v4077_v36 = vld [vmem:[%s4012_s12 + $0x48] sm:$0xff]  ;;  %v4087_v43 = vld [vmem:[%s4012_s12 + $0x50] sm:$0xff]  ;;  %v4095_v49 = vld [vmem:[%s4012_s12 + $0x58] sm:$0xff] }
  0x12   : > { %484 = vmatpush.msra.mxu3 %v466_v3  ;;  %v290_v17 = vadd.f32 %v289_v10, %v288_v13  ;;  %v301_v34 = vsel %vm285_vm0, %v4070_v32, 0.0  ;;  %v359_v35 = vmul.f32 %v4033_v12, %v4033_v12  ;;  %v388_v38 = vsel %vm285_vm0, %v356_v28, 0.0  ;;  %v4103_v55 = vld [vmem:[%s4012_s12 + $0x60] sm:$0xff]  ;;  %v4111_v61 = vld [vmem:[%s4012_s12 + $0x68] sm:$0xff]  ;;  %v4119_v3 = vld [vmem:[%s4012_s12 + $0x70] sm:$0xff] }
  0x13   : > { %v303_v39 = vsel %vm285_vm0, %v4077_v36, 0.0  ;;  %v360_v40 = vmul.f32 %v4041_v16, %v4041_v16  ;;  %v389_v41 = vsel %vm285_vm0, %v357_v30, 0.0  ;;  %v391_v42 = vsel %vm285_vm0, %v358_v31, 0.0  ;;  %v4127_v13 = vld [vmem:[%s4012_s12 + $0x78] sm:$0xff] }
  0x14   : > { %485 = vmatpush.msra.mxu3 %v465_v4  ;;  %v292_v21 = vadd.f32 %v291_v14, %v290_v17  ;;  %v390_v45 = vadd.f32 %v389_v41, %v388_v38  ;;  %v305_v46 = vsel %vm285_vm0, %v4087_v43, 0.0  ;;  %v361_v47 = vmul.f32 %v4049_v20, %v4049_v20 }
  0x15   : > { %v393_v48 = vsel %vm285_vm0, %v359_v35, 0.0  ;;  %v307_v52 = vsel %vm285_vm0, %v4095_v49, 0.0  ;;  %v362_v53 = vmul.f32 %v4054_v23, %v4054_v23  ;;  %v395_v54 = vsel %vm285_vm0, %v360_v40, 0.0 }
  0x16   : > { %486 = vmatpush.msra.mxu3 %v464_v11  ;;  %v294_v24 = vadd.f32 %v293_v18, %v292_v21  ;;  %v392_v51 = vadd.f32 %v391_v42, %v390_v45  ;;  %v309_v58 = vsel %vm285_vm0, %v4103_v55, 0.0  ;;  %v363_v59 = vmul.f32 %v4059_v26, %v4059_v26  ;;  %v4135_v21 = vld [vmem:[%s4012_s12 + $0x80] sm:$0xff] }
  0x17   : > { %v397_v60 = vsel %vm285_vm0, %v361_v47, 0.0  ;;  %v311_v0 = vsel %vm285_vm0, %v4111_v61, 0.0  ;;  %v364_v1 = vmul.f32 %v4070_v32, %v4070_v32  ;;  %v399_v2 = vsel %vm285_vm0, %v362_v53, 0.0 }
  0x18   : > { %487 = vmatpush.msra.mxu3 %v463_v15  ;;  %v296_v27 = vadd.f32 %v295_v22, %v294_v24  ;;  %v394_v57 = vadd.f32 %v393_v48, %v392_v51  ;;  %v313_v9 = vsel %vm285_vm0, %v4119_v3, 0.0  ;;  %v365_v10 = vmul.f32 %v4077_v36, %v4077_v36  ;;  %v4167_v51 = vld [vmem:[%s4012_s12 + $0xa0] sm:$0xff] }
  0x19   : > { %v401_v11 = vsel %vm285_vm0, %v363_v59, 0.0  ;;  %v315_v17 = vsel %vm285_vm0, %v4127_v13, 0.0  ;;  %v366_v18 = vmul.f32 %v4087_v43, %v4087_v43  ;;  %v369_v41 = vmul.f32 %v4111_v61, %v4111_v61 }
  0x1a   : > { %488 = vmatpush.msra.mxu3 %v462_v19  ;;  %v298_v33 = vadd.f32 %v297_v25, %v296_v27  ;;  %v396_v63 = vadd.f32 %v395_v54, %v394_v57  ;;  %v403_v19 = vsel %vm285_vm0, %v364_v1, 0.0  ;;  %v317_v25 = vsel %vm285_vm0, %v4135_v21, 0.0  ;;  %v4183_v1 = vld [vmem:[%s4012_s12 + $0xb0] sm:$0xff] }
  0x1b   : > { %v367_v27 = vmul.f32 %v4095_v49, %v4095_v49  ;;  %v405_v28 = vsel %vm285_vm0, %v365_v10, 0.0  ;;  %v407_v35 = vsel %vm285_vm0, %v366_v18, 0.0  ;;  %v370_v48 = vmul.f32 %v4119_v3, %v4119_v3 }
  0x1c   : > { %v300_v37 = vadd.f32 %v299_v29, %v298_v33  ;;  %v398_v8 = vadd.f32 %v397_v60, %v396_v63  ;;  %v4143_v29 = vld [vmem:[%s4012_s12 + $0x88] sm:$0xff]  ;;  %v325_v54 = vsel %vm285_vm0, %v4167_v51, 0.0  ;;  %v413_v57 = vsel %vm285_vm0, %v369_v41, 0.0 }
  0x1d   : > { %v319_v33 = vsel %vm285_vm0, %v4143_v29, 0.0  ;;  %v409_v42 = vsel %vm285_vm0, %v367_v27, 0.0  ;;  %v372_v63 = vmul.f32 %v4135_v21, %v4135_v21 }
  0x1e   : > { %v302_v44 = vadd.f32 %v301_v34, %v300_v37  ;;  %v400_v15 = vadd.f32 %v399_v2, %v398_v8  ;;  %v368_v34 = vmul.f32 %v4103_v55, %v4103_v55  ;;  %v4151_v37 = vld [vmem:[%s4012_s12 + $0x90] sm:$0xff]  ;;  %v329_v8 = vsel %vm285_vm0, %v4183_v1, 0.0 }
  0x1f   : > { %v321_v40 = vsel %vm285_vm0, %v4151_v37, 0.0  ;;  %v374_v18 = vmul.f32 %v4151_v37, %v4151_v37 }
  0x20   : > { %v304_v50 = vadd.f32 %v303_v39, %v302_v44  ;;  %v402_v24 = vadd.f32 %v401_v11, %v400_v15  ;;  %v4159_v44 = vld [vmem:[%s4012_s12 + $0x98] sm:$0xff] }
  0x21   : > { %v323_v47 = vsel %vm285_vm0, %v4159_v44, 0.0  ;;  %v4191_v11 = vld [vmem:[%s4012_s12 + $0xb8] sm:$0xff] }
  0x22   : > { %v306_v56 = vadd.f32 %v305_v46, %v304_v50  ;;  %v404_v31 = vadd.f32 %v403_v19, %v402_v24  ;;  %v411_v50 = vsel %vm285_vm0, %v368_v34, 0.0  ;;  %v419_v19 = vsel %vm285_vm0, %v372_v63, 0.0 }
  0x23   : > { %v379_v63 = vmul.f32 %v4191_v11, %v4191_v11 }
  0x24   : > { %v308_v62 = vadd.f32 %v307_v52, %v306_v56  ;;  %v406_v39 = vadd.f32 %v405_v28, %v404_v31  ;;  %v371_v56 = vmul.f32 %v4127_v13, %v4127_v13  ;;  %v375_v28 = vmul.f32 %v4159_v44, %v4159_v44  ;;  %v4207_v31 = vld [vmem:[%s4012_s12 + $0xc8] sm:$0xff] }
  0x26   : > { %v310_v4 = vadd.f32 %v309_v58, %v308_v62  ;;  %v408_v46 = vadd.f32 %v407_v35, %v406_v39  ;;  %v4175_v58 = vld [vmem:[%s4012_s12 + $0xa8] sm:$0xff]  ;;  %v417_v10 = vsel %vm285_vm0, %v371_v56, 0.0  ;;  %v335_v35 = vsel %vm285_vm0, %v4207_v31, 0.0 }
  0x27   : > { %v327_v62 = vsel %vm285_vm0, %v4175_v58, 0.0  ;;  %v423_v39 = vsel %vm285_vm0, %v374_v18, 0.0 }
  0x28   : > { %v312_v14 = vadd.f32 %v311_v0, %v310_v4  ;;  %v410_v53 = vadd.f32 %v409_v42, %v408_v46  ;;  %v415_v0 = vsel %vm285_vm0, %v370_v48, 0.0  ;;  %v377_v46 = vmul.f32 %v4175_v58, %v4175_v58  ;;  %v4223_v48 = vld [vmem:[%s4012_s12 + $0xd8] sm:$0xff] }
  0x2a   : > { %v314_v22 = vadd.f32 %v313_v9, %v312_v14  ;;  %v412_v60 = vadd.f32 %v411_v50, %v410_v53  ;;  %v373_v9 = vmul.f32 %v4143_v29, %v4143_v29  ;;  %v339_v53 = vsel %vm285_vm0, %v4223_v48, 0.0 }
  0x2c   : > { %v316_v30 = vadd.f32 %v315_v17, %v314_v22  ;;  %v414_v4 = vadd.f32 %v413_v57, %v412_v60  ;;  %v331_v17 = vsel %vm285_vm0, %v4191_v11, 0.0  ;;  %v4199_v22 = vld [vmem:[%s4012_s12 + $0xc0] sm:$0xff] }
  0x2d   : > { %v333_v27 = vsel %vm285_vm0, %v4199_v22, 0.0  ;;  %v4231_v57 = vld [vmem:[%s4012_s12 + $0xe0] sm:$0xff] }
  0x2e   : > { %v318_v38 = vadd.f32 %v317_v25, %v316_v30  ;;  %v416_v15 = vadd.f32 %v415_v0, %v414_v4  ;;  %v421_v30 = vsel %vm285_vm0, %v373_v9, 0.0  ;;  %v429_v0 = vsel %vm285_vm0, %v377_v46, 0.0 }
  0x30   : > { %v320_v45 = vadd.f32 %v319_v33, %v318_v38  ;;  %v418_v25 = vadd.f32 %v417_v10, %v416_v15  ;;  %v376_v38 = vmul.f32 %v4167_v51, %v4167_v51  ;;  %v380_v10 = vmul.f32 %v4199_v22, %v4199_v22  ;;  %v4247_v15 = vld [vmem:[%s4012_s12 + $0xf0] sm:$0xff] }
  0x32   : > { %v322_v52 = vadd.f32 %v321_v40, %v320_v45  ;;  %v420_v34 = vadd.f32 %v419_v19, %v418_v25  ;;  %v4215_v40 = vld [vmem:[%s4012_s12 + $0xd0] sm:$0xff]  ;;  %v427_v56 = vsel %vm285_vm0, %v376_v38, 0.0  ;;  %v345_v19 = vsel %vm285_vm0, %v4247_v15, 0.0  ;;  %v496_v38 = vld [vmem:[%s6144_s2 + $0x18] sm:$0xff] }
  0x33   : > { %v337_v45 = vsel %vm285_vm0, %v4215_v40, 0.0  ;;  %v433_v25 = vsel %vm285_vm0, %v379_v63, 0.0  ;;  %513 = vmatpush.msra.mxu1 %v496_v38 }
  0x34   : > { %v324_v59 = vadd.f32 %v323_v47, %v322_v52  ;;  %v422_v42 = vadd.f32 %v421_v30, %v420_v34  ;;  %v425_v47 = vsel %vm285_vm0, %v375_v28, 0.0  ;;  %v382_v34 = vmul.f32 %v4215_v40, %v4215_v40 }
  0x36   : > { %v326_v2 = vadd.f32 %v325_v54, %v324_v59  ;;  %v424_v52 = vadd.f32 %v423_v39, %v422_v42  ;;  %v378_v54 = vmul.f32 %v4183_v1, %v4183_v1  ;;  %v495_v39 = vld [vmem:[%s6144_s2 + $0x10] sm:$0xff] }
  0x37   : > { %514 = vmatpush.msra.mxu1 %v495_v39 }
  0x38   : > { %v328_v14 = vadd.f32 %v327_v62, %v326_v2  ;;  %v426_v60 = vadd.f32 %v425_v47, %v424_v52  ;;  %v341_v62 = vsel %vm285_vm0, %v4231_v57, 0.0  ;;  %v4239_v2 = vld [vmem:[%s4012_s12 + $0xe8] sm:$0xff] }
  0x39   : > { %v343_v9 = vsel %vm285_vm0, %v4239_v2, 0.0  ;;  %v494_v47 = vld [vmem:[%s6144_s2 + $0x8] sm:$0xff] }
  0x3a   : > { %v330_v24 = vadd.f32 %v329_v8, %v328_v14  ;;  %v428_v8 = vadd.f32 %v427_v56, %v426_v60  ;;  %v431_v14 = vsel %vm285_vm0, %v378_v54, 0.0  ;;  %v439_v54 = vsel %vm285_vm0, %v382_v34, 0.0  ;;  %515 = vmatpush.msra.mxu1 %v494_v47 }
  0x3c   : > { %v332_v33 = vadd.f32 %v331_v17, %v330_v24  ;;  %v430_v18 = vadd.f32 %v429_v0, %v428_v8  ;;  %v381_v24 = vmul.f32 %v4207_v31, %v4207_v31  ;;  %v386_v0 = vmul.f32 %v4247_v15, %v4247_v15 }
  0x3e   : > { %v334_v41 = vadd.f32 %v333_v27, %v332_v33  ;;  %v4255_v27 = vld [vmem:[%s4012_s12 + $0xf8] sm:$0xff]  ;;  %v432_v30 = vadd.f32 %v431_v14, %v430_v18  ;;  %v437_v46 = vsel %vm285_vm0, %v381_v24, 0.0  ;;  %v447_v18 = vsel %vm285_vm0, %v386_v0, 0.0  ;;  %v3670_v0 = vld [vmem:[%s6146_s4 + $0x50] sm:$0xff] }
  0x3f   : > { %v347_v33 = vsel %vm285_vm0, %v4255_v27, 0.0 }
  0x40   : > { %v336_v50 = vadd.f32 %v335_v35, %v334_v41  ;;  %v435_v35 = vsel %vm285_vm0, %v380_v10, 0.0  ;;  %v434_v42 = vadd.f32 %v433_v25, %v432_v30 }
  0x42   : > { %v338_v59 = vadd.f32 %v337_v45, %v336_v50  ;;  %v383_v45 = vmul.f32 %v4223_v48, %v4223_v48  ;;  %v436_v52 = vadd.f32 %v435_v35, %v434_v42  ;;  %v458_v35 = vlaneseq }
  0x44   : > { %v340_v4 = vadd.f32 %v339_v53, %v338_v59  ;;  %v384_v53 = vmul.f32 %v4231_v57, %v4231_v57  ;;  %v438_v56 = vadd.f32 %v437_v46, %v436_v52  ;;  %v385_v59 = vmul.f32 %v4239_v2, %v4239_v2 }
  0x45   : > { %v441_v60 = vsel %vm285_vm0, %v383_v45, 0.0  ;;  %v459_v42 = vshrl.u32 %v458_v35, 7 }
  0x46   : > { %v342_v17 = vadd.f32 %v341_v62, %v340_v4  ;;  %v440_v63 = vadd.f32 %v439_v54, %v438_v56  ;;  %v443_v4 = vsel %vm285_vm0, %v384_v53, 0.0  ;;  %v445_v10 = vsel %vm285_vm0, %v385_v59, 0.0  ;;  %v493_v53 = vld [vmem:[%s6144_s2] sm:$0xff]  ;;  %v3663_v56 = vld [vmem:[%s6146_s4 + $0x18] sm:$0xff] }
  0x47   : > { %vm460_vm1 = vcmp.eq.s32.totalorder %v459_v42, 0  ;;  %516 = vmatpush.msra.mxu1 %v493_v53  ;;  %v3667_v59 = vld [vmem:[%s6146_s4 + $0x38] sm:$0xff]  ;;  %716 = vmatpush.bf16.msra.mxu2 %v3663_v56  ;;  %v537_v42 = vld [vmem:[%s6145_s3] sm:$0x1] }
  0x48   : > { %v344_v28 = vadd.f32 %v343_v9, %v342_v17  ;;  %v442_v8 = vadd.f32 %v441_v60, %v440_v63  ;;  %v387_v9 = vmul.f32 %v4255_v27, %v4255_v27  ;;  %v3671_v60 = vld [vmem:[%s6146_s4 + $0x58] sm:$0xff]  ;;  %904 = vmatpush.bf16.msrb.mxu3 %v3667_v59  ;;  %v3666_v63 = vld [vmem:[%s6146_s4 + $0x30] sm:$0xff] }
  0x49   : > { %1091 = vmatpush.bf16.msrb.mxu1 %v3671_v60 }
  0x4a   : > { %v346_v41 = vadd.f32 %v345_v19, %v344_v28  ;;  %v444_v17 = vadd.f32 %v443_v4, %v442_v8  ;;  %v449_v24 = vsel %vm285_vm0, %v387_v9, 0.0  ;;  %v3661_v8 = vld [vmem:[%s6146_s4 + $0x8] sm:$0xff] }
  0x4b   : > { %v3665_v9 = vld [vmem:[%s6146_s4 + $0x28] sm:$0xff] }
  0x4c   : > { %v348_v50 = vadd.f32 %v347_v33, %v346_v41  ;;  %v446_v19 = vadd.f32 %v445_v10, %v444_v17  ;;  %905 = vmatpush.bf16.msrb.mxu3 %v3666_v63  ;;  %v3669_v10 = vld [vmem:[%s6146_s4 + $0x48] sm:$0xff] }
  0x4d   : > { %1092 = vmatpush.bf16.msrb.mxu1 %v3670_v0 }
  0x4e   : > { %v349_v62 = vrot.slane %v348_v50, 4  ;;  %v448_v28 = vadd.f32 %v447_v18, %v446_v19  ;;  %v3660_v18 = vld [vmem:[%s6146_s4] sm:$0xff] }
  0x4f   : > { %v3664_v19 = vld [vmem:[%s6146_s4 + $0x20] sm:$0xff] }
  0x50   : > { %v350_v14 = vadd.f32 %v349_v62, %v348_v50  ;;  %v450_v30 = vadd.f32 %v449_v24, %v448_v28  ;;  %v3662_v62 = vld [vmem:[%s6146_s4 + $0x10] sm:$0xff]  ;;  %906 = vmatpush.bf16.msrb.mxu3 %v3665_v9  ;;  %v3668_v24 = vld [vmem:[%s6146_s4 + $0x40] sm:$0xff] }
  0x51   : > { %717 = vmatpush.bf16.msra.mxu2 %v3662_v62  ;;  %1093 = vmatpush.bf16.msrb.mxu1 %v3669_v10 }
  0x52   : > { %v351_v25 = vrot.slane %v350_v14, 2  ;;  %v451_v34 = vrot.slane %v450_v30, 4 }
  0x54   : > { %v352_v33 = vadd.f32 %v351_v25, %v350_v14  ;;  %v452_v38 = vadd.f32 %v451_v34, %v450_v30  ;;  %907 = vmatpush.bf16.msrb.mxu3 %v3664_v19 }
  0x55   : > { %718 = vmatpush.bf16.msra.mxu2 %v3661_v8  ;;  %1094 = vmatpush.bf16.msrb.mxu1 %v3668_v24 }
  0x56   : > { %v353_v39 = vrot.slane %v352_v33, 1  ;;  %v453_v41 = vrot.slane %v452_v38, 2 }
  0x58   : > { %v454_v45 = vadd.f32 %v453_v41, %v452_v38  ;;  %v354_v46 = vadd.f32 %v353_v39, %v352_v33 }
  0x59   : > { %719 = vmatpush.bf16.msra.mxu2 %v3660_v18 }
  0x5a   : > { %v455_v47 = vrot.slane %v454_v45, 1 }
  0x5c   : > { %v456_v50 = vadd.f32 %v455_v47, %v454_v45  ;;  %v542_v47 = vld [vmem:[%s6145_s3 + $0x1] sm:$0x1] }
  0x5e   : > { %v461_v52 = vsel %vm460_vm1, %v354_v46, %v456_v50 }
  0x5f   : > { %3286 = vmatmul.msk.f32.vlgmr.msra.gmra.mxu3 %vm285_vm0, %v461_v52 }
  0xe2   : > { %v490_v54 = vpop.f32.mrf.mxu3 }
  0xe3   : > { %3287 = vmatmul.msk.f32.vlgmr.msra.gmra.mxu1 %vm497_vm2, %v490_v54 }
 0x160   : > { %v518_v4 = vpop.f32.mrf.mxu1 }
 0x161   : > { %v521_v14 = vmul.f32 %v518_v4, %v518_v4 }
 0x163   : > { %v523_v17 = vrot.slane %v521_v14, 7 }
 0x165   : > { %v525_v25 = vsub.f32 %v518_v4, %v523_v17 }
 0x167   : > { %v526_v28 = vadd.f32 1e-06, %v525_v25 }
 0x169   : > { %3744 = vrsqrt.f32 %v526_v28  ;;  %vm533_vm4 = vweird.f32 %v526_v28 }
 0x16f   : > { %v3745_v30 = vpop.eup %3744 }
 0x170   : > { %v528_v33 = vmul.f32 %v3745_v30, %v526_v28  ;;  %vm534_vm3 = vweird.f32 %v3745_v30 }
 0x171   : > { %vm535_vm5 = vmor %vm533_vm4, %vm534_vm3 }
 0x172   : > { %v529_v34 = vmul.f32 %v3745_v30, %v528_v33 }
 0x174   : > { %v530_v35 = vmul.f32 0.5, %v529_v34 }
 0x176   : > { %v531_v38 = vsub.f32 1.5, %v530_v35 }
 0x178   : > { %v532_v39 = vmul.f32 %v3745_v30, %v531_v38 }
 0x17a   : > { %v536_v41 = vsel %vm535_vm5, %v3745_v30, %v532_v39 }
 0x17b   : > { %v539_v45 = vrot.slane %v536_v41, 1 }
 0x17d   : > { %v541_v46 = vmul.f32 %v539_v45, %v537_v42 }
 0x17f   : > { %v543_v50 = vmul.f32 %v541_v46, %v518_v4  ;;  %v4334_v52 = vperm.slane %v541_v46, 0 }
 0x181   : > { %v544_v53 = vsub.f32 %v542_v47, %v543_v50  ;;  %v550_v56 = vmul.f32 %v4334_v52, %v4015_v5  ;;  %v551_v59 = vmul.f32 %v4334_v52, %v4018_v6  ;;  %v552_v60 = vmul.f32 %v4334_v52, %v4021_v7 }
 0x182   : > { %v558_v0 = vmul.f32 %v4334_v52, %v4070_v32  ;;  %v559_v4 = vmul.f32 %v4334_v52, %v4077_v36  ;;  %v553_v8 = vmul.f32 %v4334_v52, %v4033_v12  ;;  %v560_v5 = vmul.f32 %v4334_v52, %v4087_v43 }
 0x183   : > { %v4336_v54 = vperm.slane %v544_v53, 0  ;;  %v561_v6 = vmul.f32 %v4334_v52, %v4095_v49  ;;  %v562_v7 = vmul.f32 %v4334_v52, %v4103_v55  ;;  %v563_v36 = vmul.f32 %v4334_v52, %v4111_v61 }
 0x184   : > { %v564_v19 = vmul.f32 %v4334_v52, %v4119_v3  ;;  %v565_v24 = vmul.f32 %v4334_v52, %v4127_v13  ;;  %v566_v25 = vmul.f32 %v4334_v52, %v4135_v21  ;;  %v567_v30 = vmul.f32 %v4334_v52, %v4143_v29 }
 0x185   : > { %v583_v62 = vadd.f32 %v4336_v54, %v550_v56  ;;  %v584_v63 = vadd.f32 %v4336_v54, %v551_v59  ;;  %v591_v10 = vadd.f32 %v4336_v54, %v558_v0  ;;  %v592_v32 = vadd.f32 %v4336_v54, %v559_v4 }
 0x186   : > { %v585_v14 = vadd.f32 %v4336_v54, %v552_v60  ;;  %v586_v12 = vadd.f32 %v4336_v54, %v553_v8  ;;  %v593_v43 = vadd.f32 %v4336_v54, %v560_v5  ;;  %v594_v17 = vadd.f32 %v4336_v54, %v561_v6 }
 0x187   : > { %v615_v9 = vpack.c.bf16 %v584_v63, %v583_v62  ;;  %v4368_v49 = vpack.c.bf16 %v592_v32, %v591_v10  ;;  %v595_v55 = vadd.f32 %v4336_v54, %v562_v7  ;;  %v596_v18 = vadd.f32 %v4336_v54, %v563_v36 }
 0x188   : > { %v4373_v61 = vpack.c.bf16 %v594_v17, %v593_v43  ;;  %v568_v33 = vmul.f32 %v4334_v52, %v4151_v37  ;;  %v569_v34 = vmul.f32 %v4334_v52, %v4159_v44  ;;  %v597_v35 = vadd.f32 %v4336_v54, %v564_v19 }
 0x189   : > { %3304 = vmatmul.msk.bf16.vlgmr.msra.gmra.mxu2 %vm285_vm0, %v615_v9  ;;  %3344 = vmatmul.msk.bf16.vlgmr.msrb.gmra.mxu3 %vm285_vm0, %v615_v9  ;;  %v4381_v28 = vpack.c.bf16 %v596_v18, %v595_v55  ;;  %v598_v3 = vadd.f32 %v4336_v54, %v565_v24  ;;  %v599_v13 = vadd.f32 %v4336_v54, %v566_v25 }
 0x18a   : > { %3384 = vmatmul.msk.bf16.vlgmr.msrb.gmra.mxu1 %vm285_vm0, %v615_v9  ;;  %v570_v21 = vmul.f32 %v4334_v52, %v4167_v51  ;;  %v600_v38 = vadd.f32 %v4336_v54, %v567_v30  ;;  %v601_v39 = vadd.f32 %v4336_v54, %v568_v33  ;;  %v602_v29 = vadd.f32 %v4336_v54, %v569_v34 }
 0x18b   : > { %v571_v37 = vmul.f32 %v4334_v52, %v4175_v58  ;;  %v622_v41 = vpack.c.bf16 %v598_v3, %v597_v35  ;;  %v572_v42 = vmul.f32 %v4334_v52, %v4183_v1  ;;  %v573_v45 = vmul.f32 %v4334_v52, %v4191_v11 }
 0x18c   : > { %v603_v44 = vadd.f32 %v4336_v54, %v570_v21  ;;  %v4404_v46 = vpack.c.bf16 %v600_v38, %v599_v13  ;;  %v4406_v51 = vpack.c.bf16 %v602_v29, %v601_v39  ;;  %v574_v50 = vmul.f32 %v4334_v52, %v4199_v22 }
 0x18d   : > { %v604_v47 = vadd.f32 %v4336_v54, %v571_v37  ;;  %v605_v58 = vadd.f32 %v4336_v54, %v572_v42  ;;  %v606_v53 = vadd.f32 %v4336_v54, %v573_v45  ;;  %v575_v56 = vmul.f32 %v4334_v52, %v4207_v31 }
 0x18e   : > { %v576_v1 = vmul.f32 %v4334_v52, %v4215_v40  ;;  %v607_v59 = vadd.f32 %v4336_v54, %v574_v50  ;;  %v577_v60 = vmul.f32 %v4334_v52, %v4223_v48  ;;  %v578_v22 = vmul.f32 %v4334_v52, %v4231_v57 }
 0x18f   : > { %v4417_v11 = vpack.c.bf16 %v604_v47, %v603_v44  ;;  %v4424_v62 = vpack.c.bf16 %v606_v53, %v605_v58  ;;  %v608_v63 = vadd.f32 %v4336_v54, %v575_v56  ;;  %v579_v31 = vmul.f32 %v4334_v52, %v4239_v2 }
 0x190   : > { %v609_v0 = vadd.f32 %v4336_v54, %v576_v1  ;;  %v610_v40 = vadd.f32 %v4336_v54, %v577_v60  ;;  %v611_v4 = vadd.f32 %v4336_v54, %v578_v22  ;;  %v580_v8 = vmul.f32 %v4334_v52, %v4247_v15 }
 0x191   : > { %v581_v48 = vmul.f32 %v4334_v52, %v4255_v27  ;;  %v4436_v57 = vpack.c.bf16 %v608_v63, %v607_v59  ;;  %v612_v5 = vadd.f32 %v4336_v54, %v579_v31  ;;  %v616_v10 = vpack.c.bf16 %v586_v12, %v585_v14 }
 0x192   : > { %v4439_v6 = vpack.c.bf16 %v610_v40, %v609_v0  ;;  %v613_v7 = vadd.f32 %v4336_v54, %v580_v8  ;;  %v554_v15 = vmul.f32 %v4334_v52, %v4041_v16  ;;  %v555_v27 = vmul.f32 %v4334_v52, %v4049_v20 }
 0x193   : > { %v614_v2 = vadd.f32 %v4336_v54, %v581_v48  ;;  %v4443_v9 = vpack.c.bf16 %v612_v5, %v611_v4  ;;  %v556_v14 = vmul.f32 %v4334_v52, %v4054_v23  ;;  %v557_v16 = vmul.f32 %v4334_v52, %v4059_v26  ;;  %v4492_v23 = vld [vmem:[%s6145_s3 + $0x4] ss:$0 sm:$0xff] }
 0x194   : > { %v587_v36 = vadd.f32 %v4336_v54, %v554_v15  ;;  %v588_v43 = vadd.f32 %v4336_v54, %v555_v27 }
 0x195   : > { %v4445_v32 = vpack.c.bf16 %v614_v2, %v613_v7  ;;  %v589_v12 = vadd.f32 %v4336_v54, %v556_v14  ;;  %v590_v20 = vadd.f32 %v4336_v54, %v557_v16  ;;  %v4502_v54 = vld [vmem:[%s6145_s3 + $0x2] ss:$0 sm:$0xff] }
 0x196   : > { %v617_v17 = vpack.c.bf16 %v588_v43, %v587_v36 }
 0x197   : > { %v618_v55 = vpack.c.bf16 %v590_v20, %v589_v12 }
 0x199   : > { %3305 = vmatmul.msk.bf16.gmra.mxu2 %vm285_vm0, %v616_v10  ;;  %3345 = vmatmul.msk.bf16.gmra.mxu3 %vm285_vm0, %v616_v10 }
 0x19a   : > { %3385 = vmatmul.msk.bf16.gmra.mxu1 %vm285_vm0, %v616_v10 }
 0x1a9   : > { %3306 = vmatmul.msk.bf16.gmra.mxu2 %vm285_vm0, %v617_v17  ;;  %3346 = vmatmul.msk.bf16.gmra.mxu3 %vm285_vm0, %v617_v17 }
 0x1aa   : > { %3386 = vmatmul.msk.bf16.gmra.mxu1 %vm285_vm0, %v617_v17 }
 0x1b9   : > { %3307 = vmatmul.msk.bf16.gmra.mxu2 %vm285_vm0, %v618_v55  ;;  %3347 = vmatmul.msk.bf16.gmra.mxu3 %vm285_vm0, %v618_v55 }
 0x1ba   : > { %3387 = vmatmul.msk.bf16.gmra.mxu1 %vm285_vm0, %v618_v55 }
 0x1c9   : > { %3308 = vmatmul.msk.bf16.gmra.mxu2 %vm285_vm0, %v4368_v49  ;;  %3348 = vmatmul.msk.bf16.gmra.mxu3 %vm285_vm0, %v4368_v49 }
 0x1ca   : > { %3388 = vmatmul.msk.bf16.gmra.mxu1 %vm285_vm0, %v4368_v49  ;;  %v4507_v49 = vld [vmem:[%s6145_s3 + $0x3] ss:$0 sm:$0xff] }
 0x1d9   : > { %3309 = vmatmul.msk.bf16.gmra.mxu2 %vm285_vm0, %v4373_v61  ;;  %3349 = vmatmul.msk.bf16.gmra.mxu3 %vm285_vm0, %v4373_v61 }
 0x1da   : > { %3389 = vmatmul.msk.bf16.gmra.mxu1 %vm285_vm0, %v4373_v61 }
 0x1e9   : > { %3310 = vmatmul.msk.bf16.gmra.mxu2 %vm285_vm0, %v4381_v28  ;;  %3350 = vmatmul.msk.bf16.gmra.mxu3 %vm285_vm0, %v4381_v28 }
 0x1ea   : > { %3390 = vmatmul.msk.bf16.gmra.mxu1 %vm285_vm0, %v4381_v28 }
 0x1f9   : > { %3311 = vmatmul.msk.bf16.gmra.mxu2 %vm285_vm0, %v622_v41  ;;  %3351 = vmatmul.msk.bf16.gmra.mxu3 %vm285_vm0, %v622_v41 }
 0x1fa   : > { %3391 = vmatmul.msk.bf16.gmra.mxu1 %vm285_vm0, %v622_v41 }
 0x207   : > { %v1096_v26 = vpop.f32.mrf.mxu1 }
 0x208   : > { %v1097_v52 = vadd.f32 %v4492_v23, %v1096_v26 }
 0x209   : > { %3312 = vmatmul.msk.bf16.gmra.mxu2 %vm285_vm0, %v4404_v46  ;;  %3352 = vmatmul.msk.bf16.gmra.mxu3 %vm285_vm0, %v4404_v46 }
 0x20a   : > { %v1176_v18 = vpack.c.bf16 %v1097_v52, %v1097_v52  ;;  %3392 = vmatmul.msk.bf16.gmra.mxu1 %vm285_vm0, %v4404_v46 }
 0x20c   : > { %1208 = vst.msk [vmem:[#allocation4] sm:$0xf] %vm833_vm6, %v1176_v18  ;;  %v721_v61 = vpop.f32.mrf.mxu2  ;;  %v909_v19 = vpop.f32.mrf.mxu3 }
 0x20d   : > { %v722_v24 = vadd.f32 %v4502_v54, %v721_v61  ;;  %v910_v25 = vadd.f32 %v4507_v49, %v909_v19 }
 0x20f   : > { %v801_v28 = vpack.c.bf16 %v722_v24, %v722_v24  ;;  %v989_v30 = vpack.c.bf16 %v910_v25, %v910_v25  ;;  %v1098_v33 = vpop.f32.mrf.mxu1 }
 0x210   : > { %v1099_v34 = vadd.f32 %v4492_v23, %v1098_v33 }
 0x211   : > { %834 = vst.msk [vmem:[#allocation2] sm:$0xf] %vm833_vm6, %v801_v28 }
 0x212   : > { %1021 = vst.msk [vmem:[#allocation3] sm:$0xf] %vm833_vm6, %v989_v30  ;;  %v1177_v35 = vpack.c.bf16 %v1099_v34, %v1099_v34 }
 0x214   : > { %1209 = vst.msk [vmem:[#allocation4 + $0x4] sm:$0xf] %vm833_vm6, %v1177_v35  ;;  %v723_v3 = vpop.f32.mrf.mxu2  ;;  %v911_v13 = vpop.f32.mrf.mxu3 }
 0x215   : > { %v724_v21 = vadd.f32 %v4502_v54, %v723_v3  ;;  %v912_v38 = vadd.f32 %v4507_v49, %v911_v13 }
 0x217   : > { %v802_v39 = vpack.c.bf16 %v724_v21, %v724_v21  ;;  %v990_v29 = vpack.c.bf16 %v912_v38, %v912_v38  ;;  %v1101_v37 = vpop.f32.mrf.mxu1 }
 0x218   : > { %v1102_v41 = vadd.f32 %v4492_v23, %v1101_v37 }
 0x219   : > { %835 = vst.msk [vmem:[#allocation2 + $0x4] sm:$0xf] %vm833_vm6, %v802_v39  ;;  %3313 = vmatmul.msk.bf16.gmra.mxu2 %vm285_vm0, %v4406_v51  ;;  %3353 = vmatmul.msk.bf16.gmra.mxu3 %vm285_vm0, %v4406_v51 }
 0x21a   : > { %1022 = vst.msk [vmem:[#allocation3 + $0x4] sm:$0xf] %vm833_vm6, %v990_v29  ;;  %v1178_v44 = vpack.c.bf16 %v1102_v41, %v1102_v41  ;;  %3393 = vmatmul.msk.bf16.gmra.mxu1 %vm285_vm0, %v4406_v51 }
 0x21c   : > { %1210 = vst.msk [vmem:[#allocation4 + $0x8] sm:$0xf] %vm833_vm6, %v1178_v44  ;;  %v726_v42 = vpop.f32.mrf.mxu2  ;;  %v914_v45 = vpop.f32.mrf.mxu3 }
 0x21d   : > { %v727_v46 = vadd.f32 %v4502_v54, %v726_v42  ;;  %v915_v47 = vadd.f32 %v4507_v49, %v914_v45 }
 0x21f   : > { %v803_v50 = vpack.c.bf16 %v727_v46, %v727_v46  ;;  %v991_v58 = vpack.c.bf16 %v915_v47, %v915_v47  ;;  %v1103_v53 = vpop.f32.mrf.mxu1 }
 0x220   : > { %v1104_v56 = vadd.f32 %v4492_v23, %v1103_v53 }
 0x221   : > { %836 = vst.msk [vmem:[#allocation2 + $0x8] sm:$0xf] %vm833_vm6, %v803_v50 }
 0x222   : > { %1023 = vst.msk [vmem:[#allocation3 + $0x8] sm:$0xf] %vm833_vm6, %v991_v58  ;;  %v1179_v1 = vpack.c.bf16 %v1104_v56, %v1104_v56 }
 0x224   : > { %1211 = vst.msk [vmem:[#allocation4 + $0xc] sm:$0xf] %vm833_vm6, %v1179_v1  ;;  %v728_v51 = vpop.f32.mrf.mxu2  ;;  %v916_v59 = vpop.f32.mrf.mxu3 }
 0x225   : > { %v729_v60 = vadd.f32 %v4502_v54, %v728_v51  ;;  %v917_v22 = vadd.f32 %v4507_v49, %v916_v59 }
 0x227   : > { %v804_v63 = vpack.c.bf16 %v729_v60, %v729_v60  ;;  %v992_v0 = vpack.c.bf16 %v917_v22, %v917_v22  ;;  %v1106_v31 = vpop.f32.mrf.mxu1 }
 0x228   : > { %v1107_v40 = vadd.f32 %v4492_v23, %v1106_v31 }
 0x229   : > { %837 = vst.msk [vmem:[#allocation2 + $0xc] sm:$0xf] %vm833_vm6, %v804_v63  ;;  %3314 = vmatmul.msk.bf16.gmra.mxu2 %vm285_vm0, %v4417_v11  ;;  %3354 = vmatmul.msk.bf16.gmra.mxu3 %vm285_vm0, %v4417_v11 }
 0x22a   : > { %1024 = vst.msk [vmem:[#allocation3 + $0xc] sm:$0xf] %vm833_vm6, %v992_v0  ;;  %v1180_v4 = vpack.c.bf16 %v1107_v40, %v1107_v40  ;;  %3394 = vmatmul.msk.bf16.gmra.mxu1 %vm285_vm0, %v4417_v11 }
 0x22c   : > { %1212 = vst.msk [vmem:[#allocation4 + $0x10] sm:$0xf] %vm833_vm6, %v1180_v4  ;;  %v731_v8 = vpop.f32.mrf.mxu2  ;;  %v919_v48 = vpop.f32.mrf.mxu3 }
 0x22d   : > { %v732_v5 = vadd.f32 %v4502_v54, %v731_v8  ;;  %v920_v7 = vadd.f32 %v4507_v49, %v919_v48 }
 0x22f   : > { %v805_v2 = vpack.c.bf16 %v732_v5, %v732_v5  ;;  %v993_v10 = vpack.c.bf16 %v920_v7, %v920_v7  ;;  %v1108_v15 = vpop.f32.mrf.mxu1 }
 0x230   : > { %v1109_v27 = vadd.f32 %v4492_v23, %v1108_v15 }
 0x231   : > { %838 = vst.msk [vmem:[#allocation2 + $0x10] sm:$0xf] %vm833_vm6, %v805_v2 }
 0x232   : > { %1025 = vst.msk [vmem:[#allocation3 + $0x10] sm:$0xf] %vm833_vm6, %v993_v10  ;;  %v1181_v36 = vpack.c.bf16 %v1109_v27, %v1109_v27 }
 0x234   : > { %1213 = vst.msk [vmem:[#allocation4 + $0x14] sm:$0xf] %vm833_vm6, %v1181_v36  ;;  %v733_v11 = vpop.f32.mrf.mxu2  ;;  %v921_v43 = vpop.f32.mrf.mxu3 }
 0x235   : > { %v734_v17 = vadd.f32 %v4502_v54, %v733_v11  ;;  %v922_v14 = vadd.f32 %v4507_v49, %v921_v43 }
 0x237   : > { %v806_v16 = vpack.c.bf16 %v734_v17, %v734_v17  ;;  %v994_v12 = vpack.c.bf16 %v922_v14, %v922_v14  ;;  %v1111_v20 = vpop.f32.mrf.mxu1 }
 0x238   : > { %v1112_v55 = vadd.f32 %v4492_v23, %v1111_v20 }
 0x239   : > { %839 = vst.msk [vmem:[#allocation2 + $0x14] sm:$0xf] %vm833_vm6, %v806_v16  ;;  %3315 = vmatmul.msk.bf16.gmra.mxu2 %vm285_vm0, %v4424_v62  ;;  %3355 = vmatmul.msk.bf16.gmra.mxu3 %vm285_vm0, %v4424_v62 }
 0x23a   : > { %1026 = vst.msk [vmem:[#allocation3 + $0x14] sm:$0xf] %vm833_vm6, %v994_v12  ;;  %v1182_v26 = vpack.c.bf16 %v1112_v55, %v1112_v55  ;;  %3395 = vmatmul.msk.bf16.gmra.mxu1 %vm285_vm0, %v4424_v62 }
 0x23c   : > { %1214 = vst.msk [vmem:[#allocation4 + $0x18] sm:$0xf] %vm833_vm6, %v1182_v26  ;;  %v736_v52 = vpop.f32.mrf.mxu2  ;;  %v924_v18 = vpop.f32.mrf.mxu3 }
 0x23d   : > { %v737_v61 = vadd.f32 %v4502_v54, %v736_v52  ;;  %v925_v19 = vadd.f32 %v4507_v49, %v924_v18 }
 0x23f   : > { %v807_v24 = vpack.c.bf16 %v737_v61, %v737_v61  ;;  %v995_v25 = vpack.c.bf16 %v925_v19, %v925_v19  ;;  %v1113_v28 = vpop.f32.mrf.mxu1 }
 0x240   : > { %v1114_v30 = vadd.f32 %v4492_v23, %v1113_v28 }
 0x241   : > { %840 = vst.msk [vmem:[#allocation2 + $0x18] sm:$0xf] %vm833_vm6, %v807_v24 }
 0x242   : > { %1027 = vst.msk [vmem:[#allocation3 + $0x18] sm:$0xf] %vm833_vm6, %v995_v25  ;;  %v1183_v33 = vpack.c.bf16 %v1114_v30, %v1114_v30 }
 0x244   : > { %1215 = vst.msk [vmem:[#allocation4 + $0x1c] sm:$0xf] %vm833_vm6, %v1183_v33  ;;  %v738_v62 = vpop.f32.mrf.mxu2  ;;  %v926_v34 = vpop.f32.mrf.mxu3 }
 0x245   : > { %v739_v35 = vadd.f32 %v4502_v54, %v738_v62  ;;  %v927_v3 = vadd.f32 %v4507_v49, %v926_v34 }
 0x247   : > { %v808_v13 = vpack.c.bf16 %v739_v35, %v739_v35  ;;  %v996_v21 = vpack.c.bf16 %v927_v3, %v927_v3  ;;  %v1116_v38 = vpop.f32.mrf.mxu1 }
 0x248   : > { %v1117_v39 = vadd.f32 %v4492_v23, %v1116_v38 }
 0x249   : > { %841 = vst.msk [vmem:[#allocation2 + $0x1c] sm:$0xf] %vm833_vm6, %v808_v13  ;;  %3316 = vmatmul.msk.bf16.gmra.mxu2 %vm285_vm0, %v4436_v57  ;;  %3356 = vmatmul.msk.bf16.gmra.mxu3 %vm285_vm0, %v4436_v57 }
 0x24a   : > { %1028 = vst.msk [vmem:[#allocation3 + $0x1c] sm:$0xf] %vm833_vm6, %v996_v21  ;;  %v1184_v29 = vpack.c.bf16 %v1117_v39, %v1117_v39  ;;  %3396 = vmatmul.msk.bf16.gmra.mxu1 %vm285_vm0, %v4436_v57 }
 0x24c   : > { %1216 = vst.msk [vmem:[#allocation4 + $0x20] sm:$0xf] %vm833_vm6, %v1184_v29  ;;  %v741_v37 = vpop.f32.mrf.mxu2  ;;  %v929_v41 = vpop.f32.mrf.mxu3 }
 0x24d   : > { %v742_v44 = vadd.f32 %v4502_v54, %v741_v37  ;;  %v930_v42 = vadd.f32 %v4507_v49, %v929_v41 }
 0x24f   : > { %v809_v45 = vpack.c.bf16 %v742_v44, %v742_v44  ;;  %v997_v46 = vpack.c.bf16 %v930_v42, %v930_v42  ;;  %v1118_v47 = vpop.f32.mrf.mxu1 }
 0x250   : > { %v1119_v50 = vadd.f32 %v4492_v23, %v1118_v47 }
 0x251   : > { %842 = vst.msk [vmem:[#allocation2 + $0x20] sm:$0xf] %vm833_vm6, %v809_v45 }
 0x252   : > { %1029 = vst.msk [vmem:[#allocation3 + $0x20] sm:$0xf] %vm833_vm6, %v997_v46  ;;  %v1185_v58 = vpack.c.bf16 %v1119_v50, %v1119_v50 }
 0x254   : > { %1217 = vst.msk [vmem:[#allocation4 + $0x24] sm:$0xf] %vm833_vm6, %v1185_v58  ;;  %v743_v57 = vpop.f32.mrf.mxu2  ;;  %v931_v53 = vpop.f32.mrf.mxu3 }
 0x255   : > { %v744_v56 = vadd.f32 %v4502_v54, %v743_v57  ;;  %v932_v1 = vadd.f32 %v4507_v49, %v931_v53 }
 0x257   : > { %v810_v51 = vpack.c.bf16 %v744_v56, %v744_v56  ;;  %v998_v59 = vpack.c.bf16 %v932_v1, %v932_v1  ;;  %v1121_v60 = vpop.f32.mrf.mxu1 }
 0x258   : > { %v1122_v22 = vadd.f32 %v4492_v23, %v1121_v60 }
 0x259   : > { %843 = vst.msk [vmem:[#allocation2 + $0x24] sm:$0xf] %vm833_vm6, %v810_v51  ;;  %3317 = vmatmul.msk.bf16.gmra.mxu2 %vm285_vm0, %v4439_v6  ;;  %3357 = vmatmul.msk.bf16.gmra.mxu3 %vm285_vm0, %v4439_v6 }
 0x25a   : > { %1030 = vst.msk [vmem:[#allocation3 + $0x24] sm:$0xf] %vm833_vm6, %v998_v59  ;;  %v1186_v63 = vpack.c.bf16 %v1122_v22, %v1122_v22  ;;  %3397 = vmatmul.msk.bf16.gmra.mxu1 %vm285_vm0, %v4439_v6 }
 0x25c   : > { %1218 = vst.msk [vmem:[#allocation4 + $0x28] sm:$0xf] %vm833_vm6, %v1186_v63  ;;  %v746_v0 = vpop.f32.mrf.mxu2  ;;  %v934_v31 = vpop.f32.mrf.mxu3 }
 0x25d   : > { %v747_v40 = vadd.f32 %v4502_v54, %v746_v0  ;;  %v935_v4 = vadd.f32 %v4507_v49, %v934_v31 }
 0x25f   : > { %v811_v8 = vpack.c.bf16 %v747_v40, %v747_v40  ;;  %v999_v48 = vpack.c.bf16 %v935_v4, %v935_v4  ;;  %v1123_v5 = vpop.f32.mrf.mxu1 }
 0x260   : > { %v1124_v7 = vadd.f32 %v4492_v23, %v1123_v5 }
 0x261   : > { %844 = vst.msk [vmem:[#allocation2 + $0x28] sm:$0xf] %vm833_vm6, %v811_v8 }
 0x262   : > { %1031 = vst.msk [vmem:[#allocation3 + $0x28] sm:$0xf] %vm833_vm6, %v999_v48  ;;  %v1187_v2 = vpack.c.bf16 %v1124_v7, %v1124_v7 }
 0x264   : > { %1219 = vst.msk [vmem:[#allocation4 + $0x2c] sm:$0xf] %vm833_vm6, %v1187_v2  ;;  %v748_v6 = vpop.f32.mrf.mxu2  ;;  %v936_v10 = vpop.f32.mrf.mxu3 }
 0x265   : > { %v749_v15 = vadd.f32 %v4502_v54, %v748_v6  ;;  %v937_v27 = vadd.f32 %v4507_v49, %v936_v10 }
 0x267   : > { %v812_v36 = vpack.c.bf16 %v749_v15, %v749_v15  ;;  %v1000_v11 = vpack.c.bf16 %v937_v27, %v937_v27  ;;  %v1126_v43 = vpop.f32.mrf.mxu1 }
 0x268   : > { %v1127_v17 = vadd.f32 %v4492_v23, %v1126_v43 }
 0x269   : > { %845 = vst.msk [vmem:[#allocation2 + $0x2c] sm:$0xf] %vm833_vm6, %v812_v36  ;;  %3318 = vmatmul.msk.bf16.gmra.mxu2 %vm285_vm0, %v4443_v9  ;;  %3358 = vmatmul.msk.bf16.gmra.mxu3 %vm285_vm0, %v4443_v9 }
 0x26a   : > { %1032 = vst.msk [vmem:[#allocation3 + $0x2c] sm:$0xf] %vm833_vm6, %v1000_v11  ;;  %v1188_v14 = vpack.c.bf16 %v1127_v17, %v1127_v17  ;;  %3398 = vmatmul.msk.bf16.gmra.mxu1 %vm285_vm0, %v4443_v9  ;;  %v3708_v11 = vld [vmem:[#allocation4 + $0x20] sm:$0xff] }
 0x26b   : > { %v3709_v5 = vld [vmem:[#allocation4 + $0x28] sm:$0xff] }
 0x26c   : > { %1220 = vst.msk [vmem:[#allocation4 + $0x30] sm:$0xf] %vm833_vm6, %v1188_v14  ;;  %v751_v16 = vpop.f32.mrf.mxu2  ;;  %v939_v12 = vpop.f32.mrf.mxu3 }
 0x26d   : > { %v752_v20 = vadd.f32 %v4502_v54, %v751_v16  ;;  %v940_v55 = vadd.f32 %v4507_v49, %v939_v12  ;;  %v3707_v12 = vld [vmem:[#allocation4 + $0x18] sm:$0xff] }
 0x26f   : > { %v813_v26 = vpack.c.bf16 %v752_v20, %v752_v20  ;;  %v1001_v52 = vpack.c.bf16 %v940_v55, %v940_v55  ;;  %v1128_v18 = vpop.f32.mrf.mxu1 }
 0x270   : > { %v1129_v61 = vadd.f32 %v4492_v23, %v1128_v18 }
 0x271   : > { %846 = vst.msk [vmem:[#allocation2 + $0x30] sm:$0xf] %vm833_vm6, %v813_v26 }
 0x272   : > { %1033 = vst.msk [vmem:[#allocation3 + $0x30] sm:$0xf] %vm833_vm6, %v1001_v52  ;;  %v1189_v19 = vpack.c.bf16 %v1129_v61, %v1129_v61 }
 0x274   : > { %1221 = vst.msk [vmem:[#allocation4 + $0x34] sm:$0xf] %vm833_vm6, %v1189_v19  ;;  %v753_v9 = vpop.f32.mrf.mxu2  ;;  %v941_v24 = vpop.f32.mrf.mxu3 }
 0x275   : > { %v754_v25 = vadd.f32 %v4502_v54, %v753_v9  ;;  %v942_v28 = vadd.f32 %v4507_v49, %v941_v24  ;;  %v3706_v9 = vld [vmem:[#allocation4 + $0x10] sm:$0xff]  ;;  %v3693_v24 = vld [vmem:[#allocation3 + $0x28] sm:$0xff] }
 0x277   : > { %v814_v30 = vpack.c.bf16 %v754_v25, %v754_v25  ;;  %v1002_v33 = vpack.c.bf16 %v942_v28, %v942_v28  ;;  %v1131_v62 = vpop.f32.mrf.mxu1 }
 0x278   : > { %v1132_v34 = vadd.f32 %v4492_v23, %v1131_v62 }
 0x279   : > { %847 = vst.msk [vmem:[#allocation2 + $0x34] sm:$0xf] %vm833_vm6, %v814_v30  ;;  %3319 = vmatmul.msk.bf16.gmra.mxu2 %vm285_vm0, %v4445_v32  ;;  %3359 = vmatmul.msk.bf16.gmra.mxu3 %vm285_vm0, %v4445_v32  ;;  %v1528_v30 = vsel %vm285_vm0, %v3693_v24, 0 }
 0x27a   : > { %1034 = vst.msk [vmem:[#allocation3 + $0x34] sm:$0xf] %vm833_vm6, %v1002_v33  ;;  %v1190_v35 = vpack.c.bf16 %v1132_v34, %v1132_v34  ;;  %3399 = vmatmul.msk.bf16.gmra.mxu1 %vm285_vm0, %v4445_v32  ;;  %v3705_v33 = vld [vmem:[#allocation4 + $0x8] sm:$0xff] }
 0x27b   : > { %v3710_v31 = vld [vmem:[#allocation4 + $0x30] sm:$0xff] }
 0x27c   : > { %1222 = vst.msk [vmem:[#allocation4 + $0x38] sm:$0xf] %vm833_vm6, %v1190_v35  ;;  %v756_v3 = vpop.f32.mrf.mxu2  ;;  %v944_v13 = vpop.f32.mrf.mxu3 }
 0x27d   : > { %v757_v21 = vadd.f32 %v4502_v54, %v756_v3  ;;  %v945_v38 = vadd.f32 %v4507_v49, %v944_v13 }
 0x27f   : > { %v815_v39 = vpack.c.bf16 %v757_v21, %v757_v21  ;;  %v1003_v29 = vpack.c.bf16 %v945_v38, %v945_v38  ;;  %v1133_v37 = vpop.f32.mrf.mxu1 }
 0x280   : > { %v1134_v41 = vadd.f32 %v4492_v23, %v1133_v37 }
 0x281   : > { %848 = vst.msk [vmem:[#allocation2 + $0x38] sm:$0xf] %vm833_vm6, %v815_v39  ;;  %v3694_v43 = vld [vmem:[#allocation3 + $0x30] sm:$0xff]  ;;  %v3704_v39 = vld [vmem:[#allocation4] sm:$0xff] }
 0x282   : > { %1035 = vst.msk [vmem:[#allocation3 + $0x38] sm:$0xf] %vm833_vm6, %v1003_v29  ;;  %v1191_v44 = vpack.c.bf16 %v1134_v41, %v1134_v41  ;;  %v1531_v16 = vsel %vm285_vm0, %v3694_v43, 0  ;;  %v3692_v29 = vld [vmem:[#allocation3 + $0x20] sm:$0xff] }
 0x284   : > { %1223 = vst.msk [vmem:[#allocation4 + $0x3c] sm:$0xf] %vm833_vm6, %v1191_v44  ;;  %v758_v32 = vpop.f32.mrf.mxu2  ;;  %v946_v42 = vpop.f32.mrf.mxu3  ;;  %v1525_v44 = vsel %vm285_vm0, %v3692_v29, 0 }
 0x285   : > { %v759_v45 = vadd.f32 %v4502_v54, %v758_v32  ;;  %v947_v46 = vadd.f32 %v4507_v49, %v946_v42 }
 0x287   : > { %v816_v47 = vpack.c.bf16 %v759_v45, %v759_v45  ;;  %v1004_v50 = vpack.c.bf16 %v947_v46, %v947_v46  ;;  %v1136_v58 = vpop.f32.mrf.mxu1 }
 0x288   : > { %v1137_v57 = vadd.f32 %v4492_v23, %v1136_v58 }
 0x289   : > { %849 = vst.msk [vmem:[#allocation2 + $0x3c] sm:$0xf] %vm833_vm6, %v816_v47 }
 0x28a   : > { %1036 = vst.msk [vmem:[#allocation3 + $0x3c] sm:$0xf] %vm833_vm6, %v1004_v50  ;;  %v1192_v53 = vpack.c.bf16 %v1137_v57, %v1137_v57  ;;  %v3691_v57 = vld [vmem:[#allocation3 + $0x18] sm:$0xff] }
 0x28b   : > { %v3711_v56 = vld [vmem:[#allocation4 + $0x38] sm:$0xff] }
 0x28c   : > { %1224 = vst.msk [vmem:[#allocation4 + $0x40] sm:$0xf] %vm833_vm6, %v1192_v53  ;;  %v761_v1 = vpop.f32.mrf.mxu2  ;;  %v949_v51 = vpop.f32.mrf.mxu3  ;;  %2282 = vmatpush.bf16.msra.mxu3 %v3711_v56 }
 0x28d   : > { %v762_v59 = vadd.f32 %v4502_v54, %v761_v1  ;;  %v950_v60 = vadd.f32 %v4507_v49, %v949_v51  ;;  %v1522_v1 = vsel %vm285_vm0, %v3691_v57, 0 }
 0x28f   : > { %v817_v22 = vpack.c.bf16 %v762_v59, %v762_v59  ;;  %v1005_v63 = vpack.c.bf16 %v950_v60, %v950_v60  ;;  %v1138_v0 = vpop.f32.mrf.mxu1 }
 0x290   : > { %v1139_v40 = vadd.f32 %v4492_v23, %v1138_v0  ;;  %2283 = vmatpush.bf16.msra.mxu3 %v3710_v31 }
 0x291   : > { %850 = vst.msk [vmem:[#allocation2 + $0x40] sm:$0xf] %vm833_vm6, %v817_v22  ;;  %v3695_v4 = vld [vmem:[#allocation3 + $0x38] sm:$0xff] }
 0x292   : > { %1037 = vst.msk [vmem:[#allocation3 + $0x40] sm:$0xf] %vm833_vm6, %v1005_v63  ;;  %v1193_v8 = vpack.c.bf16 %v1139_v40, %v1139_v40  ;;  %v1534_v48 = vsel %vm285_vm0, %v3695_v4, 0  ;;  %v3690_v40 = vld [vmem:[#allocation3 + $0x10] sm:$0xff] }
 0x293   : > { %1560 = vmatpush.bf16.xpose.msra.mxu0 %v1534_v48  ;;  %v1519_v48 = vsel %vm285_vm0, %v3690_v40, 0 }
 0x294   : > { %1225 = vst.msk [vmem:[#allocation4 + $0x44] sm:$0xf] %vm833_vm6, %v1193_v8  ;;  %v763_v7 = vpop.f32.mrf.mxu2  ;;  %v951_v2 = vpop.f32.mrf.mxu3  ;;  %2284 = vmatpush.bf16.msra.mxu3 %v3709_v5 }
 0x295   : > { %v764_v6 = vadd.f32 %v4502_v54, %v763_v7  ;;  %v952_v10 = vadd.f32 %v4507_v49, %v951_v2 }
 0x297   : > { %v818_v15 = vpack.c.bf16 %v764_v6, %v764_v6  ;;  %v1006_v27 = vpack.c.bf16 %v952_v10, %v952_v10  ;;  %v1141_v36 = vpop.f32.mrf.mxu1 }
 0x298   : > { %v1142_v17 = vadd.f32 %v4492_v23, %v1141_v36  ;;  %2285 = vmatpush.bf16.msra.mxu3 %v3708_v11  ;;  %v3689_v36 = vld [vmem:[#allocation3 + $0x8] sm:$0xff] }
 0x299   : > { %851 = vst.msk [vmem:[#allocation2 + $0x44] sm:$0xf] %vm833_vm6, %v818_v15 }
 0x29a   : > { %1038 = vst.msk [vmem:[#allocation3 + $0x44] sm:$0xf] %vm833_vm6, %v1006_v27  ;;  %v1194_v14 = vpack.c.bf16 %v1142_v17, %v1142_v17  ;;  %v1516_v17 = vsel %vm285_vm0, %v3689_v36, 0  ;;  %v4742_v36 = vld [vmem:[#allocation2 + $0x10] sm:$0xff] }
 0x29b   : > { %1561 = vmatpush.bf16.xpose.msra.mxu0 %v1531_v16 }
 0x29c   : > { %1226 = vst.msk [vmem:[#allocation4 + $0x48] sm:$0xf] %vm833_vm6, %v1194_v14  ;;  %v766_v20 = vpop.f32.mrf.mxu2  ;;  %v954_v55 = vpop.f32.mrf.mxu3  ;;  %2286 = vmatpush.bf16.msra.mxu3 %v3707_v12 }
 0x29d   : > { %v767_v26 = vadd.f32 %v4502_v54, %v766_v20  ;;  %v955_v52 = vadd.f32 %v4507_v49, %v954_v55 }
 0x29f   : > { %v819_v18 = vpack.c.bf16 %v767_v26, %v767_v26  ;;  %v1007_v61 = vpack.c.bf16 %v955_v52, %v955_v52  ;;  %v1143_v19 = vpop.f32.mrf.mxu1 }
 0x2a0   : > { %v1144_v25 = vadd.f32 %v4492_v23, %v1143_v19  ;;  %2287 = vmatpush.bf16.msra.mxu3 %v3706_v9 }
 0x2a1   : > { %852 = vst.msk [vmem:[#allocation2 + $0x48] sm:$0xf] %vm833_vm6, %v819_v18  ;;  %v3688_v18 = vld [vmem:[#allocation3] sm:$0xff] }
 0x2a2   : > { %1039 = vst.msk [vmem:[#allocation3 + $0x48] sm:$0xf] %vm833_vm6, %v1007_v61  ;;  %v1195_v28 = vpack.c.bf16 %v1144_v25, %v1144_v25  ;;  %v1513_v9 = vsel %vm285_vm0, %v3688_v18, 0 }
 0x2a3   : > { %1562 = vmatpush.bf16.xpose.msra.mxu0 %v1528_v30 }
 0x2a4   : > { %1227 = vst.msk [vmem:[#allocation4 + $0x4c] sm:$0xf] %vm833_vm6, %v1195_v28  ;;  %v768_v62 = vpop.f32.mrf.mxu2  ;;  %v956_v34 = vpop.f32.mrf.mxu3  ;;  %2288 = vmatpush.bf16.msra.mxu3 %v3705_v33 }
 0x2a5   : > { %v769_v35 = vadd.f32 %v4502_v54, %v768_v62  ;;  %v957_v3 = vadd.f32 %v4507_v49, %v956_v34 }
 0x2a7   : > { %v820_v13 = vpack.c.bf16 %v769_v35, %v769_v35  ;;  %v1008_v21 = vpack.c.bf16 %v957_v3, %v957_v3  ;;  %v1146_v38 = vpop.f32.mrf.mxu1  ;;  %v4710_v3 = vld [vmem:[#allocation2] sm:$0xff] }
 0x2a8   : > { %v1147_v37 = vadd.f32 %v4492_v23, %v1146_v38  ;;  %2289 = vmatpush.bf16.msra.mxu3 %v3704_v39 }
 0x2a9   : > { %853 = vst.msk [vmem:[#allocation2 + $0x4c] sm:$0xf] %vm833_vm6, %v820_v13 }
 0x2aa   : > { %1040 = vst.msk [vmem:[#allocation3 + $0x4c] sm:$0xf] %vm833_vm6, %v1008_v21  ;;  %v1196_v41 = vpack.c.bf16 %v1147_v37, %v1147_v37 }
 0x2ab   : > { %1563 = vmatpush.bf16.xpose.msra.mxu0 %v1525_v44 }
 0x2ac   : > { %1228 = vst.msk [vmem:[#allocation4 + $0x50] sm:$0xf] %vm833_vm6, %v1196_v41  ;;  %v771_v32 = vpop.f32.mrf.mxu2  ;;  %v959_v42 = vpop.f32.mrf.mxu3 }
 0x2ad   : > { %v772_v45 = vadd.f32 %v4502_v54, %v771_v32  ;;  %v960_v46 = vadd.f32 %v4507_v49, %v959_v42 }
 0x2af   : > { %v821_v47 = vpack.c.bf16 %v772_v45, %v772_v45  ;;  %v1009_v50 = vpack.c.bf16 %v960_v46, %v960_v46  ;;  %v1148_v58 = vpop.f32.mrf.mxu1 }
 0x2b0   : > { %v1149_v53 = vadd.f32 %v4492_v23, %v1148_v58 }
 0x2b1   : > { %854 = vst.msk [vmem:[#allocation2 + $0x50] sm:$0xf] %vm833_vm6, %v821_v47 }
 0x2b2   : > { %1041 = vst.msk [vmem:[#allocation3 + $0x50] sm:$0xf] %vm833_vm6, %v1009_v50  ;;  %v1197_v56 = vpack.c.bf16 %v1149_v53, %v1149_v53 }
 0x2b3   : > { %1564 = vmatpush.bf16.xpose.msra.mxu0 %v1522_v1  ;;  %v4726_v1 = vld [vmem:[#allocation2 + $0x8] sm:$0xff] }
 0x2b4   : > { %1229 = vst.msk [vmem:[#allocation4 + $0x54] sm:$0xf] %vm833_vm6, %v1197_v56  ;;  %v773_v51 = vpop.f32.mrf.mxu2  ;;  %v961_v59 = vpop.f32.mrf.mxu3 }
 0x2b5   : > { %v774_v60 = vadd.f32 %v4502_v54, %v773_v51  ;;  %v962_v22 = vadd.f32 %v4507_v49, %v961_v59 }
 0x2b7   : > { %v822_v63 = vpack.c.bf16 %v774_v60, %v774_v60  ;;  %v1010_v0 = vpack.c.bf16 %v962_v22, %v962_v22  ;;  %v1151_v31 = vpop.f32.mrf.mxu1 }
 0x2b8   : > { %v1152_v4 = vadd.f32 %v4492_v23, %v1151_v31 }
 0x2b9   : > { %855 = vst.msk [vmem:[#allocation2 + $0x54] sm:$0xf] %vm833_vm6, %v822_v63 }
 0x2ba   : > { %1042 = vst.msk [vmem:[#allocation3 + $0x54] sm:$0xf] %vm833_vm6, %v1010_v0  ;;  %v1198_v8 = vpack.c.bf16 %v1152_v4, %v1152_v4 }
 0x2bb   : > { %1565 = vmatpush.bf16.xpose.msra.mxu0 %v1519_v48 }
 0x2bc   : > { %1230 = vst.msk [vmem:[#allocation4 + $0x58] sm:$0xf] %vm833_vm6, %v1198_v8  ;;  %v776_v5 = vpop.f32.mrf.mxu2  ;;  %v964_v7 = vpop.f32.mrf.mxu3 }
 0x2bd   : > { %v777_v2 = vadd.f32 %v4502_v54, %v776_v5  ;;  %v965_v6 = vadd.f32 %v4507_v49, %v964_v7 }
 0x2bf   : > { %v823_v10 = vpack.c.bf16 %v777_v2, %v777_v2  ;;  %v1011_v15 = vpack.c.bf16 %v965_v6, %v965_v6  ;;  %v1153_v27 = vpop.f32.mrf.mxu1 }
 0x2c0   : > { %v1154_v11 = vadd.f32 %v4492_v23, %v1153_v27 }
 0x2c1   : > { %856 = vst.msk [vmem:[#allocation2 + $0x58] sm:$0xf] %vm833_vm6, %v823_v10 }
 0x2c2   : > { %1043 = vst.msk [vmem:[#allocation3 + $0x58] sm:$0xf] %vm833_vm6, %v1011_v15  ;;  %v1199_v43 = vpack.c.bf16 %v1154_v11, %v1154_v11 }
 0x2c3   : > { %1566 = vmatpush.bf16.xpose.msra.mxu0 %v1516_v17 }
 0x2c4   : > { %1231 = vst.msk [vmem:[#allocation4 + $0x5c] sm:$0xf] %vm833_vm6, %v1199_v43  ;;  %v778_v14 = vpop.f32.mrf.mxu2  ;;  %v966_v16 = vpop.f32.mrf.mxu3 }
 0x2c5   : > { %v779_v12 = vadd.f32 %v4502_v54, %v778_v14  ;;  %v967_v20 = vadd.f32 %v4507_v49, %v966_v16 }
 0x2c7   : > { %v824_v55 = vpack.c.bf16 %v779_v12, %v779_v12  ;;  %v1012_v26 = vpack.c.bf16 %v967_v20, %v967_v20  ;;  %v1156_v52 = vpop.f32.mrf.mxu1 }
 0x2c8   : > { %v1157_v61 = vadd.f32 %v4492_v23, %v1156_v52 }
 0x2c9   : > { %857 = vst.msk [vmem:[#allocation2 + $0x5c] sm:$0xf] %vm833_vm6, %v824_v55 }
 0x2ca   : > { %1044 = vst.msk [vmem:[#allocation3 + $0x5c] sm:$0xf] %vm833_vm6, %v1012_v26  ;;  %v1200_v19 = vpack.c.bf16 %v1157_v61, %v1157_v61 }
 0x2cb   : > { %1567 = vmatpush.bf16.xpose.msra.mxu0 %v1513_v9 }
 0x2cc   : > { %1232 = vst.msk [vmem:[#allocation4 + $0x60] sm:$0xf] %vm833_vm6, %v1200_v19  ;;  %v781_v24 = vpop.f32.mrf.mxu2  ;;  %v969_v25 = vpop.f32.mrf.mxu3 }
 0x2cd   : > { %v782_v28 = vadd.f32 %v4502_v54, %v781_v24  ;;  %v970_v30 = vadd.f32 %v4507_v49, %v969_v25 }
 0x2cf   : > { %v825_v33 = vpack.c.bf16 %v782_v28, %v782_v28  ;;  %v1013_v62 = vpack.c.bf16 %v970_v30, %v970_v30  ;;  %v1158_v34 = vpop.f32.mrf.mxu1 }
 0x2d0   : > { %v1159_v35 = vadd.f32 %v4492_v23, %v1158_v34 }
 0x2d1   : > { %858 = vst.msk [vmem:[#allocation2 + $0x60] sm:$0xf] %vm833_vm6, %v825_v33  ;;  %v4758_v33 = vld [vmem:[#allocation2 + $0x18] sm:$0xff] }
 0x2d2   : > { %1045 = vst.msk [vmem:[#allocation3 + $0x60] sm:$0xf] %vm833_vm6, %v1013_v62  ;;  %v1201_v13 = vpack.c.bf16 %v1159_v35, %v1159_v35  ;;  %3528 = vmatmul.msk.bf16.vlgmr.msra.gmra.mxu0 %vm285_vm0, %v4710_v3 }
 0x2d4   : > { %1233 = vst.msk [vmem:[#allocation4 + $0x64] sm:$0xf] %vm833_vm6, %v1201_v13  ;;  %v783_v21 = vpop.f32.mrf.mxu2  ;;  %v971_v38 = vpop.f32.mrf.mxu3 }
 0x2d5   : > { %v784_v39 = vadd.f32 %v4502_v54, %v783_v21  ;;  %v972_v29 = vadd.f32 %v4507_v49, %v971_v38 }
 0x2d7   : > { %v826_v37 = vpack.c.bf16 %v784_v39, %v784_v39  ;;  %v1014_v41 = vpack.c.bf16 %v972_v29, %v972_v29  ;;  %v1161_v44 = vpop.f32.mrf.mxu1 }
 0x2d8   : > { %v1162_v32 = vadd.f32 %v4492_v23, %v1161_v44 }
 0x2d9   : > { %859 = vst.msk [vmem:[#allocation2 + $0x64] sm:$0xf] %vm833_vm6, %v826_v37  ;;  %v3676_v37 = vld [vmem:[#allocation2 + $0x20] sm:$0xff] }
 0x2da   : > { %1046 = vst.msk [vmem:[#allocation3 + $0x64] sm:$0xf] %vm833_vm6, %v1014_v41  ;;  %v1202_v42 = vpack.c.bf16 %v1162_v32, %v1162_v32 }
 0x2dc   : > { %1234 = vst.msk [vmem:[#allocation4 + $0x68] sm:$0xf] %vm833_vm6, %v1202_v42  ;;  %v786_v45 = vpop.f32.mrf.mxu2  ;;  %v974_v46 = vpop.f32.mrf.mxu3 }
 0x2dd   : > { %v787_v47 = vadd.f32 %v4502_v54, %v786_v45  ;;  %v975_v50 = vadd.f32 %v4507_v49, %v974_v46  ;;  %v3715_v45 = vld [vmem:[#allocation4 + $0x58] sm:$0xff]  ;;  %v3714_v46 = vld [vmem:[#allocation4 + $0x50] sm:$0xff] }
 0x2df   : > { %v827_v58 = vpack.c.bf16 %v787_v47, %v787_v47  ;;  %v1015_v57 = vpack.c.bf16 %v975_v50, %v975_v50  ;;  %v1163_v53 = vpop.f32.mrf.mxu1  ;;  %v3677_v50 = vld [vmem:[#allocation2 + $0x28] sm:$0xff] }
 0x2e0   : > { %v1164_v56 = vadd.f32 %v4492_v23, %v1163_v53  ;;  %v3712_v53 = vld [vmem:[#allocation4 + $0x40] sm:$0xff] }
 0x2e1   : > { %860 = vst.msk [vmem:[#allocation2 + $0x68] sm:$0xf] %vm833_vm6, %v827_v58 }
 0x2e2   : > { %1047 = vst.msk [vmem:[#allocation3 + $0x68] sm:$0xf] %vm833_vm6, %v1015_v57  ;;  %v1203_v51 = vpack.c.bf16 %v1164_v56, %v1164_v56  ;;  %3529 = vmatmul.msk.bf16.gmra.mxu0 %vm285_vm0, %v4726_v1  ;;  %v3713_v57 = vld [vmem:[#allocation4 + $0x48] sm:$0xff]  ;;  %v3700_v56 = vld [vmem:[#allocation3 + $0x60] sm:$0xff] }
 0x2e4   : > { %1235 = vst.msk [vmem:[#allocation4 + $0x6c] sm:$0xf] %vm833_vm6, %v1203_v51  ;;  %v788_v59 = vpop.f32.mrf.mxu2  ;;  %v976_v60 = vpop.f32.mrf.mxu3  ;;  %v1549_v51 = vsel %vm285_vm0, %v3700_v56, 0 }
 0x2e5   : > { %v789_v22 = vadd.f32 %v4502_v54, %v788_v59  ;;  %v977_v63 = vadd.f32 %v4507_v49, %v976_v60  ;;  %v3699_v59 = vld [vmem:[#allocation3 + $0x58] sm:$0xff]  ;;  %v3678_v60 = vld [vmem:[#allocation2 + $0x30] sm:$0xff] }
 0x2e7   : > { %v828_v0 = vpack.c.bf16 %v789_v22, %v789_v22  ;;  %v1016_v31 = vpack.c.bf16 %v977_v63, %v977_v63  ;;  %v1166_v40 = vpop.f32.mrf.mxu1  ;;  %v1546_v22 = vsel %vm285_vm0, %v3699_v59, 0  ;;  %v3698_v63 = vld [vmem:[#allocation3 + $0x50] sm:$0xff] }
 0x2e8   : > { %v1167_v4 = vadd.f32 %v4492_v23, %v1166_v40  ;;  %v3679_v40 = vld [vmem:[#allocation2 + $0x38] sm:$0xff] }
 0x2e9   : > { %861 = vst.msk [vmem:[#allocation2 + $0x6c] sm:$0xf] %vm833_vm6, %v828_v0  ;;  %v1543_v0 = vsel %vm285_vm0, %v3698_v63, 0 }
 0x2ea   : > { %1048 = vst.msk [vmem:[#allocation3 + $0x6c] sm:$0xf] %vm833_vm6, %v1016_v31  ;;  %v1204_v8 = vpack.c.bf16 %v1167_v4, %v1167_v4  ;;  %v3697_v31 = vld [vmem:[#allocation3 + $0x48] sm:$0xff] }
 0x2eb   : > { %v3717_v32 = vld [vmem:[#allocation4 + $0x68] sm:$0xff]  ;;  %v1540_v4 = vsel %vm285_vm0, %v3697_v31, 0 }
 0x2ec   : > { %1236 = vst.msk [vmem:[#allocation4 + $0x70] sm:$0xf] %vm833_vm6, %v1204_v8  ;;  %v791_v48 = vpop.f32.mrf.mxu2  ;;  %v979_v5 = vpop.f32.mrf.mxu3  ;;  %v3696_v8 = vld [vmem:[#allocation3 + $0x40] sm:$0xff] }
 0x2ed   : > { %v792_v7 = vadd.f32 %v4502_v54, %v791_v48  ;;  %v980_v2 = vadd.f32 %v4507_v49, %v979_v5  ;;  %v1537_v48 = vsel %vm285_vm0, %v3696_v8, 0  ;;  %v3680_v5 = vld [vmem:[#allocation2 + $0x40] sm:$0xff] }
 0x2ef   : > { %v829_v6 = vpack.c.bf16 %v792_v7, %v792_v7  ;;  %v1017_v10 = vpack.c.bf16 %v980_v2, %v980_v2  ;;  %v1168_v15 = vpop.f32.mrf.mxu1  ;;  %v3681_v7 = vld [vmem:[#allocation2 + $0x48] sm:$0xff]  ;;  %v3682_v2 = vld [vmem:[#allocation2 + $0x50] sm:$0xff] }
 0x2f0   : > { %v1169_v27 = vadd.f32 %v4492_v23, %v1168_v15 }
 0x2f1   : > { %862 = vst.msk [vmem:[#allocation2 + $0x70] sm:$0xf] %vm833_vm6, %v829_v6  ;;  %v3701_v47 = vld [vmem:[#allocation3 + $0x68] sm:$0xff] }
 0x2f2   : > { %1049 = vst.msk [vmem:[#allocation3 + $0x70] sm:$0xf] %vm833_vm6, %v1017_v10  ;;  %v1205_v11 = vpack.c.bf16 %v1169_v27, %v1169_v27  ;;  %3530 = vmatmul.msk.bf16.gmra.mxu0 %vm285_vm0, %v4742_v36  ;;  %v1552_v58 = vsel %vm285_vm0, %v3701_v47, 0  ;;  %v3683_v10 = vld [vmem:[#allocation2 + $0x58] sm:$0xff]  ;;  %v3684_v27 = vld [vmem:[#allocation2 + $0x60] sm:$0xff] }
 0x2f4   : > { %1237 = vst.msk [vmem:[#allocation4 + $0x74] sm:$0xf] %vm833_vm6, %v1205_v11  ;;  %v793_v43 = vpop.f32.mrf.mxu2  ;;  %v981_v17 = vpop.f32.mrf.mxu3 }
 0x2f5   : > { %v794_v14 = vadd.f32 %v4502_v54, %v793_v43  ;;  %v982_v16 = vadd.f32 %v4507_v49, %v981_v17 }
 0x2f7   : > { %v830_v12 = vpack.c.bf16 %v794_v14, %v794_v14  ;;  %v1018_v20 = vpack.c.bf16 %v982_v16, %v982_v16  ;;  %v1171_v55 = vpop.f32.mrf.mxu1 }
 0x2f8   : > { %v1172_v26 = vadd.f32 %v4492_v23, %v1171_v55 }
 0x2f9   : > { %863 = vst.msk [vmem:[#allocation2 + $0x74] sm:$0xf] %vm833_vm6, %v830_v12 }
 0x2fa   : > { %1050 = vst.msk [vmem:[#allocation3 + $0x74] sm:$0xf] %vm833_vm6, %v1018_v20  ;;  %v1206_v52 = vpack.c.bf16 %v1172_v26, %v1172_v26 }
 0x2fb   : > { %v3718_v29 = vld [vmem:[#allocation4 + $0x70] sm:$0xff] }
 0x2fc   : > { %1238 = vst.msk [vmem:[#allocation4 + $0x78] sm:$0xf] %vm833_vm6, %v1206_v52  ;;  %v796_v18 = vpop.f32.mrf.mxu2  ;;  %v984_v61 = vpop.f32.mrf.mxu3 }
 0x2fd   : > { %v797_v19 = vadd.f32 %v4502_v54, %v796_v18  ;;  %v985_v9 = vadd.f32 %v4507_v49, %v984_v61 }
 0x2ff   : > { %v831_v24 = vpack.c.bf16 %v797_v19, %v797_v19  ;;  %v1019_v25 = vpack.c.bf16 %v985_v9, %v985_v9  ;;  %v1173_v28 = vpop.f32.mrf.mxu1 }
 0x300   : > { %v1174_v30 = vadd.f32 %v4492_v23, %v1173_v28  ;;  %v3686_v17 = vld [vmem:[#allocation2 + $0x70] sm:$0xff] }
 0x301   : > { %864 = vst.msk [vmem:[#allocation2 + $0x78] sm:$0xf] %vm833_vm6, %v831_v24 }
 0x302   : > { %1051 = vst.msk [vmem:[#allocation3 + $0x78] sm:$0xf] %vm833_vm6, %v1019_v25  ;;  %v1207_v62 = vpack.c.bf16 %v1174_v30, %v1174_v30  ;;  %3531 = vmatmul.msk.bf16.gmra.mxu0 %vm285_vm0, %v4758_v33 }
 0x304   : > { %1239 = vst.msk [vmem:[#allocation4 + $0x7c] sm:$0xf] %vm833_vm6, %v1207_v62  ;;  %v798_v34 = vpop.f32.mrf.mxu2  ;;  %v986_v35 = vpop.f32.mrf.mxu3 }
 0x305   : > { %v799_v13 = vadd.f32 %v4502_v54, %v798_v34  ;;  %v987_v21 = vadd.f32 %v4507_v49, %v986_v35  ;;  %v3716_v54 = vld [vmem:[#allocation4 + $0x60] sm:$0xff]  ;;  %v3702_v49 = vld [vmem:[#allocation3 + $0x70] sm:$0xff] }
 0x306   : > { %v1555_v42 = vsel %vm285_vm0, %v3702_v49, 0 }
 0x307   : > { %v832_v38 = vpack.c.bf16 %v799_v13, %v799_v13  ;;  %v1020_v23 = vpack.c.bf16 %v987_v21, %v987_v21 }
 0x309   : > { %865 = vst.msk [vmem:[#allocation2 + $0x7c] sm:$0xf] %vm833_vm6, %v832_v38 }
 0x30a   : > { %1052 = vst.msk [vmem:[#allocation3 + $0x7c] sm:$0xf] %vm833_vm6, %v1020_v23 }
 0x30b   : > { %v3719_v39 = vld [vmem:[#allocation4 + $0x78] sm:$0xff] }
 0x30c   : > { %2371 = vmatpush.bf16.msra.mxu1 %v3719_v39 }
 0x310   : > { %2372 = vmatpush.bf16.msra.mxu1 %v3718_v29  ;;  %v4812_v16 = vld [vmem:[#allocation2 + $0x78] sm:$0xff] }
 0x311   : > { %v3703_v41 = vld [vmem:[#allocation3 + $0x78] sm:$0xff] }
 0x312   : > { %3532 = vmatmul.msk.bf16.gmra.mxu0 %vm285_vm0, %v3676_v37  ;;  %v1558_v44 = vsel %vm285_vm0, %v3703_v41, 0 }
 0x313   : > { %1649 = vmatpush.bf16.xpose.msrb.mxu2 %v1558_v44 }
 0x314   : > { %2373 = vmatpush.bf16.msra.mxu1 %v3717_v32 }
 0x318   : > { %2374 = vmatpush.bf16.msra.mxu1 %v3716_v54 }
 0x31b   : > { %1650 = vmatpush.bf16.xpose.msrb.mxu2 %v1555_v42 }
 0x31c   : > { %2375 = vmatpush.bf16.msra.mxu1 %v3715_v45 }
 0x320   : > { %2376 = vmatpush.bf16.msra.mxu1 %v3714_v46 }
 0x322   : > { %3533 = vmatmul.msk.bf16.gmra.mxu0 %vm285_vm0, %v3677_v50 }
 0x323   : > { %1651 = vmatpush.bf16.xpose.msrb.mxu2 %v1552_v58 }
 0x324   : > { %2377 = vmatpush.bf16.msra.mxu1 %v3713_v57 }
 0x328   : > { %2378 = vmatpush.bf16.msra.mxu1 %v3712_v53 }
 0x32b   : > { %1652 = vmatpush.bf16.xpose.msrb.mxu2 %v1549_v51 }
 0x332   : > { %3534 = vmatmul.msk.bf16.gmra.mxu0 %vm285_vm0, %v3678_v60 }
 0x333   : > { %1653 = vmatpush.bf16.xpose.msrb.mxu2 %v1546_v22 }
 0x33b   : > { %1654 = vmatpush.bf16.xpose.msrb.mxu2 %v1543_v0 }
 0x342   : > { %3535 = vmatmul.msk.bf16.gmra.mxu0 %vm285_vm0, %v3679_v40 }
 0x343   : > { %1655 = vmatpush.bf16.xpose.msrb.mxu2 %v1540_v4 }
 0x34b   : > { %1656 = vmatpush.bf16.xpose.msrb.mxu2 %v1537_v48 }
 0x34f   : > { %v4789_v6 = vpop.f32.mrf.mxu0 }
 0x352   : > { %3536 = vmatmul.msk.bf16.gmra.mxu0 %vm285_vm0, %v3680_v5  ;;  %3544 = vmatmul.msk.bf16.vlgmr.msrb.gmra.mxu2 %vm285_vm0, %v4710_v3 }
 0x357   : > { %v4794_v3 = vpop.f32.mrf.mxu0 }
 0x35f   : > { %v4796_v15 = vpop.f32.mrf.mxu0 }
 0x362   : > { %3537 = vmatmul.msk.bf16.gmra.mxu0 %vm285_vm0, %v3681_v7  ;;  %3545 = vmatmul.msk.bf16.gmra.mxu2 %vm285_vm0, %v4726_v1 }
 0x367   : > { %v4800_v1 = vpop.f32.mrf.mxu0 }
 0x36f   : > { %v4804_v11 = vpop.f32.mrf.mxu0 }
 0x372   : > { %3538 = vmatmul.msk.bf16.gmra.mxu0 %vm285_vm0, %v3682_v2  ;;  %3546 = vmatmul.msk.bf16.gmra.mxu2 %vm285_vm0, %v4742_v36  ;;  %v3685_v36 = vld [vmem:[#allocation2 + $0x68] sm:$0xff] }
 0x377   : > { %v4806_v43 = vpop.f32.mrf.mxu0 }
 0x37f   : > { %v4810_v14 = vpop.f32.mrf.mxu0 }
 0x382   : > { %3539 = vmatmul.msk.bf16.gmra.mxu0 %vm285_vm0, %v3683_v10  ;;  %3547 = vmatmul.msk.bf16.gmra.mxu2 %vm285_vm0, %v4758_v33 }
 0x387   : > { %v4814_v12 = vpop.f32.mrf.mxu0 }
 0x38f   : > { %v4833_v19 = vpop.f32.mrf.mxu0 }
 0x392   : > { %3540 = vmatmul.msk.bf16.gmra.mxu0 %vm285_vm0, %v3684_v27  ;;  %3548 = vmatmul.msk.bf16.gmra.mxu2 %vm285_vm0, %v3676_v37 }
 0x397   : > { %v4839_v25 = vpop.f32.mrf.mxu0 }
 0x39f   : > { %v4846_v33 = vpop.f32.mrf.mxu0 }
 0x3a2   : > { %3541 = vmatmul.msk.bf16.gmra.mxu0 %vm285_vm0, %v3685_v36  ;;  %3549 = vmatmul.msk.bf16.gmra.mxu2 %vm285_vm0, %v3677_v50 }
 0x3a7   : > { %v4853_v35 = vpop.f32.mrf.mxu0 }
 0x3af   : > { %v4863_v39 = vpop.f32.mrf.mxu0 }
 0x3b2   : > { %3542 = vmatmul.msk.bf16.gmra.mxu0 %vm285_vm0, %v3686_v17  ;;  %3550 = vmatmul.msk.bf16.gmra.mxu2 %vm285_vm0, %v3678_v60 }
 0x3b7   : > { %v4870_v41 = vpop.f32.mrf.mxu0 }
 0x3bf   : > { %v4877_v54 = vpop.f32.mrf.mxu0 }
 0x3c2   : > { %3543 = vmatmul.msk.bf16.gmra.mxu0 %vm285_vm0, %v4812_v16  ;;  %3551 = vmatmul.msk.bf16.gmra.mxu2 %vm285_vm0, %v3679_v40 }
 0x3c7   : > { %v4883_v45 = vpop.f32.mrf.mxu0 }
 0x3cf   : > { %v4894_v57 = vpop.f32.mrf.mxu0 }
 0x3d2   : > { %3552 = vmatmul.msk.bf16.gmra.mxu2 %vm285_vm0, %v3680_v5 }
 0x3d5   : > { %v4820_v20 = vpop.f32.mrf.mxu2 }
 0x3d6   : > { %v1738_v55 = vmax.f32 %v4789_v6, %v4820_v20 }
 0x3d7   : > { %v4900_v51 = vpop.f32.mrf.mxu0 }
 0x3d8   : > { %1739 = vmax.xlane.f32.xlu0 %v1738_v55 }
 0x3dd   : > { %v4824_v26 = vpop.f32.mrf.mxu2 }
 0x3de   : > { %v1741_v52 = vmax.f32 %v4794_v3, %v4824_v26 }
 0x3df   : > { %v4908_v22 = vpop.f32.mrf.mxu0 }
 0x3e0   : > { %1742 = vmax.xlane.f32.xlu0 %v1741_v52 }
 0x3e2   : > { %3553 = vmatmul.msk.bf16.gmra.mxu2 %vm285_vm0, %v3681_v7 }
 0x3e5   : > { %v4829_v18 = vpop.f32.mrf.mxu2 }
 0x3e6   : > { %v1744_v61 = vmax.f32 %v4796_v15, %v4829_v18 }
 0x3e8   : > { %1745 = vmax.xlane.f32.xlu1 %v1744_v61 }
 0x3ed   : > { %v4835_v9 = vpop.f32.mrf.mxu2 }
 0x3ee   : > { %v1747_v24 = vmax.f32 %v4800_v1, %v4835_v9 }
 0x3f0   : > { %1748 = vmax.xlane.f32.xlu1 %v1747_v24 }
 0x3f2   : > { %3554 = vmatmul.msk.bf16.gmra.mxu2 %vm285_vm0, %v3682_v2 }
 0x3f5   : > { %v4842_v28 = vpop.f32.mrf.mxu2 }
 0x3f6   : > { %v1750_v30 = vmax.f32 %v4804_v11, %v4842_v28 }
 0x3f8   : > { %1751 = vmax.xlane.f32.xlu2 %v1750_v30 }
 0x3fd   : > { %v4848_v62 = vpop.f32.mrf.mxu2 }
 0x3fe   : > { %v1753_v34 = vmax.f32 %v4806_v43, %v4848_v62 }
 0x400   : > { %1754 = vmax.xlane.f32.xlu2 %v1753_v34 }
 0x402   : > { %3555 = vmatmul.msk.bf16.gmra.mxu2 %vm285_vm0, %v3683_v10  ;;  %v4918_v10 = vpop.f32.mrf.mxu0 }
 0x405   : > { %v4855_v13 = vpop.f32.mrf.mxu2 }
 0x406   : > { %v1756_v21 = vmax.f32 %v4810_v14, %v4855_v13 }
 0x408   : > { %1757 = vmax.xlane.f32.xlu0 %v1756_v21 }
 0x40a   : > { %v4937_v30 = vpop.f32.mrf.mxu0 }
 0x40d   : > { %v4859_v38 = vpop.f32.mrf.mxu2 }
 0x40e   : > { %v1759_v23 = vmax.f32 %v4814_v12, %v4859_v38 }
 0x410   : > { %1760 = vmax.xlane.f32.xlu1 %v1759_v23 }
 0x412   : > { %3556 = vmatmul.msk.bf16.gmra.mxu2 %vm285_vm0, %v3684_v27 }
 0x415   : > { %v4866_v29 = vpop.f32.mrf.mxu2 }
 0x416   : > { %v1762_v37 = vmax.f32 %v4833_v19, %v4866_v29 }
 0x418   : > { %1763 = vmax.xlane.f32.xlu2 %v1762_v37 }
 0x41d   : > { %v4872_v44 = vpop.f32.mrf.mxu2 }
 0x41e   : > { %v1765_v32 = vmax.f32 %v4839_v25, %v4872_v44 }
 0x420   : > { %1766 = vmax.xlane.f32.xlu0 %v1765_v32 }
 0x422   : > { %3557 = vmatmul.msk.bf16.gmra.mxu2 %vm285_vm0, %v3685_v36 }
 0x425   : > { %v4879_v49 = vpop.f32.mrf.mxu2 }
 0x426   : > { %v1768_v42 = vmax.f32 %v4846_v33, %v4879_v49 }
 0x428   : > { %1769 = vmax.xlane.f32.xlu1 %v1768_v42 }
 0x42d   : > { %v4885_v46 = vpop.f32.mrf.mxu2 }
 0x42e   : > { %v1771_v47 = vmax.f32 %v4853_v35, %v4885_v46 }
 0x430   : > { %1772 = vmax.xlane.f32.xlu2 %v1771_v47 }
 0x432   : > { %3558 = vmatmul.msk.bf16.gmra.mxu2 %vm285_vm0, %v3686_v17 }
 0x435   : > { %v4890_v50 = vpop.f32.mrf.mxu2 }
 0x436   : > { %v1774_v58 = vmax.f32 %v4863_v39, %v4890_v50 }
 0x438   : > { %1775 = vmax.xlane.f32.xlu0 %v1774_v58 }
 0x43d   : > { %v4896_v53 = vpop.f32.mrf.mxu2 }
 0x43e   : > { %v1777_v56 = vmax.f32 %v4870_v41, %v4896_v53 }
 0x440   : > { %1778 = vmax.xlane.f32.xlu1 %v1777_v56 }
 0x442   : > { %3559 = vmatmul.msk.bf16.gmra.mxu2 %vm285_vm0, %v4812_v16 }
 0x445   : > { %v4904_v59 = vpop.f32.mrf.mxu2 }
 0x446   : > { %v1780_v60 = vmax.f32 %v4877_v54, %v4904_v59 }
 0x448   : > { %1781 = vmax.xlane.f32.xlu2 %v1780_v60 }
 0x44b   : > { %v1740_v63 = vpop.xlane.xlu0 %1739 }
 0x44c   : > { %v1834_v31 = vsub.f32 %v4789_v6, %v1740_v63  ;;  %v1835_v4 = vsub.f32 %v4820_v20, %v1740_v63  ;;  %v4950_v63 = vpop.f32.mrf.mxu0 }
 0x44d   : > { %v4910_v0 = vpop.f32.mrf.mxu2 }
 0x44e   : > { %v1783_v40 = vmax.f32 %v4883_v45, %v4910_v0  ;;  %v1898_v8 = vmul.f32 1.442695, %v1834_v31  ;;  %v1900_v48 = vmul.f32 1.442695, %v1835_v4 }
 0x450   : > { %1784 = vmax.xlane.f32.xlu0 %v1783_v40  ;;  %3746 = vpow2.f32 %v1898_v8 }
 0x451   : > { %3748 = vpow2.f32 %v1900_v48 }
 0x453   : > { %v1743_v5 = vpop.xlane.xlu0 %1742 }
 0x454   : > { %v1836_v7 = vsub.f32 %v4794_v3, %v1743_v5  ;;  %v1837_v2 = vsub.f32 %v4824_v26, %v1743_v5 }
 0x455   : > { %v4920_v27 = vpop.f32.mrf.mxu2 }
 0x456   : > { %v1902_v36 = vmul.f32 1.442695, %v1836_v7  ;;  %v1904_v6 = vmul.f32 1.442695, %v1837_v2  ;;  %v1786_v17 = vmax.f32 %v4894_v57, %v4920_v27  ;;  %v4924_v20 = vpop.eup %3746 }
 0x457   : > { %v4926_v3 = vpop.eup %3748 }
 0x458   : > { %3750 = vpow2.f32 %v1902_v36  ;;  %1787 = vmax.xlane.f32.xlu1 %v1786_v17  ;;  %v4970_v17 = vpop.f32.mrf.mxu0 }
 0x459   : > { %3752 = vpow2.f32 %v1904_v6 }
 0x45b   : > { %v1746_v16 = vpop.xlane.xlu1 %1745 }
 0x45c   : > { %v1838_v52 = vsub.f32 %v4796_v15, %v1746_v16  ;;  %v1839_v21 = vsub.f32 %v4829_v18, %v1746_v16 }
 0x45d   : > { %v4928_v55 = vpop.f32.mrf.mxu2 }
 0x45e   : > { %v4930_v26 = vpop.eup %3750  ;;  %v1789_v61 = vmax.f32 %v4900_v51, %v4928_v55  ;;  %v1906_v37 = vmul.f32 1.442695, %v1838_v52  ;;  %v1908_v15 = vmul.f32 1.442695, %v1839_v21 }
 0x45f   : > { %v4935_v24 = vpop.eup %3752  ;;  %v2122_v34 = vpack.c.bf16 %v4930_v26, %v4924_v20 }
 0x460   : > { %v2123_v23 = vpack.c.bf16 %v4935_v24, %v4926_v3  ;;  %1790 = vmax.xlane.f32.xlu2 %v1789_v61  ;;  %3754 = vpow2.f32 %v1906_v37 }
 0x461   : > { %2290 = vmatmul.bf16.vlgmr.msra.gmra.mxu3 %v2122_v34  ;;  %3756 = vpow2.f32 %v1908_v15 }
 0x462   : > { %2379 = vmatmul.bf16.vlgmr.msra.gmra.mxu1 %v2123_v23 }
 0x463   : > { %v1749_v32 = vpop.xlane.xlu1 %1748 }
 0x464   : > { %v1840_v42 = vsub.f32 %v4800_v1, %v1749_v32  ;;  %v1841_v47 = vsub.f32 %v4835_v9, %v1749_v32 }
 0x465   : > { %v4946_v58 = vpop.f32.mrf.mxu2 }
 0x466   : > { %v1910_v56 = vmul.f32 1.442695, %v1840_v42  ;;  %v1912_v60 = vmul.f32 1.442695, %v1841_v47  ;;  %v1792_v18 = vmax.f32 %v4908_v22, %v4946_v58  ;;  %v4952_v40 = vpop.eup %3754 }
 0x467   : > { %v4954_v1 = vpop.eup %3756 }
 0x468   : > { %3758 = vpow2.f32 %v1910_v56  ;;  %1793 = vmax.xlane.f32.xlu0 %v1792_v18 }
 0x469   : > { %3760 = vpow2.f32 %v1912_v60 }
 0x46b   : > { %v1752_v31 = vpop.xlane.xlu2 %1751 }
 0x46c   : > { %v1842_v8 = vsub.f32 %v4804_v11, %v1752_v31  ;;  %v1843_v7 = vsub.f32 %v4842_v28, %v1752_v31 }
 0x46d   : > { %v4956_v9 = vpop.f32.mrf.mxu2 }
 0x46e   : > { %v4958_v4 = vpop.eup %3758  ;;  %v1795_v48 = vmax.f32 %v4918_v10, %v4956_v9  ;;  %v1914_v6 = vmul.f32 1.442695, %v1842_v8  ;;  %v1916_v11 = vmul.f32 1.442695, %v1843_v7 }
 0x46f   : > { %v4963_v5 = vpop.eup %3760  ;;  %v2124_v2 = vpack.c.bf16 %v4958_v4, %v4952_v40 }
 0x470   : > { %1796 = vmax.xlane.f32.xlu1 %v1795_v48  ;;  %v2125_v36 = vpack.c.bf16 %v4963_v5, %v4954_v1  ;;  %3762 = vpow2.f32 %v1914_v6 }
 0x471   : > { %2295 = vmatmul.bf16.gmra.mxu3 %v2124_v2  ;;  %3764 = vpow2.f32 %v1916_v11 }
 0x472   : > { %2384 = vmatmul.bf16.gmra.mxu1 %v2125_v36 }
 0x473   : > { %v1755_v16 = vpop.xlane.xlu2 %1754 }
 0x474   : > { %v1844_v52 = vsub.f32 %v4806_v43, %v1755_v16  ;;  %v1845_v61 = vsub.f32 %v4848_v62, %v1755_v16  ;;  %v4982_v43 = vpop.f32.mrf.mxu0 }
 0x475   : > { %v4974_v34 = vpop.f32.mrf.mxu2 }
 0x476   : > { %v1918_v28 = vmul.f32 1.442695, %v1844_v52  ;;  %v1920_v21 = vmul.f32 1.442695, %v1845_v61  ;;  %v1798_v23 = vmax.f32 %v4937_v30, %v4974_v34  ;;  %v4978_v15 = vpop.eup %3762 }
 0x477   : > { %v4980_v32 = vpop.eup %3764 }
 0x478   : > { %3766 = vpow2.f32 %v1918_v28  ;;  %1799 = vmax.xlane.f32.xlu2 %v1798_v23  ;;  %v2029_v23 = vadd.f32 %v4935_v24, %v4930_v26 }
 0x479   : > { %3768 = vpow2.f32 %v1920_v21 }
 0x47b   : > { %v1758_v37 = vpop.xlane.xlu0 %1757 }
 0x47c   : > { %v1846_v47 = vsub.f32 %v4810_v14, %v1758_v37  ;;  %v1847_v18 = vsub.f32 %v4855_v13, %v1758_v37  ;;  %v2026_v13 = vadd.f32 %v4926_v3, %v4924_v20  ;;  %v5006_v61 = vpop.f32.mrf.mxu0 }
 0x47d   : > { %v4984_v62 = vpop.f32.mrf.mxu2 }
 0x47e   : > { %v4986_v42 = vpop.eup %3766  ;;  %v1801_v56 = vmax.f32 %v4950_v63, %v4984_v62  ;;  %v1922_v48 = vmul.f32 1.442695, %v1846_v47  ;;  %v1924_v7 = vmul.f32 1.442695, %v1847_v18 }
 0x47f   : > { %v4991_v60 = vpop.eup %3768  ;;  %v2126_v31 = vpack.c.bf16 %v4986_v42, %v4978_v15 }
 0x480   : > { %1802 = vmax.xlane.f32.xlu0 %v1801_v56  ;;  %v2127_v8 = vpack.c.bf16 %v4991_v60, %v4980_v32  ;;  %3770 = vpow2.f32 %v1922_v48 }
 0x481   : > { %2300 = vmatmul.bf16.gmra.mxu3 %v2126_v31  ;;  %3772 = vpow2.f32 %v1924_v7 }
 0x482   : > { %2389 = vmatmul.bf16.gmra.mxu1 %v2127_v8 }
 0x483   : > { %v1761_v2 = vpop.xlane.xlu1 %1760 }
 0x484   : > { %v1848_v14 = vsub.f32 %v4814_v12, %v1761_v2  ;;  %v1849_v36 = vsub.f32 %v4859_v38, %v1761_v2  ;;  %v5028_v8 = vpop.f32.mrf.mxu0  ;;  %v2032_v2 = vadd.f32 %v4954_v1, %v4952_v40 }
 0x485   : > { %v5000_v6 = vpop.f32.mrf.mxu2 }
 0x486   : > { %v1926_v11 = vmul.f32 1.442695, %v1848_v14  ;;  %v1928_v16 = vmul.f32 1.442695, %v1849_v36  ;;  %v1804_v52 = vmax.f32 %v4970_v17, %v5000_v6  ;;  %v5008_v38 = vpop.eup %3770 }
 0x487   : > { %v5010_v28 = vpop.eup %3772 }
 0x488   : > { %3774 = vpow2.f32 %v1926_v11  ;;  %2027 = vadd.xlane.f32.xlu0 %v2026_v13  ;;  %1805 = vmax.xlane.f32.xlu1 %v1804_v52 }
 0x489   : > { %3776 = vpow2.f32 %v1928_v16 }
 0x48b   : > { %v1764_v12 = vpop.xlane.xlu2 %1763 }
 0x48c   : > { %v1850_v3 = vsub.f32 %v4833_v19, %v1764_v12  ;;  %v1851_v56 = vsub.f32 %v4866_v29, %v1764_v12  ;;  %v5038_v11 = vpop.f32.mrf.mxu0  ;;  %v2035_v12 = vadd.f32 %v4963_v5, %v4958_v4 }
 0x48d   : > { %v5012_v21 = vpop.f32.mrf.mxu2 }
 0x48e   : > { %v5014_v20 = vpop.eup %3774  ;;  %v1807_v37 = vmax.f32 %v4982_v43, %v5012_v21  ;;  %v1930_v19 = vmul.f32 1.442695, %v1850_v3  ;;  %v1932_v26 = vmul.f32 1.442695, %v1851_v56 }
 0x48f   : > { %v5021_v47 = vpop.eup %3776  ;;  %v2128_v18 = vpack.c.bf16 %v5014_v20, %v5008_v38 }
 0x490   : > { %2030 = vadd.xlane.f32.xlu1 %v2029_v23  ;;  %1808 = vmax.xlane.f32.xlu2 %v1807_v37  ;;  %v2129_v31 = vpack.c.bf16 %v5021_v47, %v5010_v28  ;;  %3778 = vpow2.f32 %v1930_v19 }
 0x491   : > { %2305 = vmatmul.bf16.gmra.mxu3 %v2128_v18  ;;  %3780 = vpow2.f32 %v1932_v26 }
 0x492   : > { %2394 = vmatmul.bf16.gmra.mxu1 %v2129_v31 }
 0x493   : > { %v1767_v24 = vpop.xlane.xlu0 %1766 }
 0x494   : > { %v1852_v48 = vsub.f32 %v4839_v25, %v1767_v24  ;;  %v1853_v7 = vsub.f32 %v4872_v44, %v1767_v24  ;;  %v5062_v26 = vpop.f32.mrf.mxu0  ;;  %v2038_v24 = vadd.f32 %v4980_v32, %v4978_v15  ;;  %v2041_v32 = vadd.f32 %v4991_v60, %v4986_v42 }
 0x495   : > { %v5032_v29 = vpop.f32.mrf.mxu2 }
 0x496   : > { %v1934_v14 = vmul.f32 1.442695, %v1852_v48  ;;  %v1936_v36 = vmul.f32 1.442695, %v1853_v7  ;;  %v1810_v13 = vmax.f32 %v5006_v61, %v5032_v29  ;;  %v5040_v44 = vpop.eup %3778 }
 0x497   : > { %v5042_v16 = vpop.eup %3780 }
 0x498   : > { %3782 = vpow2.f32 %v1934_v14  ;;  %2033 = vadd.xlane.f32.xlu1 %v2032_v2  ;;  %1811 = vmax.xlane.f32.xlu2 %v1810_v13 }
 0x499   : > { %3784 = vpow2.f32 %v1936_v36 }
 0x49b   : > { %v1770_v25 = vpop.xlane.xlu1 %1769 }
 0x49c   : > { %v1854_v1 = vsub.f32 %v4846_v33, %v1770_v25  ;;  %v1855_v37 = vsub.f32 %v4879_v49, %v1770_v25 }
 0x49d   : > { %v5044_v52 = vpop.f32.mrf.mxu2 }
 0x49e   : > { %v5046_v40 = vpop.eup %3782  ;;  %v1813_v3 = vmax.f32 %v5028_v8, %v5044_v52  ;;  %v1938_v33 = vmul.f32 1.442695, %v1854_v1  ;;  %v1940_v31 = vmul.f32 1.442695, %v1855_v37 }
 0x49f   : > { %v5053_v23 = vpop.eup %3784  ;;  %v2130_v56 = vpack.c.bf16 %v5046_v40, %v5040_v44 }
 0x4a0   : > { %2036 = vadd.xlane.f32.xlu2 %v2035_v12  ;;  %1814 = vmax.xlane.f32.xlu0 %v1813_v3  ;;  %v2131_v18 = vpack.c.bf16 %v5053_v23, %v5042_v16  ;;  %3786 = vpow2.f32 %v1938_v33  ;;  %v5085_v12 = vpop.f32.mrf.mxu0 }
 0x4a1   : > { %2310 = vmatmul.bf16.gmra.mxu3 %v2130_v56  ;;  %3788 = vpow2.f32 %v1940_v31 }
 0x4a2   : > { %2399 = vmatmul.bf16.gmra.mxu1 %v2131_v18 }
 0x4a3   : > { %v1773_v4 = vpop.xlane.xlu2 %1772 }
 0x4a4   : > { %v1856_v5 = vsub.f32 %v4853_v35, %v1773_v4  ;;  %v1857_v19 = vsub.f32 %v4885_v46, %v1773_v4 }
 0x4a5   : > { %v5064_v49 = vpop.f32.mrf.mxu2 }
 0x4a6   : > { %v1942_v48 = vmul.f32 1.442695, %v1856_v5  ;;  %v1944_v7 = vmul.f32 1.442695, %v1857_v19  ;;  %v1816_v2 = vmax.f32 %v5038_v11, %v5064_v49  ;;  %v5070_v46 = vpop.eup %3786 }
 0x4a7   : > { %v5072_v14 = vpop.eup %3788 }
 0x4a8   : > { %3790 = vpow2.f32 %v1942_v48  ;;  %2039 = vadd.xlane.f32.xlu2 %v2038_v24  ;;  %1817 = vmax.xlane.f32.xlu0 %v1816_v2  ;;  %v5100_v24 = vpop.f32.mrf.mxu0 }
 0x4a9   : > { %3792 = vpow2.f32 %v1944_v7 }
 0x4ab   : > { %v1776_v35 = vpop.xlane.xlu0 %1775 }
 0x4ac   : > { %v1858_v15 = vsub.f32 %v4863_v39, %v1776_v35  ;;  %v1859_v3 = vsub.f32 %v4890_v50, %v1776_v35  ;;  %v2044_v50 = vadd.f32 %v5010_v28, %v5008_v38  ;;  %v2047_v35 = vadd.f32 %v5021_v47, %v5014_v20 }
 0x4ad   : > { %v5074_v36 = vpop.f32.mrf.mxu2 }
 0x4ae   : > { %v5076_v13 = vpop.eup %3790  ;;  %v1819_v25 = vmax.f32 %v5062_v26, %v5074_v36  ;;  %v1946_v56 = vmul.f32 1.442695, %v1858_v15  ;;  %v1948_v42 = vmul.f32 1.442695, %v1859_v3 }
 0x4af   : > { %v5083_v1 = vpop.eup %3792  ;;  %v2132_v37 = vpack.c.bf16 %v5076_v13, %v5070_v46 }
 0x4b0   : > { %2042 = vadd.xlane.f32.xlu0 %v2041_v32  ;;  %1820 = vmax.xlane.f32.xlu1 %v1819_v25  ;;  %v2133_v39 = vpack.c.bf16 %v5083_v1, %v5072_v14  ;;  %3794 = vpow2.f32 %v1946_v56 }
 0x4b1   : > { %2315 = vmatmul.bf16.gmra.mxu3 %v2132_v37  ;;  %3796 = vpow2.f32 %v1948_v42 }
 0x4b2   : > { %2404 = vmatmul.bf16.gmra.mxu1 %v2133_v39 }
 0x4b3   : > { %v1779_v60 = vpop.xlane.xlu1 %1778 }
 0x4b4   : > { %v1860_v18 = vsub.f32 %v4870_v41, %v1779_v60  ;;  %v1861_v33 = vsub.f32 %v4896_v53, %v1779_v60  ;;  %v3723_v41 = vld [vmem:[%s6147_s5 + $0x18] sm:$0xff] }
 0x4b5   : > { %v5094_v31 = vpop.f32.mrf.mxu2  ;;  %3041 = vmatpush.bf16.msrb.mxu0 %v3723_v41  ;;  %3725 = vmatpush.bf16.msra.mxu2 %v3723_v41 }
 0x4b6   : > { %v1950_v4 = vmul.f32 1.442695, %v1860_v18  ;;  %v1952_v5 = vmul.f32 1.442695, %v1861_v33  ;;  %v1822_v19 = vmax.f32 %v5085_v12, %v5094_v31  ;;  %v3795_v38 = vpop.eup %3794  ;;  %3724 = vmatpush.bf16.msrb.mxu1 %v3723_v41 }
 0x4b7   : > { %v3797_v28 = vpop.eup %3796 }
 0x4b8   : > { %3798 = vpow2.f32 %v1950_v4  ;;  %2045 = vadd.xlane.f32.xlu0 %v2044_v50  ;;  %1823 = vmax.xlane.f32.xlu1 %v1822_v19 }
 0x4b9   : > { %3800 = vpow2.f32 %v1952_v5 }
 0x4bb   : > { %v1782_v53 = vpop.xlane.xlu2 %1781 }
 0x4bc   : > { %v1862_v2 = vsub.f32 %v4877_v54, %v1782_v53  ;;  %v1863_v25 = vsub.f32 %v4904_v59, %v1782_v53  ;;  %v5119_v54 = vpop.f32.mrf.mxu0  ;;  %v2050_v59 = vadd.f32 %v5042_v16, %v5040_v44  ;;  %v2059_v16 = vadd.f32 %v5083_v1, %v5076_v13 }
 0x4bd   : > { %v5105_v48 = vpop.f32.mrf.mxu2  ;;  %v2053_v53 = vadd.f32 %v5053_v23, %v5046_v40  ;;  %v2062_v23 = vadd.f32 %v3797_v28, %v3795_v38 }
 0x4be   : > { %v5107_v7 = vpop.eup %3798  ;;  %v1825_v15 = vmax.f32 %v5100_v24, %v5105_v48  ;;  %v1954_v39 = vmul.f32 1.442695, %v1862_v2  ;;  %v1956_v56 = vmul.f32 1.442695, %v1863_v25 }
 0x4bf   : > { %v5114_v32 = vpop.eup %3800  ;;  %v2134_v3 = vpack.c.bf16 %v5107_v7, %v3795_v38 }
 0x4c0   : > { %2048 = vadd.xlane.f32.xlu1 %v2047_v35  ;;  %1826 = vmax.xlane.f32.xlu2 %v1825_v15  ;;  %v2135_v37 = vpack.c.bf16 %v5114_v32, %v3797_v28  ;;  %3802 = vpow2.f32 %v1954_v39 }
 0x4c1   : > { %2320 = vmatmul.bf16.gmra.mxu3 %v2134_v3  ;;  %3804 = vpow2.f32 %v1956_v56 }
 0x4c2   : > { %2409 = vmatmul.bf16.gmra.mxu1 %v2135_v37 }
 0x4c3   : > { %v1785_v20 = vpop.xlane.xlu0 %1784 }
 0x4c4   : > { %v1864_v47 = vsub.f32 %v4883_v45, %v1785_v20  ;;  %v1865_v42 = vsub.f32 %v4910_v0, %v1785_v20  ;;  %v5129_v0 = vpop.f32.mrf.mxu0 }
 0x4c5   : > { %v5123_v60 = vpop.f32.mrf.mxu2 }
 0x4c6   : > { %v1958_v18 = vmul.f32 1.442695, %v1864_v47  ;;  %v1960_v33 = vmul.f32 1.442695, %v1865_v42  ;;  %v1828_v50 = vmax.f32 %v5119_v54, %v5123_v60  ;;  %v3803_v45 = vpop.eup %3802 }
 0x4c7   : > { %v3805_v5 = vpop.eup %3804 }
 0x4c8   : > { %3806 = vpow2.f32 %v1958_v18  ;;  %2051 = vadd.xlane.f32.xlu1 %v2050_v59  ;;  %1829 = vmax.xlane.f32.xlu2 %v1828_v50  ;;  %v2068_v20 = vadd.f32 %v3805_v5, %v3803_v45 }
 0x4c9   : > { %3808 = vpow2.f32 %v1960_v33 }
 0x4cb   : > { %v1788_v4 = vpop.xlane.xlu1 %1787 }
 0x4cc   : > { %v1866_v44 = vsub.f32 %v4894_v57, %v1788_v4  ;;  %v1867_v15 = vsub.f32 %v4920_v27, %v1788_v4  ;;  %v2056_v27 = vadd.f32 %v5072_v14, %v5070_v46  ;;  %v2065_v46 = vadd.f32 %v5114_v32, %v5107_v7 }
 0x4cd   : > { %v5131_v19 = vpop.f32.mrf.mxu2 }
 0x4ce   : > { %v3807_v41 = vpop.eup %3806  ;;  %v1831_v2 = vmax.f32 %v5129_v0, %v5131_v19  ;;  %v1962_v37 = vmul.f32 1.442695, %v1866_v44  ;;  %v1964_v57 = vmul.f32 1.442695, %v1867_v15 }
 0x4cf   : > { %v3809_v35 = vpop.eup %3808  ;;  %v2136_v25 = vpack.c.bf16 %v3807_v41, %v3803_v45 }
 0x4d0   : > { %2060 = vadd.xlane.f32.xlu1 %v2059_v16  ;;  %2054 = vadd.xlane.f32.xlu2 %v2053_v53  ;;  %v2137_v3 = vpack.c.bf16 %v3809_v35, %v3805_v5  ;;  %3810 = vpow2.f32 %v1962_v37  ;;  %v2071_v33 = vadd.f32 %v3809_v35, %v3807_v41 }
 0x4d1   : > { %1832 = vmax.xlane.f32.xlu0 %v1831_v2  ;;  %2325 = vmatmul.bf16.gmra.mxu3 %v2136_v25  ;;  %3812 = vpow2.f32 %v1964_v57 }
 0x4d2   : > { %2414 = vmatmul.bf16.gmra.mxu1 %v2137_v3 }
 0x4d3   : > { %v1791_v39 = vpop.xlane.xlu2 %1790 }
 0x4d4   : > { %v1868_v13 = vsub.f32 %v4900_v51, %v1791_v39  ;;  %v1869_v40 = vsub.f32 %v4928_v55, %v1791_v39 }
 0x4d6   : > { %v1966_v1 = vmul.f32 1.442695, %v1868_v13  ;;  %v1968_v56 = vmul.f32 1.442695, %v1869_v40  ;;  %v3811_v42 = vpop.eup %3810 }
 0x4d7   : > { %v3813_v38 = vpop.eup %3812 }
 0x4d8   : > { %3814 = vpow2.f32 %v1966_v1  ;;  %2069 = vadd.xlane.f32.xlu1 %v2068_v20  ;;  %2063 = vadd.xlane.f32.xlu2 %v2062_v23  ;;  %v2074_v35 = vadd.f32 %v3813_v38, %v3811_v42 }
 0x4d9   : > { %3816 = vpow2.f32 %v1968_v56  ;;  %2057 = vadd.xlane.f32.xlu0 %v2056_v27 }
 0x4db   : > { %v1794_v47 = vpop.xlane.xlu0 %1793 }
 0x4dc   : > { %v1870_v51 = vsub.f32 %v4908_v22, %v1794_v47  ;;  %v1871_v55 = vsub.f32 %v4946_v58, %v1794_v47 }
 0x4de   : > { %v3815_v28 = vpop.eup %3814  ;;  %v1970_v59 = vmul.f32 1.442695, %v1870_v51  ;;  %v1972_v18 = vmul.f32 1.442695, %v1871_v55 }
 0x4df   : > { %v3817_v50 = vpop.eup %3816  ;;  %v5147_v4 = vpop.f32.mrf.mxu1  ;;  %v2138_v14 = vpack.c.bf16 %v3815_v28, %v3811_v42 }
 0x4e0   : > { %3818 = vpow2.f32 %v1970_v59  ;;  %2072 = vadd.xlane.f32.xlu2 %v2071_v33  ;;  %v2139_v45 = vpack.c.bf16 %v3817_v50, %v3813_v38  ;;  %v2077_v5 = vadd.f32 %v3817_v50, %v3815_v28 }
 0x4e1   : > { %3820 = vpow2.f32 %v1972_v18  ;;  %2066 = vadd.xlane.f32.xlu0 %v2065_v46  ;;  %2330 = vmatmul.bf16.gmra.mxu3 %v2138_v14  ;;  %v3721_v46 = vld [vmem:[%s6147_s5 + $0x8] sm:$0xff] }
 0x4e2   : > { %2419 = vmatmul.bf16.gmra.mxu1 %v2139_v45  ;;  %2078 = vadd.xlane.f32.xlu1 %v2077_v5 }
 0x4e3   : > { %v1797_v22 = vpop.xlane.xlu1 %1796 }
 0x4e4   : > { %v1872_v58 = vsub.f32 %v4918_v10, %v1797_v22  ;;  %v1873_v41 = vsub.f32 %v4956_v9, %v1797_v22  ;;  %v5153_v44 = vpop.f32.mrf.mxu3 }
 0x4e6   : > { %v3819_v16 = vpop.eup %3818  ;;  %v1974_v53 = vmul.f32 1.442695, %v1872_v58  ;;  %v1976_v7 = vmul.f32 1.442695, %v1873_v41 }
 0x4e7   : > { %v3821_v32 = vpop.eup %3820  ;;  %v5155_v2 = vpop.f32.mrf.mxu1 }
 0x4e8   : > { %3822 = vpow2.f32 %v1974_v53  ;;  %v2080_v15 = vadd.f32 %v3821_v32, %v3819_v16 }
 0x4e9   : > { %3824 = vpow2.f32 %v1976_v7  ;;  %2075 = vadd.xlane.f32.xlu0 %v2074_v35  ;;  %v3720_v35 = vld [vmem:[%s6147_s5] sm:$0xff] }
 0x4ea   : > { %2081 = vadd.xlane.f32.xlu2 %v2080_v15 }
 0x4eb   : > { %v1800_v25 = vpop.xlane.xlu2 %1799 }
 0x4ec   : > { %v1874_v3 = vsub.f32 %v4937_v30, %v1800_v25  ;;  %v1875_v10 = vsub.f32 %v4974_v34, %v1800_v25  ;;  %v5159_v9 = vpop.f32.mrf.mxu3 }
 0x4ee   : > { %v3823_v37 = vpop.eup %3822  ;;  %v1978_v57 = vmul.f32 1.442695, %v1874_v3  ;;  %v1980_v39 = vmul.f32 1.442695, %v1875_v10 }
 0x4ef   : > { %v3825_v13 = vpop.eup %3824  ;;  %v5161_v40 = vpop.f32.mrf.mxu1  ;;  %v2140_v23 = vpack.c.bf16 %v3823_v37, %v3819_v16 }
 0x4f0   : > { %3826 = vpow2.f32 %v1978_v57  ;;  %v2141_v1 = vpack.c.bf16 %v3825_v13, %v3821_v32  ;;  %v2083_v56 = vadd.f32 %v3825_v13, %v3823_v37 }
 0x4f1   : > { %3828 = vpow2.f32 %v1980_v39  ;;  %2335 = vmatmul.bf16.gmra.mxu3 %v2140_v23 }
 0x4f2   : > { %2424 = vmatmul.bf16.gmra.mxu1 %v2141_v1  ;;  %2084 = vadd.xlane.f32.xlu0 %v2083_v56 }
 0x4f3   : > { %v1803_v20 = vpop.xlane.xlu0 %1802 }
 0x4f4   : > { %v1876_v30 = vsub.f32 %v4950_v63, %v1803_v20  ;;  %v1877_v34 = vsub.f32 %v4984_v62, %v1803_v20  ;;  %v5165_v27 = vpop.f32.mrf.mxu3  ;;  %v3722_v63 = vld [vmem:[%s6147_s5 + $0x10] sm:$0xff] }
 0x4f5   : > { %3042 = vmatpush.bf16.msrb.mxu0 %v3722_v63  ;;  %3726 = vmatpush.bf16.msrb.mxu1 %v3722_v63 }
 0x4f6   : > { %v3827_v47 = vpop.eup %3826  ;;  %v1982_v42 = vmul.f32 1.442695, %v1876_v30  ;;  %v1984_v51 = vmul.f32 1.442695, %v1877_v34  ;;  %3727 = vmatpush.bf16.msra.mxu2 %v3722_v63 }
 0x4f7   : > { %v3829_v55 = vpop.eup %3828  ;;  %v5167_v38 = vpop.f32.mrf.mxu1 }
 0x4f8   : > { %3830 = vpow2.f32 %v1982_v42  ;;  %v2086_v28 = vadd.f32 %v3829_v55, %v3827_v47 }
 0x4f9   : > { %3832 = vpow2.f32 %v1984_v51  ;;  %3043 = vmatpush.bf16.msrb.mxu0 %v3721_v46  ;;  %3728 = vmatpush.bf16.msrb.mxu1 %v3721_v46 }
 0x4fa   : > { %2087 = vadd.xlane.f32.xlu1 %v2086_v28  ;;  %3729 = vmatpush.bf16.msra.mxu2 %v3721_v46 }
 0x4fb   : > { %v5169_v59 = vpop.xlane.xlu0 %2027  ;;  %v1806_v18 = vpop.xlane.xlu1 %1805 }
 0x4fc   : > { %3834 = vrcp.f32 %v5169_v59  ;;  %v5175_v62 = vpop.f32.mrf.mxu3  ;;  %v1878_v33 = vsub.f32 %v4970_v17, %v1806_v18  ;;  %v1879_v50 = vsub.f32 %v5000_v6, %v1806_v18  ;;  %v2469_v30 = vand.u32 2147483647, %v5169_v59 }
 0x4fd   : > { %3044 = vmatpush.bf16.msrb.mxu0 %v3720_v35  ;;  %3730 = vmatpush.bf16.msrb.mxu1 %v3720_v35  ;;  %v2471_v42 = vand.u32 2147483648, %v5169_v59  ;;  %vm2465_vm8 = vweird.f32 %v5169_v59 }
 0x4fe   : > { %v3831_v14 = vpop.eup %3830  ;;  %v1986_v5 = vmul.f32 1.442695, %v1878_v33  ;;  %v1988_v22 = vmul.f32 1.442695, %v1879_v50  ;;  %3731 = vmatpush.bf16.msra.mxu2 %v3720_v35  ;;  %vm5217_vm10 = vcmp.eq.f32.partialorder %v2469_v30, 8.507059e+37 }
 0x4ff   : > { %v3833_v45 = vpop.eup %3832  ;;  %v5182_v58 = vpop.f32.mrf.mxu1  ;;  %v2142_v41 = vpack.c.bf16 %v3831_v14, %v3827_v47 }
 0x500   : > { %v2143_v16 = vpack.c.bf16 %v3833_v45, %v3829_v55  ;;  %v2089_v53 = vadd.f32 %v3833_v45, %v3831_v14  ;;  %3836 = vpow2.f32 %v1986_v5 }
 0x501   : > { %2340 = vmatmul.bf16.gmra.mxu3 %v2142_v41  ;;  %3838 = vpow2.f32 %v1988_v22  ;;  %v2472_v41 = vor.u32 1.1754944e-38, %v2471_v42 }
 0x502   : > { %v5184_v17 = vpop.eup %3834  ;;  %2429 = vmatmul.bf16.gmra.mxu1 %v2143_v16  ;;  %2090 = vadd.xlane.f32.xlu2 %v2089_v53 }
 0x503   : > { %v2461_v6 = vmul.f32 %v5184_v17, %v5169_v59  ;;  %v5188_v7 = vpop.xlane.xlu1 %2030  ;;  %v1809_v32 = vpop.xlane.xlu2 %1808  ;;  %vm2466_vm7 = vweird.f32 %v5184_v17 }
 0x504   : > { %3840 = vrcp.f32 %v5188_v7  ;;  %v5194_v15 = vpop.f32.mrf.mxu3  ;;  %v1880_v3 = vsub.f32 %v4982_v43, %v1809_v32  ;;  %v1881_v10 = vsub.f32 %v5012_v21, %v1809_v32  ;;  %vm5213_vm9 = vmor %vm2465_vm8, %vm2466_vm7  ;;  %v2483_v33 = vand.u32 2147483647, %v5188_v7 }
 0x505   : > { %v2462_v25 = vsub.f32 1.0, %v2461_v6  ;;  %v2485_v50 = vand.u32 2147483648, %v5188_v7  ;;  %vm2479_vm12 = vweird.f32 %v5188_v7 }
 0x506   : > { %v3837_v37 = vpop.eup %3836  ;;  %v1990_v39 = vmul.f32 1.442695, %v1880_v3  ;;  %v1992_v13 = vmul.f32 1.442695, %v1881_v10  ;;  %vm2484_vm14 = vcmp.eq.f32.partialorder %v2483_v33, 8.507059e+37 }
 0x507   : > { %v2463_v57 = vmul.f32 %v5184_v17, %v2462_v25  ;;  %v5199_v23 = vpop.f32.mrf.mxu1  ;;  %v3839_v1 = vpop.eup %3838  ;;  %v2486_v3 = vor.u32 1.1754944e-38, %v2485_v50 }
 0x508   : > { %3842 = vpow2.f32 %v1990_v39  ;;  %v2092_v56 = vadd.f32 %v3839_v1, %v3837_v37 }
 0x509   : > { %3844 = vpow2.f32 %v1992_v13  ;;  %v2464_v43 = vadd.f32 %v5184_v17, %v2463_v57 }
 0x50a   : > { %v3841_v20 = vpop.eup %3840  ;;  %2093 = vadd.xlane.f32.xlu0 %v2092_v56 }
 0x50b   : > { %v2475_v21 = vmul.f32 %v3841_v20, %v5188_v7  ;;  %v5205_v34 = vpop.xlane.xlu1 %2033  ;;  %v1812_v47 = vpop.xlane.xlu2 %1811  ;;  %v2468_v59 = vsel %vm5213_vm9, %v5184_v17, %v2464_v43  ;;  %vm2480_vm11 = vweird.f32 %v3841_v20  ;;  %v2381_v17 = vadd.f32 %v5147_v4, %v5153_v44 }
 0x50c   : > { %3846 = vrcp.f32 %v5205_v34  ;;  %v5209_v51 = vpop.f32.mrf.mxu3  ;;  %v1882_v28 = vsub.f32 %v5006_v61, %v1812_v47  ;;  %v1883_v46 = vsub.f32 %v5032_v29, %v1812_v47  ;;  %v2473_v25 = vsel %vm5217_vm10, %v2472_v41, %v2468_v59  ;;  %vm2481_vm13 = vmor %vm2479_vm12, %vm2480_vm11 }
 0x50d   : > { %v2476_v55 = vsub.f32 1.0, %v2475_v21  ;;  %v2383_v7 = vadd.f32 %v5155_v2, %v5159_v9  ;;  %v2908_v13 = vmul.f32 %v2473_v25, %v2381_v17  ;;  %vm2493_vm1 = vweird.f32 %v5205_v34 }
 0x50e   : > { %v3843_v14 = vpop.eup %3842  ;;  %v1994_v45 = vmul.f32 1.442695, %v1882_v28  ;;  %v1996_v16 = vmul.f32 1.442695, %v1883_v46 }
 0x50f   : > { %v2477_v61 = vmul.f32 %v3841_v20, %v2476_v55  ;;  %v5227_v5 = vpop.f32.mrf.mxu1  ;;  %v3845_v22 = vpop.eup %3844  ;;  %v2144_v53 = vpack.c.bf16 %v3843_v14, %v3837_v37 }
 0x510   : > { %3848 = vpow2.f32 %v1994_v45  ;;  %v2145_v32 = vpack.c.bf16 %v3845_v22, %v3839_v1  ;;  %v2095_v29 = vadd.f32 %v3845_v22, %v3843_v14  ;;  %v2499_v45 = vand.u32 2147483648, %v5205_v34 }
 0x511   : > { %v2478_v6 = vadd.f32 %v3841_v20, %v2477_v61  ;;  %3850 = vpow2.f32 %v1996_v16  ;;  %2345 = vmatmul.bf16.gmra.mxu3 %v2144_v53  ;;  %v2497_v61 = vand.u32 2147483647, %v5205_v34 }
 0x512   : > { %v5230_v35 = vpop.eup %3846  ;;  %2434 = vmatmul.bf16.gmra.mxu1 %v2145_v32  ;;  %2096 = vadd.xlane.f32.xlu1 %v2095_v29 }
 0x513   : > { %v2482_v10 = vsel %vm2481_vm13, %v3841_v20, %v2478_v6  ;;  %v2489_v37 = vmul.f32 %v5230_v35, %v5205_v34  ;;  %v5241_v57 = vpop.xlane.xlu2 %2036  ;;  %v1815_v4 = vpop.xlane.xlu0 %1814  ;;  %vm2494_vm15 = vweird.f32 %v5230_v35  ;;  %vm2498_vm6 = vcmp.eq.f32.partialorder %v2497_v61, 8.507059e+37 }
 0x514   : > { %v2487_v44 = vsel %vm2484_vm14, %v2486_v3, %v2482_v10  ;;  %3852 = vrcp.f32 %v5241_v57  ;;  %v5244_v39 = vpop.f32.mrf.mxu3  ;;  %v1884_v2 = vsub.f32 %v5028_v8, %v1815_v4  ;;  %v1885_v9 = vsub.f32 %v5044_v52, %v1815_v4  ;;  %vm5266_vm3 = vmor %vm2493_vm1, %vm2494_vm15 }
 0x515   : > { %v2909_v1 = vmul.f32 %v2487_v44, %v2383_v7  ;;  %v2490_v56 = vsub.f32 1.0, %v2489_v37  ;;  %vm2507_vm2 = vweird.f32 %v5241_v57  ;;  %v2511_v34 = vand.u32 2147483647, %v5241_v57 }
 0x516   : > { %v3849_v20 = vpop.eup %3848  ;;  %v1998_v30 = vmul.f32 1.442695, %v1884_v2  ;;  %v2000_v55 = vmul.f32 1.442695, %v1885_v9  ;;  %v2513_v29 = vand.u32 2147483648, %v5241_v57  ;;  %v2500_v37 = vor.u32 1.1754944e-38, %v2499_v45 }
 0x517   : > { %v5248_v43 = vpop.f32.mrf.mxu1  ;;  %v2940_v21 = vpack.c.bf16 %v2909_v1, %v2908_v13  ;;  %v3851_v47 = vpop.eup %3850  ;;  %v2491_v42 = vmul.f32 %v5230_v35, %v2490_v56  ;;  %v2388_v56 = vadd.f32 %v5167_v38, %v5175_v62  ;;  %vm2512_vm7 = vcmp.eq.f32.partialorder %v2511_v34, 8.507059e+37 }
 0x518   : > { %3854 = vpow2.f32 %v1998_v30  ;;  %v2098_v28 = vadd.f32 %v3851_v47, %v3849_v20  ;;  %v2514_v2 = vor.u32 1.1754944e-38, %v2513_v29 }
 0x519   : > { %3640 = vmatmul.msk.bf16.vlgmr.msrb.gmra.mxu0 %vm285_vm0, %v2940_v21  ;;  %3856 = vpow2.f32 %v2000_v55  ;;  %v2492_v33 = vadd.f32 %v5230_v35, %v2491_v42 }
 0x51a   : > { %v3853_v18 = vpop.eup %3852  ;;  %2099 = vadd.xlane.f32.xlu2 %v2098_v28 }
 0x51b   : > { %v2503_v63 = vmul.f32 %v3853_v18, %v5241_v57  ;;  %v5253_v8 = vpop.xlane.xlu2 %2039  ;;  %v1818_v52 = vpop.xlane.xlu0 %1817  ;;  %vm2508_vm4 = vweird.f32 %v3853_v18  ;;  %v2496_v32 = vsel %vm5266_vm3, %v5230_v35, %v2492_v33  ;;  %v2386_v35 = vadd.f32 %v5161_v40, %v5165_v27 }
 0x51c   : > { %3858 = vrcp.f32 %v5253_v8  ;;  %v5258_v50 = vpop.f32.mrf.mxu3  ;;  %v1886_v14 = vsub.f32 %v5038_v11, %v1818_v52  ;;  %v1887_v59 = vsub.f32 %v5064_v49, %v1818_v52  ;;  %vm5282_vm5 = vmor %vm2507_vm2, %vm2508_vm4  ;;  %v2501_v40 = vsel %vm2498_vm6, %v2500_v37, %v2496_v32 }
 0x51d   : > { %v2504_v46 = vsub.f32 1.0, %v2503_v63  ;;  %vm2521_vm9 = vweird.f32 %v5253_v8  ;;  %v2525_v41 = vand.u32 2147483647, %v5253_v8 }
 0x51e   : > { %v3855_v22 = vpop.eup %3854  ;;  %v2002_v53 = vmul.f32 1.442695, %v1886_v14  ;;  %v2004_v6 = vmul.f32 1.442695, %v1887_v59 }
 0x51f   : > { %v2505_v16 = vmul.f32 %v3853_v18, %v2504_v46  ;;  %v5270_v11 = vpop.f32.mrf.mxu1  ;;  %v3857_v49 = vpop.eup %3856  ;;  %v2146_v17 = vpack.c.bf16 %v3855_v22, %v3849_v20  ;;  %vm2526_vm13 = vcmp.eq.f32.partialorder %v2525_v41, 8.507059e+37 }
 0x520   : > { %3860 = vpow2.f32 %v2002_v53  ;;  %v2147_v3 = vpack.c.bf16 %v3857_v49, %v3851_v47  ;;  %v2101_v7 = vadd.f32 %v3857_v49, %v3855_v22 }
 0x521   : > { %v2506_v25 = vadd.f32 %v3853_v18, %v2505_v16  ;;  %3862 = vpow2.f32 %v2004_v6  ;;  %2350 = vmatmul.bf16.gmra.mxu3 %v2146_v17 }
 0x522   : > { %v5277_v10 = vpop.eup %3858  ;;  %2439 = vmatmul.bf16.gmra.mxu1 %v2147_v3  ;;  %2102 = vadd.xlane.f32.xlu0 %v2101_v7 }
 0x523   : > { %v2510_v44 = vsel %vm5282_vm5, %v3853_v18, %v2506_v25  ;;  %v2517_v13 = vmul.f32 %v5277_v10, %v5253_v8  ;;  %v5292_v1 = vpop.xlane.xlu0 %2042  ;;  %v1821_v57 = vpop.xlane.xlu1 %1820  ;;  %v2910_v18 = vmul.f32 %v2501_v40, %v2386_v35  ;;  %vm2522_vm8 = vweird.f32 %v5277_v10 }
 0x524   : > { %3864 = vrcp.f32 %v5292_v1  ;;  %v5297_v9 = vpop.f32.mrf.mxu3  ;;  %v1888_v20 = vsub.f32 %v5062_v26, %v1821_v57  ;;  %v1889_v30 = vsub.f32 %v5074_v36, %v1821_v57  ;;  %v2515_v21 = vsel %vm2512_vm7, %v2514_v2, %v2510_v44  ;;  %vm5318_vm10 = vmor %vm2521_vm9, %vm2522_vm8 }
 0x525   : > { %v2518_v27 = vsub.f32 1.0, %v2517_v13  ;;  %v2911_v38 = vmul.f32 %v2515_v21, %v2388_v56  ;;  %v2527_v26 = vand.u32 2147483648, %v5253_v8  ;;  %v2541_v8 = vand.u32 2147483648, %v5292_v1 }
 0x526   : > { %v3861_v47 = vpop.eup %3860  ;;  %v2006_v42 = vmul.f32 1.442695, %v1888_v20  ;;  %v2008_v55 = vmul.f32 1.442695, %v1889_v30  ;;  %vm2535_vm12 = vweird.f32 %v5292_v1  ;;  %v2539_v37 = vand.u32 2147483647, %v5292_v1 }
 0x527   : > { %v5301_v28 = vpop.f32.mrf.mxu1  ;;  %v3863_v62 = vpop.eup %3862  ;;  %v2519_v63 = vmul.f32 %v5277_v10, %v2518_v27  ;;  %v2941_v52 = vpack.c.bf16 %v2911_v38, %v2910_v18  ;;  %v2528_v6 = vor.u32 1.1754944e-38, %v2527_v26  ;;  %v2542_v56 = vor.u32 1.1754944e-38, %v2541_v8 }
 0x528   : > { %3866 = vpow2.f32 %v2006_v42  ;;  %v2104_v33 = vadd.f32 %v3863_v62, %v3861_v47  ;;  %vm2540_vm15 = vcmp.eq.f32.partialorder %v2539_v37, 8.507059e+37 }
 0x529   : > { %3868 = vpow2.f32 %v2008_v55  ;;  %3641 = vmatmul.msk.bf16.gmra.mxu0 %vm285_vm0, %v2941_v52  ;;  %v2520_v61 = vadd.f32 %v5277_v10, %v2519_v63 }
 0x52a   : > { %v3865_v46 = vpop.eup %3864  ;;  %2105 = vadd.xlane.f32.xlu0 %v2104_v33 }
 0x52b   : > { %v2531_v36 = vmul.f32 %v3865_v46, %v5292_v1  ;;  %v5307_v14 = vpop.xlane.xlu0 %2045  ;;  %v1824_v59 = vpop.xlane.xlu1 %1823  ;;  %vm2536_vm11 = vweird.f32 %v3865_v46  ;;  %v2524_v17 = vsel %vm5318_vm10, %v5277_v10, %v2520_v61 }
 0x52c   : > { %3870 = vrcp.f32 %v5307_v14  ;;  %v5312_v45 = vpop.f32.mrf.mxu3  ;;  %v1890_v32 = vsub.f32 %v5085_v12, %v1824_v59  ;;  %v1891_v25 = vsub.f32 %v5094_v31, %v1824_v59  ;;  %vm5338_vm14 = vmor %vm2535_vm12, %vm2536_vm11  ;;  %v2391_v31 = vadd.f32 %v5182_v58, %v5194_v15 }
 0x52d   : > { %v2532_v22 = vsub.f32 1.0, %v2531_v36  ;;  %v2529_v57 = vsel %vm2526_vm13, %v2528_v6, %v2524_v17  ;;  %v2393_v58 = vadd.f32 %v5199_v23, %v5209_v51  ;;  %vm2549_vm3 = vweird.f32 %v5307_v14 }
 0x52e   : > { %v5316_v16 = vpop.eup %3866  ;;  %v2010_v44 = vmul.f32 1.442695, %v1890_v32  ;;  %v2012_v40 = vmul.f32 1.442695, %v1891_v25  ;;  %v2912_v21 = vmul.f32 %v2529_v57, %v2391_v31 }
 0x52f   : > { %v2533_v49 = vmul.f32 %v3865_v46, %v2532_v22  ;;  %v5323_v34 = vpop.f32.mrf.mxu1  ;;  %v5325_v29 = vpop.eup %3868  ;;  %v2148_v3 = vpack.c.bf16 %v5316_v16, %v3861_v47  ;;  %v2555_v22 = vand.u32 2147483648, %v5307_v14 }
 0x530   : > { %v2149_v12 = vpack.c.bf16 %v5325_v29, %v3863_v62 }
 0x531   : > { %v2534_v7 = vadd.f32 %v3865_v46, %v2533_v49  ;;  %2355 = vmatmul.bf16.gmra.mxu3 %v2148_v3  ;;  %v2553_v3 = vand.u32 2147483647, %v5307_v14 }
 0x532   : > { %v5336_v4 = vpop.eup %3870  ;;  %2444 = vmatmul.bf16.gmra.mxu1 %v2149_v12 }
 0x533   : > { %v2538_v10 = vsel %vm5338_vm14, %v3865_v46, %v2534_v7  ;;  %v5346_v13 = vpop.xlane.xlu1 %2048  ;;  %v1827_v1 = vpop.xlane.xlu2 %1826  ;;  %v2545_v2 = vmul.f32 %v5336_v4, %v5307_v14  ;;  %vm2550_vm1 = vweird.f32 %v5336_v4  ;;  %vm2554_vm7 = vcmp.eq.f32.partialorder %v2553_v3, 8.507059e+37 }
 0x534   : > { %3872 = vrcp.f32 %v5346_v13  ;;  %v5351_v27 = vpop.f32.mrf.mxu3  ;;  %v1892_v15 = vsub.f32 %v5100_v24, %v1827_v1  ;;  %v1893_v20 = vsub.f32 %v5105_v48, %v1827_v1  ;;  %v2543_v30 = vsel %vm2540_vm15, %v2542_v56, %v2538_v10  ;;  %vm5389_vm4 = vmor %vm2549_vm3, %vm2550_vm1 }
 0x535   : > { %3874 = vpow2.f32 %v2010_v44  ;;  %v2913_v18 = vmul.f32 %v2543_v30, %v2393_v58  ;;  %v2546_v38 = vsub.f32 1.0, %v2545_v2  ;;  %v2569_v7 = vand.u32 2147483648, %v5346_v13 }
 0x536   : > { %v2014_v47 = vmul.f32 1.442695, %v1892_v15  ;;  %v2016_v42 = vmul.f32 1.442695, %v1893_v20  ;;  %3876 = vpow2.f32 %v2012_v40  ;;  %vm2563_vm5 = vweird.f32 %v5346_v13 }
 0x537   : > { %v5357_v55 = vpop.f32.mrf.mxu1  ;;  %v2942_v62 = vpack.c.bf16 %v2913_v18, %v2912_v21  ;;  %v2547_v51 = vmul.f32 %v5336_v4, %v2546_v38  ;;  %v2567_v12 = vand.u32 2147483647, %v5346_v13  ;;  %v2398_v56 = vadd.f32 %v5248_v43, %v5258_v50 }
 0x538   : > { %3878 = vpow2.f32 %v2014_v47  ;;  %v2396_v47 = vadd.f32 %v5227_v5, %v5244_v39 }
 0x539   : > { %3880 = vpow2.f32 %v2016_v42  ;;  %3642 = vmatmul.msk.bf16.gmra.mxu0 %vm285_vm0, %v2942_v62  ;;  %v2548_v17 = vadd.f32 %v5336_v4, %v2547_v51  ;;  %vm2568_vm8 = vcmp.eq.f32.partialorder %v2567_v12, 8.507059e+37 }
 0x53a   : > { %v5359_v63 = vpop.eup %3872 }
 0x53b   : > { %v2559_v24 = vmul.f32 %v5359_v63, %v5346_v13  ;;  %v5364_v48 = vpop.xlane.xlu1 %2051  ;;  %v1830_v23 = vpop.xlane.xlu2 %1829  ;;  %vm2564_vm2 = vweird.f32 %v5359_v63  ;;  %v2552_v14 = vsel %vm5389_vm4, %v5336_v4, %v2548_v17  ;;  %v2556_v13 = vor.u32 1.1754944e-38, %v2555_v22 }
 0x53c   : > { %v5367_v52 = vpop.f32.mrf.mxu3  ;;  %v5369_v33 = vpop.eup %3874  ;;  %v1894_v26 = vsub.f32 %v5119_v54, %v1830_v23  ;;  %v1895_v36 = vsub.f32 %v5123_v60, %v1830_v23  ;;  %3882 = vrcp.f32 %v5364_v48  ;;  %vm5404_vm6 = vmor %vm2563_vm5, %vm2564_vm2  ;;  %v2570_v4 = vor.u32 1.1754944e-38, %v2569_v7 }
 0x53d   : > { %v2560_v46 = vsub.f32 1.0, %v2559_v24  ;;  %v5373_v59 = vpop.eup %3876  ;;  %v2557_v30 = vsel %vm2554_vm7, %v2556_v13, %v2552_v14  ;;  %vm2577_vm11 = vweird.f32 %v5364_v48  ;;  %v2581_v7 = vand.u32 2147483647, %v5364_v48 }
 0x53e   : > { %v3879_v61 = vpop.eup %3878  ;;  %v2018_v53 = vmul.f32 1.442695, %v1894_v26  ;;  %v2020_v6 = vmul.f32 1.442695, %v1895_v36  ;;  %v2914_v62 = vmul.f32 %v2557_v30, %v2396_v47 }
 0x53f   : > { %v2561_v41 = vmul.f32 %v5359_v63, %v2560_v46  ;;  %v5378_v49 = vpop.f32.mrf.mxu1  ;;  %v3881_v32 = vpop.eup %3880  ;;  %v2150_v54 = vpack.c.bf16 %v3879_v61, %v5369_v33  ;;  %vm2582_vm15 = vcmp.eq.f32.partialorder %v2581_v7, 8.507059e+37 }
 0x540   : > { %3884 = vpow2.f32 %v2018_v53  ;;  %v2151_v8 = vpack.c.bf16 %v3881_v32, %v5373_v59  ;;  %v2113_v25 = vadd.f32 %v3881_v32, %v3879_v61 }
 0x541   : > { %v2562_v60 = vadd.f32 %v5359_v63, %v2561_v41  ;;  %3886 = vpow2.f32 %v2020_v6  ;;  %2360 = vmatmul.bf16.gmra.mxu3 %v2150_v54  ;;  %v2107_v41 = vadd.f32 %v5325_v29, %v5316_v16 }
 0x542   : > { %2449 = vmatmul.bf16.gmra.mxu1 %v2151_v8  ;;  %2114 = vadd.xlane.f32.xlu0 %v2113_v25  ;;  %v5397_v31 = vpop.eup %3882  ;;  %v2583_v25 = vand.u32 2147483648, %v5364_v48 }
 0x543   : > { %v5395_v35 = vpop.xlane.xlu2 %2054  ;;  %v2566_v57 = vsel %vm5404_vm6, %v5359_v63, %v2562_v60  ;;  %v2573_v58 = vmul.f32 %v5397_v31, %v5364_v48  ;;  %vm2578_vm9 = vweird.f32 %v5397_v31 }
 0x544   : > { %v1833_v44 = vpop.xlane.xlu0 %1832  ;;  %v5408_v1 = vpop.f32.mrf.mxu3  ;;  %3888 = vrcp.f32 %v5395_v35  ;;  %v2571_v43 = vsel %vm2568_vm8, %v2570_v4, %v2566_v57  ;;  %v2597_v16 = vand.u32 2147483648, %v5395_v35  ;;  %vm5452_vm12 = vmor %vm2577_vm11, %vm2578_vm9  ;;  %vm2591_vm13 = vweird.f32 %v5395_v35 }
 0x545   : > { %v1896_v2 = vsub.f32 %v5129_v0, %v1833_v44  ;;  %v1897_v15 = vsub.f32 %v5131_v19, %v1833_v44  ;;  %v2915_v18 = vmul.f32 %v2571_v43, %v2398_v56  ;;  %v5424_v0 = vpop.xlane.xlu1 %2060  ;;  %v2574_v24 = vsub.f32 1.0, %v2573_v58 }
 0x546   : > { %v3885_v40 = vpop.eup %3884  ;;  %v2595_v37 = vand.u32 2147483647, %v5395_v35  ;;  %v2598_v57 = vor.u32 1.1754944e-38, %v2597_v16  ;;  %vm2619_vm6 = vweird.f32 %v5424_v0 }
 0x547   : > { %v5420_v20 = vpop.f32.mrf.mxu1  ;;  %v3887_v21 = vpop.eup %3886  ;;  %v2022_v42 = vmul.f32 1.442695, %v1896_v2  ;;  %v2024_v50 = vmul.f32 1.442695, %v1897_v15  ;;  %v2943_v23 = vpack.c.bf16 %v2915_v18, %v2914_v62  ;;  %v2575_v39 = vmul.f32 %v5397_v31, %v2574_v24 }
 0x548   : > { %v2116_v38 = vadd.f32 %v3887_v21, %v3885_v40  ;;  %v2401_v2 = vadd.f32 %v5270_v11, %v5297_v9  ;;  %vm2596_vm1 = vcmp.eq.f32.partialorder %v2595_v37, 8.507059e+37  ;;  %v2623_v24 = vand.u32 2147483647, %v5424_v0 }
 0x549   : > { %3890 = vpow2.f32 %v2022_v42  ;;  %3643 = vmatmul.msk.bf16.gmra.mxu0 %vm285_vm0, %v2943_v23  ;;  %v2576_v54 = vadd.f32 %v5397_v31, %v2575_v39 }
 0x54a   : > { %v3889_v63 = vpop.eup %3888  ;;  %3892 = vpow2.f32 %v2024_v50  ;;  %2117 = vadd.xlane.f32.xlu1 %v2116_v38  ;;  %vm2624_vm9 = vcmp.eq.f32.partialorder %v2623_v24, 8.507059e+37 }
 0x54b   : > { %v2587_v19 = vmul.f32 %v3889_v63, %v5395_v35  ;;  %3894 = vrcp.f32 %v5424_v0  ;;  %vm2592_vm10 = vweird.f32 %v3889_v63  ;;  %v2580_v44 = vsel %vm5452_vm12, %v5397_v31, %v2576_v54  ;;  %v5481_v31 = vpop.xlane.xlu2 %2063 }
 0x54c   : > { %v5427_v51 = vpop.xlane.xlu0 %2057  ;;  %v5429_v46 = vpop.f32.mrf.mxu3  ;;  %vm5464_vm14 = vmor %vm2591_vm13, %vm2592_vm10  ;;  %v2584_v35 = vor.u32 1.1754944e-38, %v2583_v25  ;;  %v2408_v54 = vadd.f32 %v5357_v55, %v5367_v52 }
 0x54d   : > { %v2588_v5 = vsub.f32 1.0, %v2587_v19  ;;  %3896 = vrcp.f32 %v5427_v51  ;;  %vm2605_vm4 = vweird.f32 %v5427_v51  ;;  %v2609_v38 = vand.u32 2147483647, %v5427_v51 }
 0x54e   : > { %v2585_v15 = vsel %vm2582_vm15, %v2584_v35, %v2580_v44  ;;  %v2639_v44 = vand.u32 2147483648, %v5481_v31 }
 0x54f   : > { %v5435_v26 = vpop.f32.mrf.mxu1  ;;  %v3891_v36 = vpop.eup %3890  ;;  %v2589_v61 = vmul.f32 %v3889_v63, %v2588_v5  ;;  %v2916_v42 = vmul.f32 %v2585_v15, %v2401_v2  ;;  %vm2610_vm8 = vcmp.eq.f32.partialorder %v2609_v38, 8.507059e+37 }
 0x550   : > { %v3893_v22 = vpop.eup %3892  ;;  %v2152_v53 = vpack.c.bf16 %v3891_v36, %v3885_v40  ;;  %v2403_v40 = vadd.f32 %v5301_v28, %v5312_v45 }
 0x551   : > { %v2153_v6 = vpack.c.bf16 %v3893_v22, %v3887_v21  ;;  %v2119_v32 = vadd.f32 %v3893_v22, %v3891_v36  ;;  %v5440_v17 = vpop.eup %3894  ;;  %v2590_v60 = vadd.f32 %v3889_v63, %v2589_v61  ;;  %v2110_v21 = vadd.f32 %v5373_v59, %v5369_v33 }
 0x552   : > { %2108 = vadd.xlane.f32.xlu1 %v2107_v41  ;;  %2365 = vmatmul.bf16.gmra.mxu3 %v2152_v53  ;;  %v2615_v14 = vmul.f32 %v5440_v17, %v5424_v0  ;;  %v2611_v59 = vand.u32 2147483648, %v5427_v51  ;;  %vm2620_vm3 = vweird.f32 %v5440_v17 }
 0x553   : > { %v5443_v8 = vpop.eup %3896  ;;  %2454 = vmatmul.bf16.gmra.mxu1 %v2153_v6  ;;  %2120 = vadd.xlane.f32.xlu2 %v2119_v32  ;;  %v2594_v48 = vsel %vm5464_vm14, %v3889_v63, %v2590_v60  ;;  %v2625_v63 = vand.u32 2147483648, %v5424_v0  ;;  %vm2621_vm7 = vmor %vm2619_vm6, %vm2620_vm3  ;;  %v2406_v0 = vadd.f32 %v5323_v34, %v5351_v27  ;;  %v5520_v53 = vpop.xlane.xlu2 %2072  ;;  %vm2633_vm14 = vweird.f32 %v5481_v31 }
 0x554   : > { %v5448_v29 = vpop.f32.mrf.mxu3  ;;  %v2601_v12 = vmul.f32 %v5443_v8, %v5427_v51  ;;  %v5475_v4 = vpop.xlane.xlu0 %2066  ;;  %v2616_v58 = vsub.f32 1.0, %v2615_v14  ;;  %v2599_v30 = vsel %vm2596_vm1, %v2598_v57, %v2594_v48  ;;  %vm2606_vm2 = vweird.f32 %v5443_v8 }
 0x555   : > { %3898 = vrcp.f32 %v5475_v4  ;;  %v2917_v43 = vmul.f32 %v2599_v30, %v2403_v40  ;;  %vm2607_vm5 = vmor %vm2605_vm4, %vm2606_vm2  ;;  %v2612_v39 = vor.u32 1.1754944e-38, %v2611_v59  ;;  %v2626_v61 = vor.u32 1.1754944e-38, %v2625_v63 }
 0x556   : > { %v2602_v56 = vsub.f32 1.0, %v2601_v12  ;;  %3900 = vrcp.f32 %v5481_v31  ;;  %v2617_v9 = vmul.f32 %v5440_v17, %v2616_v58  ;;  %v2653_v37 = vand.u32 2147483648, %v5475_v4 }
 0x557   : > { %v5473_v13 = vpop.f32.mrf.mxu1  ;;  %v2944_v28 = vpack.c.bf16 %v2917_v43, %v2916_v42  ;;  %3902 = vrcp.f32 %v5520_v53  ;;  %vm2647_vm12 = vweird.f32 %v5475_v4  ;;  %v2651_v14 = vand.u32 2147483647, %v5475_v4 }
 0x558   : > { %v2603_v47 = vmul.f32 %v5443_v8, %v2602_v56  ;;  %v2618_v18 = vadd.f32 %v5440_v17, %v2617_v9  ;;  %v2637_v48 = vand.u32 2147483647, %v5481_v31  ;;  %v2654_v2 = vor.u32 1.1754944e-38, %v2653_v37 }
 0x559   : > { %3644 = vmatmul.msk.bf16.gmra.mxu0 %vm285_vm0, %v2944_v28  ;;  %vm2652_vm1 = vcmp.eq.f32.partialorder %v2651_v14, 8.507059e+37  ;;  %v2640_v58 = vor.u32 1.1754944e-38, %v2639_v44  ;;  %v2411_v43 = vadd.f32 %v5378_v49, %v5408_v1  ;;  %v2681_v49 = vand.u32 2147483648, %v5520_v53 }
 0x55a   : > { %v2604_v50 = vadd.f32 %v5443_v8, %v2603_v47  ;;  %v2622_v51 = vsel %vm2621_vm7, %v5440_v17, %v2618_v18  ;;  %v5524_v17 = vpop.xlane.xlu1 %2069  ;;  %vm2638_vm2 = vcmp.eq.f32.partialorder %v2637_v48, 8.507059e+37  ;;  %vm2675_vm4 = vweird.f32 %v5520_v53 }
 0x55b   : > { %2111 = vadd.xlane.f32.xlu2 %v2110_v21  ;;  %v5496_v33 = vpop.eup %3898  ;;  %v2627_v32 = vsel %vm2624_vm9, %v2626_v61, %v2622_v51  ;;  %3904 = vrcp.f32 %v5524_v17  ;;  %v2679_v24 = vand.u32 2147483647, %v5520_v53  ;;  %vm2661_vm7 = vweird.f32 %v5524_v17 }
 0x55c   : > { %v5487_v11 = vpop.f32.mrf.mxu3  ;;  %v5503_v62 = vpop.eup %3900  ;;  %v2608_v19 = vsel %vm2607_vm5, %v5443_v8, %v2604_v50  ;;  %v2643_v23 = vmul.f32 %v5496_v33, %v5475_v4  ;;  %v2919_v16 = vmul.f32 %v2627_v32, %v2408_v54  ;;  %vm2648_vm10 = vweird.f32 %v5496_v33 }
 0x55d   : > { %v2629_v36 = vmul.f32 %v5503_v62, %v5481_v31  ;;  %v2613_v41 = vsel %vm2610_vm8, %v2612_v39, %v2608_v19  ;;  %v5537_v52 = vpop.eup %3902  ;;  %vm2634_vm11 = vweird.f32 %v5503_v62  ;;  %vm2649_vm13 = vmor %vm2647_vm12, %vm2648_vm10  ;;  %v2413_v31 = vadd.f32 %v5420_v20, %v5429_v46  ;;  %v5562_v28 = vpop.xlane.xlu0 %2075 }
 0x55e   : > { %v2644_v6 = vsub.f32 1.0, %v2643_v23  ;;  %v2918_v8 = vmul.f32 %v2613_v41, %v2406_v0  ;;  %v2671_v35 = vmul.f32 %v5537_v52, %v5520_v53  ;;  %vm2635_vm15 = vmor %vm2633_vm14, %vm2634_vm11  ;;  %vm2676_vm3 = vweird.f32 %v5537_v52 }
 0x55f   : > { %v5491_v45 = vpop.f32.mrf.mxu1  ;;  %v2630_v60 = vsub.f32 1.0, %v2629_v36  ;;  %v2667_v23 = vand.u32 2147483648, %v5524_v17  ;;  %vm2677_vm6 = vmor %vm2675_vm4, %vm2676_vm3  ;;  %v2665_v39 = vand.u32 2147483647, %v5524_v17  ;;  %v2682_v61 = vor.u32 1.1754944e-38, %v2681_v49 }
 0x560   : > { %v2645_v25 = vmul.f32 %v5496_v33, %v2644_v6  ;;  %v2945_v27 = vpack.c.bf16 %v2919_v16, %v2918_v8  ;;  %v2672_v21 = vsub.f32 1.0, %v2671_v35  ;;  %vm2680_vm9 = vcmp.eq.f32.partialorder %v2679_v24, 8.507059e+37  ;;  %v5622_v35 = vld [vmem:[%s6145_s3 + $0x5] ss:$0 sm:$0xff] }
 0x561   : > { %v2631_v34 = vmul.f32 %v5503_v62, %v2630_v60  ;;  %v3905_v10 = vpop.eup %3904  ;;  %v2668_v6 = vor.u32 1.1754944e-38, %v2667_v23  ;;  %vm2666_vm10 = vcmp.eq.f32.partialorder %v2665_v39, 8.507059e+37  ;;  %v2416_v8 = vadd.f32 %v5435_v26, %v5448_v29 }
 0x562   : > { %v2646_v55 = vadd.f32 %v5496_v33, %v2645_v25  ;;  %v2657_v40 = vmul.f32 %v3905_v10, %v5524_v17  ;;  %v5558_v47 = vpop.xlane.xlu1 %2078  ;;  %vm2662_vm5 = vweird.f32 %v3905_v10  ;;  %v2418_v17 = vadd.f32 %v5473_v13, %v5487_v11 }
 0x563   : > { %v2632_v12 = vadd.f32 %v5503_v62, %v2631_v34  ;;  %3906 = vrcp.f32 %v5558_v47  ;;  %vm2663_vm8 = vmor %vm2661_vm7, %vm2662_vm5  ;;  %v2695_v44 = vand.u32 2147483648, %v5562_v28  ;;  %v2709_v48 = vand.u32 2147483648, %v5558_v47 }
 0x564   : > { %v5511_v5 = vpop.f32.mrf.mxu3  ;;  %v2650_v57 = vsel %vm2649_vm13, %v5496_v33, %v2646_v55  ;;  %v2658_v9 = vsub.f32 1.0, %v2657_v40  ;;  %v2673_v33 = vmul.f32 %v5537_v52, %v2672_v21  ;;  %3908 = vrcp.f32 %v5562_v28 }
 0x565   : > { %v2636_v4 = vsel %vm2635_vm15, %v5503_v62, %v2632_v12  ;;  %v2655_v30 = vsel %vm2652_vm1, %v2654_v2, %v2650_v57  ;;  %vm2689_vm13 = vweird.f32 %v5562_v28  ;;  %vm2703_vm14 = vweird.f32 %v5558_v47 }
 0x566   : > { %v2641_v42 = vsel %vm2638_vm2, %v2640_v58, %v2636_v4  ;;  %v2921_v50 = vmul.f32 %v2655_v30, %v2413_v31  ;;  %v2659_v20 = vmul.f32 %v3905_v10, %v2658_v9  ;;  %v2674_v62 = vadd.f32 %v5537_v52, %v2673_v33  ;;  %v3126_v9 = vld [vmem:[%s4012_s12] sm:$0xff] }
 0x567   : > { %v5516_v22 = vpop.f32.mrf.mxu1  ;;  %v2920_v59 = vmul.f32 %v2641_v42, %v2411_v43  ;;  %v2693_v2 = vand.u32 2147483647, %v5562_v28  ;;  %v2707_v40 = vand.u32 2147483647, %v5558_v47 }
 0x568   : > { %v2660_v63 = vadd.f32 %v3905_v10, %v2659_v20  ;;  %v2678_v51 = vsel %vm2677_vm6, %v5537_v52, %v2674_v62  ;;  %v5599_v52 = vpop.xlane.xlu2 %2081  ;;  %v2421_v62 = vadd.f32 %v5491_v45, %v5511_v5  ;;  %v3127_v45 = vld [vmem:[%s4012_s12 + $0x8] sm:$0xff] }
 0x569   : > { %3645 = vmatmul.msk.bf16.gmra.mxu0 %vm285_vm0, %v2945_v27  ;;  %v2946_v46 = vpack.c.bf16 %v2921_v50, %v2920_v59  ;;  %v5575_v1 = vpop.eup %3906  ;;  %v2683_v32 = vsel %vm2680_vm9, %v2682_v61, %v2678_v51  ;;  %v5597_v27 = vpop.xlane.xlu0 %2084  ;;  %v2710_v50 = vor.u32 1.1754944e-38, %v2709_v48  ;;  %vm2694_vm2 = vcmp.eq.f32.partialorder %v2693_v2, 8.507059e+37 }
 0x56a   : > { %v5579_v19 = vpop.eup %3908  ;;  %v2664_v41 = vsel %vm2663_vm8, %v3905_v10, %v2660_v63  ;;  %v2699_v0 = vmul.f32 %v5575_v1, %v5558_v47  ;;  %v2923_v34 = vmul.f32 %v2683_v32, %v2418_v17  ;;  %3910 = vrcp.f32 %v5597_v27 }
 0x56b   : > { %v2685_v53 = vmul.f32 %v5579_v19, %v5562_v28  ;;  %v2669_v60 = vsel %vm2666_vm10, %v2668_v6, %v2664_v41  ;;  %3912 = vrcp.f32 %v5599_v52  ;;  %vm2690_vm11 = vweird.f32 %v5579_v19 }
 0x56c   : > { %v5528_v3 = vpop.f32.mrf.mxu3  ;;  %v2700_v25 = vsub.f32 1.0, %v2699_v0  ;;  %v2922_v55 = vmul.f32 %v2669_v60, %v2416_v8  ;;  %vm2704_vm12 = vweird.f32 %v5575_v1  ;;  %vm5625_vm15 = vmor %vm2689_vm13, %vm2690_vm11  ;;  %v2696_v28 = vor.u32 1.1754944e-38, %v2695_v44 }
 0x56d   : > { %v2686_v16 = vsub.f32 1.0, %v2685_v53  ;;  %vm5633_vm1 = vmor %vm2703_vm14, %vm2704_vm12  ;;  %v2423_v42 = vadd.f32 %v5516_v22, %v5528_v3  ;;  %vm2708_vm3 = vcmp.eq.f32.partialorder %v2707_v40, 8.507059e+37  ;;  %v5668_v23 = vpop.xlane.xlu1 %2087  ;;  %v2737_v8 = vand.u32 2147483648, %v5597_v27 }
 0x56e   : > { %v2701_v12 = vmul.f32 %v5575_v1, %v2700_v25  ;;  %v2947_v11 = vpack.c.bf16 %v2923_v34, %v2922_v55  ;;  %vm2731_vm5 = vweird.f32 %v5597_v27  ;;  %vm2717_vm7 = vweird.f32 %v5599_v52 }
 0x56f   : > { %v5532_v7 = vpop.f32.mrf.mxu1  ;;  %v2687_v13 = vmul.f32 %v5579_v19, %v2686_v16  ;;  %v2735_v16 = vand.u32 2147483647, %v5597_v27  ;;  %v2723_v55 = vand.u32 2147483648, %v5599_v52  ;;  %v2738_v48 = vor.u32 1.1754944e-38, %v2737_v8 }
 0x570   : > { %v2702_v14 = vadd.f32 %v5575_v1, %v2701_v12  ;;  %v5614_v10 = vpop.eup %3910 }
 0x571   : > { %v2688_v29 = vadd.f32 %v5579_v19, %v2687_v13  ;;  %v5631_v4 = vpop.eup %3912  ;;  %v2727_v21 = vmul.f32 %v5614_v10, %v5597_v27  ;;  %vm2732_vm4 = vweird.f32 %v5614_v10  ;;  %vm2736_vm10 = vcmp.eq.f32.partialorder %v2735_v16, 8.507059e+37 }
 0x572   : > { %v2706_v47 = vsel %vm5633_vm1, %v5575_v1, %v2702_v14  ;;  %v2713_v59 = vmul.f32 %v5631_v4, %v5599_v52  ;;  %vm2718_vm6 = vweird.f32 %v5631_v4  ;;  %vm5698_vm8 = vmor %vm2731_vm5, %vm2732_vm4  ;;  %v2724_v40 = vor.u32 1.1754944e-38, %v2723_v55 }
 0x573   : > { %v2692_v31 = vsel %vm5625_vm15, %v5579_v19, %v2688_v29  ;;  %v2711_v3 = vsel %vm2708_vm3, %v2710_v50, %v2706_v47  ;;  %v2728_v49 = vsub.f32 1.0, %v2727_v21  ;;  %vm5712_vm9 = vmor %vm2717_vm7, %vm2718_vm6  ;;  %vm2745_vm15 = vweird.f32 %v5668_v23 }
 0x574   : > { %v5550_v56 = vpop.f32.mrf.mxu3  ;;  %v2697_v22 = vsel %vm2694_vm2, %v2696_v28, %v2692_v31  ;;  %v2925_v1 = vmul.f32 %v2711_v3, %v2423_v42  ;;  %v2714_v24 = vsub.f32 1.0, %v2713_v59 }
 0x575   : > { %v5664_v63 = vpop.xlane.xlu2 %2090  ;;  %v2924_v19 = vmul.f32 %v2697_v22, %v2421_v62  ;;  %v2729_v51 = vmul.f32 %v5614_v10, %v2728_v49 }
 0x576   : > { %3914 = vrcp.f32 %v5664_v63  ;;  %v2715_v0 = vmul.f32 %v5631_v4, %v2714_v24  ;;  %vm2759_vm14 = vweird.f32 %v5664_v63 }
 0x577   : > { %v5554_v15 = vpop.f32.mrf.mxu1  ;;  %v2948_v61 = vpack.c.bf16 %v2925_v1, %v2924_v19  ;;  %3916 = vrcp.f32 %v5668_v23  ;;  %v2730_v17 = vadd.f32 %v5614_v10, %v2729_v51  ;;  %v2765_v51 = vand.u32 2147483648, %v5664_v63 }
 0x578   : > { %v2716_v25 = vadd.f32 %v5631_v4, %v2715_v0 }
 0x579   : > { %3646 = vmatmul.msk.bf16.gmra.mxu0 %vm285_vm0, %v2946_v46  ;;  %v2734_v14 = vsel %vm5698_vm8, %v5614_v10, %v2730_v17  ;;  %v3128_v10 = vld [vmem:[%s4012_s12 + $0x10] sm:$0xff] }
 0x57a   : > { %v2720_v2 = vsel %vm5712_vm9, %v5631_v4, %v2716_v25  ;;  %v2739_v58 = vsel %vm2736_vm10, %v2738_v48, %v2734_v14 }
 0x57c   : > { %v5566_v18 = vpop.f32.mrf.mxu3  ;;  %v5685_v60 = vpop.eup %3914 }
 0x57d   : > { %v5681_v6 = vpop.xlane.xlu0 %2093  ;;  %v5694_v34 = vpop.eup %3916  ;;  %v2755_v29 = vmul.f32 %v5685_v60, %v5664_v63  ;;  %v2428_v27 = vadd.f32 %v5554_v15, %v5566_v18  ;;  %vm2760_vm12 = vweird.f32 %v5685_v60 }
 0x57e   : > { %v2741_v57 = vmul.f32 %v5694_v34, %v5668_v23  ;;  %3918 = vrcp.f32 %v5681_v6  ;;  %vm2746_vm13 = vweird.f32 %v5694_v34  ;;  %vm5764_vm1 = vmor %vm2759_vm14, %vm2760_vm12  ;;  %vm2773_vm5 = vweird.f32 %v5681_v6 }
 0x57f   : > { %v5569_v38 = vpop.f32.mrf.mxu1  ;;  %v2756_v42 = vsub.f32 1.0, %v2755_v29  ;;  %v2927_v47 = vmul.f32 %v2739_v58, %v2428_v27  ;;  %vm5783_vm2 = vmor %vm2745_vm15, %vm2746_vm13  ;;  %v3130_v27 = vld [vmem:[%s4012_s12 + $0x20] sm:$0xff] }
 0x581   : > { %v2757_v50 = vmul.f32 %v5685_v60, %v2756_v42 }
 0x583   : > { %v2758_v1 = vadd.f32 %v5685_v60, %v2757_v50 }
 0x584   : > { %v5585_v36 = vpop.f32.mrf.mxu3  ;;  %v5744_v49 = vpop.eup %3918 }
 0x585   : > { %v2769_v0 = vmul.f32 %v5744_v49, %v5681_v6  ;;  %v2762_v55 = vsel %vm5764_vm1, %v5685_v60, %v2758_v1  ;;  %vm2774_vm6 = vweird.f32 %v5744_v49  ;;  %v2779_v1 = vand.u32 2147483648, %v5681_v6 }
 0x586   : > { %vm5835_vm9 = vmor %vm2773_vm5, %vm2774_vm6 }
 0x587   : > { %v5591_v54 = vpop.f32.mrf.mxu1  ;;  %v2770_v60 = vsub.f32 1.0, %v2769_v0 }
 0x589   : > { %3647 = vmatmul.msk.bf16.gmra.mxu0 %vm285_vm0, %v2947_v11  ;;  %v2721_v11 = vand.u32 2147483647, %v5599_v52  ;;  %v2426_v52 = vadd.f32 %v5532_v7, %v5550_v56  ;;  %v5729_v7 = vpop.xlane.xlu1 %2096 }
 0x58a   : > { %3920 = vrcp.f32 %v5729_v7  ;;  %vm2787_vm8 = vweird.f32 %v5729_v7 }
 0x58b   : > { %vm2722_vm11 = vcmp.eq.f32.partialorder %v2721_v11, 8.507059e+37  ;;  %v2766_v11 = vor.u32 1.1754944e-38, %v2765_v51 }
 0x58c   : > { %v5601_v37 = vpop.f32.mrf.mxu3  ;;  %v2725_v56 = vsel %vm2722_vm11, %v2724_v40, %v2720_v2  ;;  %v2771_v40 = vmul.f32 %v5744_v49, %v2770_v60 }
 0x58d   : > { %v5748_v24 = vpop.xlane.xlu2 %2099  ;;  %v2433_v16 = vadd.f32 %v5591_v54, %v5601_v37 }
 0x58e   : > { %vm2801_vm13 = vweird.f32 %v5748_v24 }
 0x58f   : > { %v5608_v26 = vpop.f32.mrf.mxu1 }
 0x590   : > { %v5750_v19 = vpop.eup %3920 }
 0x591   : > { %v2783_v25 = vmul.f32 %v5750_v19, %v5729_v7  ;;  %vm2788_vm7 = vweird.f32 %v5750_v19 }
 0x592   : > { %vm5844_vm10 = vmor %vm2787_vm8, %vm2788_vm7 }
 0x594   : > { %v5637_v30 = vpop.f32.mrf.mxu3 }
 0x595   : > { %v5726_v31 = vpop.xlane.xlu0 %2102 }
 0x596   : > { %v3046_v43 = vpop.f32.mrf.mxu0  ;;  %3922 = vrcp.f32 %v5726_v31  ;;  %v2821_v60 = vand.u32 2147483648, %v5726_v31  ;;  %vm2815_vm1 = vweird.f32 %v5726_v31 }
 0x597   : > { %v3047_v33 = vadd.f32 %v5622_v35, %v3046_v43  ;;  %v5653_v20 = vpop.f32.mrf.mxu1  ;;  %v2742_v43 = vsub.f32 1.0, %v2741_v57  ;;  %3924 = vrcp.f32 %v5748_v24 }
 0x599   : > { %v3158_v46 = vadd.f32 %v3126_v9, %v3047_v33  ;;  %3648 = vmatmul.msk.bf16.gmra.mxu0 %vm285_vm0, %v2948_v61  ;;  %v2926_v9 = vmul.f32 %v2725_v56, %v2426_v52  ;;  %v2743_v59 = vmul.f32 %v5694_v34, %v2742_v43  ;;  %v2784_v52 = vsub.f32 1.0, %v2783_v25 }
 0x59a   : > { %v2777_v43 = vand.u32 2147483647, %v5681_v6 }
 0x59b   : > { %3190 = vst.msk [vmem:[%s5660_s13] sm:$0xff] %vm285_vm0, %v3158_v46  ;;  %v2949_v33 = vpack.c.bf16 %v2927_v47, %v2926_v9  ;;  %v3129_v46 = vld [vmem:[%s4012_s12 + $0x18] sm:$0xff]  ;;  %v2785_v42 = vmul.f32 %v5750_v19, %v2784_v52  ;;  %v2819_v52 = vand.u32 2147483647, %v5726_v31 }
 0x59c   : > { %v5671_v39 = vpop.f32.mrf.mxu3  ;;  %v5796_v57 = vpop.eup %3922  ;;  %vm2778_vm11 = vcmp.eq.f32.partialorder %v2777_v43, 8.507059e+37 }
 0x59d   : > { %v5754_v61 = vpop.xlane.xlu0 %2105  ;;  %v2811_v58 = vmul.f32 %v5796_v57, %v5726_v31  ;;  %v2786_v51 = vadd.f32 %v5750_v19, %v2785_v42  ;;  %vm2816_vm14 = vweird.f32 %v5796_v57 }
 0x59e   : > { %v3048_v41 = vpop.f32.mrf.mxu0 }
 0x59f   : > { %v3049_v5 = vadd.f32 %v5622_v35, %v3048_v41  ;;  %v5679_v53 = vpop.f32.mrf.mxu1 }
 0x5a1   : > { %v3159_v32 = vadd.f32 %v3127_v45, %v3049_v5  ;;  %v2744_v45 = vadd.f32 %v5694_v34, %v2743_v59  ;;  %v2763_v5 = vand.u32 2147483647, %v5664_v63  ;;  %v2749_v63 = vand.u32 2147483647, %v5668_v23 }
 0x5a2   : > { %v2772_v59 = vadd.f32 %v5744_v49, %v2771_v40  ;;  %v2805_v40 = vand.u32 2147483647, %v5748_v24 }
 0x5a3   : > { %3191 = vst.msk [vmem:[%s5660_s13 + $0x8] sm:$0xff] %vm285_vm0, %v3159_v32  ;;  %v2751_v32 = vand.u32 2147483648, %v5668_v23  ;;  %v2431_v23 = vadd.f32 %v5569_v38, %v5585_v36  ;;  %v2748_v29 = vsel %vm5783_vm2, %v5694_v34, %v2744_v45  ;;  %vm2764_vm3 = vcmp.eq.f32.partialorder %v2763_v5, 8.507059e+37  ;;  %v5798_v36 = vpop.eup %3924  ;;  %vm5887_vm2 = vmor %vm2815_vm1, %vm2816_vm14 }
 0x5a4   : > { %v5702_v13 = vpop.f32.mrf.mxu3  ;;  %v2767_v44 = vsel %vm2764_vm3, %v2766_v11, %v2762_v55  ;;  %vm2750_vm4 = vcmp.eq.f32.partialorder %v2749_v63, 8.507059e+37  ;;  %v2797_v56 = vmul.f32 %v5798_v36, %v5748_v24  ;;  %v2793_v45 = vand.u32 2147483648, %v5729_v7 }
 0x5a5   : > { %v2752_v14 = vor.u32 1.1754944e-38, %v2751_v32  ;;  %v2929_v38 = vmul.f32 %v2767_v44, %v2433_v16  ;;  %v2776_v17 = vsel %vm5835_vm9, %v5744_v49, %v2772_v59  ;;  %v2780_v16 = vor.u32 1.1754944e-38, %v2779_v1 }
 0x5a6   : > { %v3051_v18 = vpop.f32.mrf.mxu0  ;;  %v2438_v55 = vadd.f32 %v5653_v20, %v5671_v39  ;;  %v2790_v49 = vsel %vm5844_vm10, %v5750_v19, %v2786_v51  ;;  %v2794_v12 = vor.u32 1.1754944e-38, %v2793_v45  ;;  %vm2802_vm15 = vweird.f32 %v5798_v36 }
 0x5a7   : > { %v5723_v15 = vpop.f32.mrf.mxu1  ;;  %v3052_v21 = vadd.f32 %v5622_v35, %v3051_v18  ;;  %v2753_v2 = vsel %vm2750_vm4, %v2752_v14, %v2748_v29  ;;  %v2436_v29 = vadd.f32 %v5608_v26, %v5637_v30  ;;  %v2807_v30 = vand.u32 2147483648, %v5748_v24  ;;  %vm5900_vm3 = vmor %vm2801_vm13, %vm2802_vm15 }
 0x5a8   : > { %v2441_v24 = vadd.f32 %v5679_v53, %v5702_v13  ;;  %vm2820_vm4 = vcmp.eq.f32.partialorder %v2819_v52, 8.507059e+37  ;;  %vm2806_vm5 = vcmp.eq.f32.partialorder %v2805_v40, 8.507059e+37 }
 0x5a9   : > { %v3160_v4 = vadd.f32 %v3128_v10, %v3052_v21  ;;  %3649 = vmatmul.msk.bf16.gmra.mxu0 %vm285_vm0, %v2949_v33  ;;  %v2928_v10 = vmul.f32 %v2753_v2, %v2431_v23  ;;  %v3131_v33 = vld [vmem:[%s4012_s12 + $0x28] sm:$0xff] }
 0x5ab   : > { %3192 = vst.msk [vmem:[%s5660_s13 + $0x10] sm:$0xff] %vm285_vm0, %v3160_v4  ;;  %v2950_v47 = vpack.c.bf16 %v2929_v38, %v2928_v10 }
 0x5ac   : > { %v5735_v28 = vpop.f32.mrf.mxu3 }
 0x5ad   : > { %v2443_v43 = vadd.f32 %v5723_v15, %v5735_v28  ;;  %v2808_v15 = vor.u32 1.1754944e-38, %v2807_v30 }
 0x5ae   : > { %v3053_v3 = vpop.f32.mrf.mxu0 }
 0x5af   : > { %v5740_v22 = vpop.f32.mrf.mxu1  ;;  %v3054_v62 = vadd.f32 %v5622_v35, %v3053_v3  ;;  %v2812_v3 = vsub.f32 1.0, %v2811_v58 }
 0x5b1   : > { %v3161_v41 = vadd.f32 %v3129_v46, %v3054_v62  ;;  %v2798_v62 = vsub.f32 1.0, %v2797_v56  ;;  %v2813_v63 = vmul.f32 %v5796_v57, %v2812_v3 }
 0x5b3   : > { %3193 = vst.msk [vmem:[%s5660_s13 + $0x18] sm:$0xff] %vm285_vm0, %v3161_v41  ;;  %v2791_v41 = vand.u32 2147483647, %v5729_v7  ;;  %v2799_v6 = vmul.f32 %v5798_v36, %v2798_v62  ;;  %v2814_v19 = vadd.f32 %v5796_v57, %v2813_v63 }
 0x5b4   : > { %v5771_v8 = vpop.f32.mrf.mxu3 }
 0x5b5   : > { %v5800_v34 = vpop.xlane.xlu0 %2114  ;;  %vm2792_vm12 = vcmp.eq.f32.partialorder %v2791_v41, 8.507059e+37  ;;  %v2800_v26 = vadd.f32 %v5798_v36, %v2799_v6 }
 0x5b6   : > { %v3056_v37 = vpop.f32.mrf.mxu0  ;;  %3926 = vrcp.f32 %v5800_v34  ;;  %v2795_v39 = vsel %vm2792_vm12, %v2794_v12, %v2790_v49  ;;  %v2875_v63 = vand.u32 2147483647, %v5800_v34  ;;  %v2877_v25 = vand.u32 2147483648, %v5800_v34 }
 0x5b7   : > { %v5792_v54 = vpop.f32.mrf.mxu1  ;;  %v3057_v48 = vadd.f32 %v5622_v35, %v3056_v37  ;;  %v2781_v37 = vsel %vm2778_vm11, %v2780_v16, %v2776_v17  ;;  %v2931_v44 = vmul.f32 %v2795_v39, %v2438_v55  ;;  %v2804_v62 = vsel %vm5900_vm3, %v5798_v36, %v2800_v26  ;;  %v3133_v55 = vld [vmem:[%s4012_s12 + $0x38] sm:$0xff] }
 0x5b8   : > { %v2930_v10 = vmul.f32 %v2781_v37, %v2436_v29  ;;  %v2809_v36 = vsel %vm2806_vm5, %v2808_v15, %v2804_v62  ;;  %vm2871_vm7 = vweird.f32 %v5800_v34  ;;  %v2878_v52 = vor.u32 1.1754944e-38, %v2877_v25 }
 0x5b9   : > { %v3162_v18 = vadd.f32 %v3130_v27, %v3057_v48  ;;  %3650 = vmatmul.msk.bf16.gmra.mxu0 %vm285_vm0, %v2950_v47  ;;  %v5931_v17 = vmul.f32 %v2809_v36, %v2441_v24  ;;  %vm5958_vm10 = vcmp.eq.f32.partialorder %v2875_v63, 8.507059e+37 }
 0x5bb   : > { %3194 = vst.msk [vmem:[%s5660_s13 + $0x20] sm:$0xff] %vm285_vm0, %v3162_v18  ;;  %v3132_v18 = vld [vmem:[%s4012_s12 + $0x30] sm:$0xff] }
 0x5bc   : > { %v5807_v21 = vpop.f32.mrf.mxu3  ;;  %v5830_v0 = vpop.eup %3926 }
 0x5bd   : > { %v5813_v4 = vpop.xlane.xlu1 %2117  ;;  %v2867_v11 = vmul.f32 %v5830_v0, %v5800_v34  ;;  %vm2872_vm6 = vweird.f32 %v5830_v0 }
 0x5be   : > { %v3058_v50 = vpop.f32.mrf.mxu0  ;;  %3928 = vrcp.f32 %v5813_v4  ;;  %v2889_v49 = vand.u32 2147483647, %v5813_v4  ;;  %v2891_v12 = vand.u32 2147483648, %v5813_v4  ;;  %vm5953_vm8 = vmor %vm2871_vm7, %vm2872_vm6  ;;  %vm2885_vm9 = vweird.f32 %v5813_v4 }
 0x5bf   : > { %v5818_v9 = vpop.f32.mrf.mxu1  ;;  %v3059_v46 = vadd.f32 %v5622_v35, %v3058_v50  ;;  %3930 = vrcp.f32 %v5754_v61  ;;  %v2868_v38 = vsub.f32 1.0, %v2867_v11  ;;  %v2818_v50 = vsel %vm5887_vm2, %v5796_v57, %v2814_v19 }
 0x5c0   : > { %vm5966_vm11 = vcmp.eq.f32.partialorder %v2889_v49, 8.507059e+37  ;;  %v2892_v58 = vor.u32 1.1754944e-38, %v2891_v12 }
 0x5c1   : > { %v3163_v5 = vadd.f32 %v3131_v33, %v3059_v46  ;;  %v2822_v33 = vor.u32 1.1754944e-38, %v2821_v60  ;;  %v2951_v46 = vpack.c.bf16 %v2931_v44, %v2930_v10  ;;  %v2869_v28 = vmul.f32 %v5830_v0, %v2868_v38  ;;  %v3135_v38 = vld [vmem:[%s4012_s12 + $0x48] sm:$0xff] }
 0x5c3   : > { %3195 = vst.msk [vmem:[%s5660_s13 + $0x28] sm:$0xff] %vm285_vm0, %v3163_v5  ;;  %v2823_v41 = vsel %vm2820_vm4, %v2822_v33, %v2818_v50  ;;  %v2870_v6 = vadd.f32 %v5830_v0, %v2869_v28 }
 0x5c4   : > { %v5850_v7 = vpop.f32.mrf.mxu3  ;;  %v5868_v20 = vpop.eup %3928  ;;  %v5929_v5 = vmul.f32 %v2823_v41, %v2443_v43 }
 0x5c5   : > { %v5865_v27 = vpop.xlane.xlu1 %2108  ;;  %v5873_v14 = vpop.eup %3930  ;;  %v2881_v42 = vmul.f32 %v5868_v20, %v5813_v4  ;;  %v2874_v34 = vsel %vm5953_vm8, %v5830_v0, %v2870_v6  ;;  %vm2886_vm12 = vweird.f32 %v5868_v20  ;;  %v2451_v56 = vadd.f32 %v5818_v9, %v5850_v7 }
 0x5c6   : > { %v5860_v23 = vpop.xlane.xlu2 %2120  ;;  %v3061_v2 = vpop.f32.mrf.mxu0  ;;  %v2825_v31 = vmul.f32 %v5873_v14, %v5754_v61  ;;  %v2952_v60 = vpack.c.bf16 %v5929_v5, %v5931_v17  ;;  %v2849_v50 = vand.u32 2147483648, %v5865_v27  ;;  %v2879_v24 = vsel %vm5958_vm10, %v2878_v52, %v2874_v34  ;;  %vm5988_vm1 = vmor %vm2885_vm9, %vm2886_vm12 }
 0x5c7   : > { %3932 = vrcp.f32 %v5860_v23  ;;  %v5878_v48 = vpop.f32.mrf.mxu1  ;;  %v3062_v47 = vadd.f32 %v5622_v35, %v3061_v2  ;;  %v2882_v45 = vsub.f32 1.0, %v2881_v42  ;;  %vm2899_vm14 = vweird.f32 %v5860_v23 }
 0x5c8   : > { %3934 = vrcp.f32 %v5865_v27  ;;  %v2826_v13 = vsub.f32 1.0, %v2825_v31  ;;  %v2903_v31 = vand.u32 2147483647, %v5860_v23  ;;  %vm2843_vm8 = vweird.f32 %v5865_v27 }
 0x5c9   : > { %v3164_v1 = vadd.f32 %v3132_v18, %v3062_v47  ;;  %3651 = vmatmul.msk.bf16.gmra.mxu0 %vm285_vm0, %v2951_v46  ;;  %v2883_v11 = vmul.f32 %v5868_v20, %v2882_v45  ;;  %v2905_v46 = vand.u32 2147483648, %v5860_v23  ;;  %vm2830_vm10 = vweird.f32 %v5873_v14 }
 0x5ca   : > { %v5945_v19 = vmul.f32 %v5873_v14, %v2826_v13  ;;  %vm6002_vm3 = vcmp.eq.f32.partialorder %v2903_v31, 8.507059e+37  ;;  %v3134_v13 = vld [vmem:[%s4012_s12 + $0x40] sm:$0xff]  ;;  %v2850_v30 = vor.u32 1.1754944e-38, %v2849_v50 }
 0x5cb   : > { %3196 = vst.msk [vmem:[%s5660_s13 + $0x30] sm:$0xff] %vm285_vm0, %v3164_v1  ;;  %v2884_v47 = vadd.f32 %v5868_v20, %v2883_v11 }
 0x5cc   : > { %v5909_v59 = vpop.f32.mrf.mxu3 }
 0x5cd   : > { %v5911_v3 = vpop.eup %3932  ;;  %v2453_v15 = vadd.f32 %v5878_v48, %v5909_v59 }
 0x5ce   : > { %v2895_v57 = vmul.f32 %v5911_v3, %v5860_v23  ;;  %v5921_v51 = vpop.xlane.xlu2 %2111  ;;  %v5927_v53 = vpop.eup %3934  ;;  %vm2900_vm13 = vweird.f32 %v5911_v3  ;;  %v2888_v23 = vsel %vm5988_vm1, %v5868_v20, %v2884_v47 }
 0x5cf   : > { %3936 = vrcp.f32 %v5921_v51  ;;  %v3063_v16 = vpop.f32.mrf.mxu0  ;;  %v2839_v29 = vmul.f32 %v5927_v53, %v5865_v27  ;;  %v2863_v33 = vand.u32 2147483648, %v5921_v51  ;;  %v2861_v9 = vand.u32 2147483647, %v5921_v51  ;;  %vm5998_vm2 = vmor %vm2899_vm14, %vm2900_vm13 }
 0x5d0   : > { %v2896_v32 = vsub.f32 1.0, %v2895_v57  ;;  %v2455_v37 = vpop.f32.mrf.mxu1  ;;  %v3064_v39 = vadd.f32 %v5622_v35, %v3063_v16  ;;  %vm2857_vm4 = vweird.f32 %v5921_v51  ;;  %vm2844_vm5 = vweird.f32 %v5927_v53 }
 0x5d1   : > { %v2840_v42 = vsub.f32 1.0, %v2839_v29  ;;  %v2864_v20 = vor.u32 1.1754944e-38, %v2863_v33  ;;  %vm2862_vm7 = vcmp.eq.f32.partialorder %v2861_v9, 8.507059e+37  ;;  %v2847_v29 = vand.u32 2147483647, %v5865_v27  ;;  %vm6026_vm9 = vmor %vm2843_vm8, %vm2844_vm5  ;;  %v3138_v33 = vld [vmem:[%s4012_s12 + $0x60] sm:$0xff] }
 0x5d2   : > { %v2897_v44 = vmul.f32 %v5911_v3, %v2896_v32  ;;  %v3165_v2 = vadd.f32 %v3133_v55, %v3064_v39  ;;  %v2906_v32 = vor.u32 1.1754944e-38, %v2905_v46  ;;  %v2937_v55 = vmul.f32 %v2879_v24, %v2453_v15  ;;  %v3139_v9 = vld [vmem:[%s4012_s12 + $0x68] sm:$0xff] }
 0x5d3   : > { %v2841_v1 = vmul.f32 %v5927_v53, %v2840_v42  ;;  %v2835_v27 = vand.u32 2147483648, %v5754_v61  ;;  %vm2848_vm12 = vcmp.eq.f32.partialorder %v2847_v29, 8.507059e+37  ;;  %v3146_v29 = vld [vmem:[%s4012_s12 + $0xa0] sm:$0xff] }
 0x5d4   : > { %3197 = vst.msk [vmem:[%s5660_s13 + $0x38] sm:$0xff] %vm285_vm0, %v3165_v2  ;;  %v2898_v43 = vadd.f32 %v5911_v3, %v2897_v44  ;;  %v2828_v44 = vadd.f32 %v5873_v14, %v5945_v19  ;;  %v2833_v19 = vand.u32 2147483647, %v5754_v61 }
 0x5d5   : > { %v3937_v26 = vpop.eup %3936  ;;  %v2366_v18 = vpop.f32.mrf.mxu3  ;;  %v2842_v25 = vadd.f32 %v5927_v53, %v2841_v1 }
 0x5d6   : > { %v2853_v10 = vmul.f32 %v3937_v26, %v5921_v51  ;;  %vm2858_vm15 = vweird.f32 %v3937_v26  ;;  %v2456_v41 = vadd.f32 %v2455_v37, %v2366_v18  ;;  %v2902_v48 = vsel %vm5998_vm2, %v5911_v3, %v2898_v43 }
 0x5d7   : > { %v3066_v45 = vpop.f32.mrf.mxu0  ;;  %vm2859_vm6 = vmor %vm2857_vm4, %vm2858_vm15  ;;  %v2893_v51 = vsel %vm5966_vm11, %v2892_v58, %v2888_v23  ;;  %v2907_v16 = vsel %vm6002_vm3, %v2906_v32, %v2902_v48  ;;  %vm2829_vm11 = vweird.f32 %v5754_v61  ;;  %v2446_v18 = vadd.f32 %v5740_v22, %v5771_v8  ;;  %v3136_v22 = vld [vmem:[%s4012_s12 + $0x50] sm:$0xff]  ;;  %v3143_v32 = vld [vmem:[%s4012_s12 + $0x88] sm:$0xff] }
 0x5d8   : > { %v2854_v0 = vsub.f32 1.0, %v2853_v10  ;;  %v2457_v59 = vpop.f32.mrf.mxu1  ;;  %v3067_v36 = vadd.f32 %v5622_v35, %v3066_v45  ;;  %v2938_v12 = vmul.f32 %v2893_v51, %v2456_v41  ;;  %vm2831_vm13 = vmor %vm2829_vm11, %vm2830_vm10  ;;  %v2448_v10 = vadd.f32 %v5792_v54, %v5807_v21  ;;  %v3137_v21 = vld [vmem:[%s4012_s12 + $0x58] sm:$0xff]  ;;  %v3140_v23 = vld [vmem:[%s4012_s12 + $0x70] sm:$0xff] }
 0x5d9   : > { %3652 = vmatmul.msk.bf16.gmra.mxu0 %vm285_vm0, %v2952_v60  ;;  %v2832_v34 = vsel %vm2831_vm13, %v5873_v14, %v2828_v44  ;;  %v2836_v58 = vor.u32 1.1754944e-38, %v2835_v27  ;;  %vm2834_vm14 = vcmp.eq.f32.partialorder %v2833_v19, 8.507059e+37  ;;  %v3141_v41 = vld [vmem:[%s4012_s12 + $0x78] sm:$0xff]  ;;  %v3147_v44 = vld [vmem:[%s4012_s12 + $0xa8] sm:$0xff] }
 0x5da   : > { %v2855_v62 = vmul.f32 %v3937_v26, %v2854_v0  ;;  %v3166_v6 = vadd.f32 %v3134_v13, %v3067_v36 }
 0x5db   : > { %v2837_v42 = vsel %vm2834_vm14, %v2836_v58, %v2832_v34 }
 0x5dc   : > { %v2856_v4 = vadd.f32 %v3937_v26, %v2855_v62  ;;  %3198 = vst.msk [vmem:[%s5660_s13 + $0x40] sm:$0xff] %vm285_vm0, %v3166_v6  ;;  %v2934_v47 = vmul.f32 %v2837_v42, %v2446_v18 }
 0x5dd   : > { %v2368_v5 = vpop.f32.mrf.mxu3 }
 0x5de   : > { %v2860_v17 = vsel %vm2859_vm6, %v3937_v26, %v2856_v4  ;;  %v2458_v63 = vadd.f32 %v2457_v59, %v2368_v5  ;;  %v2846_v26 = vsel %vm6026_vm9, %v5927_v53, %v2842_v25  ;;  %v3144_v25 = vld [vmem:[%s4012_s12 + $0x90] sm:$0xff] }
 0x5df   : > { %v2865_v3 = vsel %vm2862_vm7, %v2864_v20, %v2860_v17  ;;  %v3068_v52 = vpop.f32.mrf.mxu0  ;;  %v2851_v53 = vsel %vm2848_vm12, %v2850_v30, %v2846_v26  ;;  %v3142_v20 = vld [vmem:[%s4012_s12 + $0x80] sm:$0xff] }
 0x5e0   : > { %v2936_v49 = vmul.f32 %v2865_v3, %v2451_v56  ;;  %v2939_v11 = vmul.f32 %v2907_v16, %v2458_v63  ;;  %v3069_v2 = vadd.f32 %v5622_v35, %v3068_v52  ;;  %v2935_v61 = vmul.f32 %v2851_v53, %v2448_v10  ;;  %v3148_v52 = vld [vmem:[%s4012_s12 + $0xb0] sm:$0xff]  ;;  %v3149_v53 = vld [vmem:[%s4012_s12 + $0xb8] sm:$0xff] }
 0x5e2   : > { %v2954_v39 = vpack.c.bf16 %v2937_v55, %v2936_v49  ;;  %v2955_v60 = vpack.c.bf16 %v2939_v11, %v2938_v12  ;;  %v3167_v40 = vadd.f32 %v3135_v38, %v3069_v2  ;;  %v2953_v14 = vpack.c.bf16 %v2935_v61, %v2934_v47  ;;  %v3145_v55 = vld [vmem:[%s4012_s12 + $0x98] sm:$0xff]  ;;  %v3154_v47 = vld [vmem:[%s4012_s12 + $0xe0] sm:$0xff] }
 0x5e4   : > { %3654 = vmatmul.msk.bf16.vlgmr.msrb.gmra.mxu1 %vm285_vm0, %v2954_v39  ;;  %3655 = vmatmul.msk.bf16.vlgmr.msra.gmra.mxu2 %vm285_vm0, %v2955_v60  ;;  %3199 = vst.msk [vmem:[%s5660_s13 + $0x48] sm:$0xff] %vm285_vm0, %v3167_v40  ;;  %v3150_v40 = vld [vmem:[%s4012_s12 + $0xc0] sm:$0xff] }
 0x5e7   : > { %v3071_v31 = vpop.f32.mrf.mxu0 }
 0x5e8   : > { %v3072_v8 = vadd.f32 %v5622_v35, %v3071_v31 }
 0x5e9   : > { %3653 = vmatmul.msk.bf16.gmra.mxu0 %vm285_vm0, %v2953_v14 }
 0x5ea   : > { %v3168_v56 = vadd.f32 %v3136_v22, %v3072_v8  ;;  %v3151_v8 = vld [vmem:[%s4012_s12 + $0xc8] sm:$0xff] }
 0x5ec   : > { %3200 = vst.msk [vmem:[%s5660_s13 + $0x50] sm:$0xff] %vm285_vm0, %v3168_v56 }
 0x5ef   : > { %v3073_v54 = vpop.f32.mrf.mxu0 }
 0x5f0   : > { %v3074_v0 = vadd.f32 %v5622_v35, %v3073_v54 }
 0x5f2   : > { %v3169_v43 = vadd.f32 %v3137_v21, %v3074_v0  ;;  %v3156_v0 = vld [vmem:[%s4012_s12 + $0xf0] sm:$0xff] }
 0x5f4   : > { %3201 = vst.msk [vmem:[%s5660_s13 + $0x58] sm:$0xff] %vm285_vm0, %v3169_v43 }
 0x5f7   : > { %v3076_v50 = vpop.f32.mrf.mxu0 }
 0x5f8   : > { %v3077_v46 = vadd.f32 %v5622_v35, %v3076_v50 }
 0x5fa   : > { %v3170_v24 = vadd.f32 %v3138_v33, %v3077_v46  ;;  %v3155_v33 = vld [vmem:[%s4012_s12 + $0xe8] sm:$0xff] }
 0x5fc   : > { %3202 = vst.msk [vmem:[%s5660_s13 + $0x60] sm:$0xff] %vm285_vm0, %v3170_v24 }
 0x5ff   : > { %v3078_v62 = vpop.f32.mrf.mxu0 }
 0x600   : > { %v3079_v7 = vadd.f32 %v5622_v35, %v3078_v62 }
 0x602   : > { %v3171_v1 = vadd.f32 %v3139_v9, %v3079_v7  ;;  %v3152_v9 = vld [vmem:[%s4012_s12 + $0xd0] sm:$0xff] }
 0x604   : > { %3203 = vst.msk [vmem:[%s5660_s13 + $0x68] sm:$0xff] %vm285_vm0, %v3171_v1 }
 0x607   : > { %v3081_v15 = vpop.f32.mrf.mxu0 }
 0x608   : > { %v3082_v28 = vadd.f32 %v5622_v35, %v3081_v15 }
 0x60a   : > { %v3172_v57 = vadd.f32 %v3140_v23, %v3082_v28  ;;  %v3157_v28 = vld [vmem:[%s4012_s12 + $0xf8] sm:$0xff] }
 0x60c   : > { %3204 = vst.msk [vmem:[%s5660_s13 + $0x70] sm:$0xff] %vm285_vm0, %v3172_v57 }
 0x60f   : > { %v3083_v4 = vpop.f32.mrf.mxu0 }
 0x610   : > { %v3084_v45 = vadd.f32 %v5622_v35, %v3083_v4 }
 0x612   : > { %v3173_v13 = vadd.f32 %v3141_v41, %v3084_v45  ;;  %v3153_v45 = vld [vmem:[%s4012_s12 + $0xd8] sm:$0xff] }
 0x614   : > { %3205 = vst.msk [vmem:[%s5660_s13 + $0x78] sm:$0xff] %vm285_vm0, %v3173_v13 }
 0x617   : > { %v3086_v48 = vpop.f32.mrf.mxu0 }
 0x618   : > { %v3087_v59 = vadd.f32 %v5622_v35, %v3086_v48 }
 0x61a   : > { %v3174_v36 = vadd.f32 %v3142_v20, %v3087_v59 }
 0x61c   : > { %3206 = vst.msk [vmem:[%s5660_s13 + $0x80] sm:$0xff] %vm285_vm0, %v3174_v36 }
 0x61f   : > { %v3088_v5 = vpop.f32.mrf.mxu0 }
 0x620   : > { %v3089_v17 = vadd.f32 %v5622_v35, %v3088_v5 }
 0x622   : > { %v3175_v51 = vadd.f32 %v3143_v32, %v3089_v17 }
 0x624   : > { %3207 = vst.msk [vmem:[%s5660_s13 + $0x88] sm:$0xff] %vm285_vm0, %v3175_v51 }
 0x627   : > { %v3091_v63 = vpop.f32.mrf.mxu0 }
 0x628   : > { %v3092_v3 = vadd.f32 %v5622_v35, %v3091_v63 }
 0x62a   : > { %v3176_v6 = vadd.f32 %v3144_v25, %v3092_v3 }
 0x62c   : > { %3208 = vst.msk [vmem:[%s5660_s13 + $0x90] sm:$0xff] %vm285_vm0, %v3176_v6 }
 0x62f   : > { %v3093_v16 = vpop.f32.mrf.mxu0 }
 0x630   : > { %v3094_v49 = vadd.f32 %v5622_v35, %v3093_v16 }
 0x632   : > { %v3177_v12 = vadd.f32 %v3145_v55, %v3094_v49 }
 0x634   : > { %3209 = vst.msk [vmem:[%s5660_s13 + $0x98] sm:$0xff] %vm285_vm0, %v3177_v12 }
 0x637   : > { %v3096_v11 = vpop.f32.mrf.mxu0 }
 0x638   : > { %v3097_v37 = vadd.f32 %v5622_v35, %v3096_v11 }
 0x63a   : > { %v3178_v39 = vadd.f32 %v3146_v29, %v3097_v37 }
 0x63c   : > { %3210 = vst.msk [vmem:[%s5660_s13 + $0xa0] sm:$0xff] %vm285_vm0, %v3178_v39 }
 0x63f   : > { %v3098_v60 = vpop.f32.mrf.mxu0 }
 0x640   : > { %v3099_v26 = vadd.f32 %v5622_v35, %v3098_v60 }
 0x642   : > { %v3179_v27 = vadd.f32 %v3147_v44, %v3099_v26 }
 0x644   : > { %3211 = vst.msk [vmem:[%s5660_s13 + $0xa8] sm:$0xff] %vm285_vm0, %v3179_v27 }
 0x647   : > { %v3101_v30 = vpop.f32.mrf.mxu0 }
 0x648   : > { %v3102_v38 = vadd.f32 %v5622_v35, %v3101_v30 }
 0x64a   : > { %v3180_v19 = vadd.f32 %v3148_v52, %v3102_v38 }
 0x64c   : > { %3212 = vst.msk [vmem:[%s5660_s13 + $0xb0] sm:$0xff] %vm285_vm0, %v3180_v19 }
 0x64f   : > { %v3103_v2 = vpop.f32.mrf.mxu0 }
 0x650   : > { %v3104_v18 = vadd.f32 %v5622_v35, %v3103_v2 }
 0x652   : > { %v3181_v34 = vadd.f32 %v3149_v53, %v3104_v18 }
 0x654   : > { %3213 = vst.msk [vmem:[%s5660_s13 + $0xb8] sm:$0xff] %vm285_vm0, %v3181_v34 }
 0x657   : > { %v3106_v10 = vpop.f32.mrf.mxu0 }
 0x658   : > { %v3107_v58 = vadd.f32 %v5622_v35, %v3106_v10 }
 0x65a   : > { %v3182_v61 = vadd.f32 %v3150_v40, %v3107_v58 }
 0x65c   : > { %3214 = vst.msk [vmem:[%s5660_s13 + $0xc0] sm:$0xff] %vm285_vm0, %v3182_v61 }
 0x65f   : > { %v3108_v22 = vpop.f32.mrf.mxu0 }
 0x660   : > { %v3109_v56 = vadd.f32 %v5622_v35, %v3108_v22 }
 0x661   : > { %v3116_v42 = vpop.f32.mrf.mxu1 }
 0x662   : > { %v3117_v31 = vadd.f32 %v5622_v35, %v3116_v42  ;;  %v3183_v54 = vadd.f32 %v3151_v8, %v3109_v56 }
 0x664   : > { %v3186_v14 = vadd.f32 %v3154_v47, %v3117_v31  ;;  %3215 = vst.msk [vmem:[%s5660_s13 + $0xc8] sm:$0xff] %vm285_vm0, %v3183_v54 }
 0x666   : > { %3218 = vst.msk [vmem:[%s5660_s13 + $0xe0] sm:$0xff] %vm285_vm0, %v3186_v14 }
 0x667   : > { %v3121_v21 = vpop.f32.mrf.mxu2  ;;  %v3111_v62 = vpop.f32.mrf.mxu0 }
 0x668   : > { %v3122_v43 = vadd.f32 %v5622_v35, %v3121_v21  ;;  %v3112_v1 = vadd.f32 %v5622_v35, %v3111_v62 }
 0x669   : > { %v3118_v50 = vpop.f32.mrf.mxu1 }
 0x66a   : > { %v3188_v46 = vadd.f32 %v3156_v0, %v3122_v43  ;;  %v3119_v24 = vadd.f32 %v5622_v35, %v3118_v50  ;;  %v3184_v15 = vadd.f32 %v3152_v9, %v3112_v1 }
 0x66c   : > { %3220 = vst.msk [vmem:[%s5660_s13 + $0xf0] sm:$0xff] %vm285_vm0, %v3188_v46  ;;  %v3187_v7 = vadd.f32 %v3155_v33, %v3119_v24 }
 0x66d   : > { %3216 = vst.msk [vmem:[%s5660_s13 + $0xd0] sm:$0xff] %vm285_vm0, %v3184_v15 }
 0x66e   : > { %3219 = vst.msk [vmem:[%s5660_s13 + $0xe8] sm:$0xff] %vm285_vm0, %v3187_v7 }
 0x66f   : > { %v3123_v23 = vpop.f32.mrf.mxu2  ;;  %v3113_v41 = vpop.f32.mrf.mxu0 }
 0x670   : > { %v3124_v57 = vadd.f32 %v5622_v35, %v3123_v23  ;;  %v3114_v13 = vadd.f32 %v5622_v35, %v3113_v41 }
 0x672   : > { %v3189_v4 = vadd.f32 %v3157_v28, %v3124_v57  ;;  %v3185_v48 = vadd.f32 %v3153_v45, %v3114_v13 }
 0x674   : > { %3221 = vst.msk [vmem:[%s5660_s13 + $0xf8] sm:$0xff] %vm285_vm0, %v3189_v4 }
 0x675   : > { %3217 = vst.msk [vmem:[%s5660_s13 + $0xd8] sm:$0xff] %vm285_vm0, %v3185_v48 }
 0x676 PF: > { %s16_s21 = sadd.s32 1, %s3944_s21  }
 0x677   : > { %p13_p4 = scmp.ge.s32.totalorder %s16_s21, 4  }
 0x679   :  { %15 = sbr.rel (!%p13_p4) target bundleno = 1 (0x1), region = 76 }

</bundles_post_ra>
